<compile_context>
chip_gen: v6e
topology: v6e:2x2x1
jax: 0.10.0
libtpu: 0.0.40
codegen_flags: <defaults>
</compile_context>

<pallas_src>
import functools

import jax
import jax.numpy as jnp
from jax.experimental import pallas as pl
from jax.experimental.pallas import tpu as pltpu

VMEM_LIMIT = 32 * 1024 * 1024


def _round_up(x, m):
    return (x + m - 1) // m * m


# -----------------------------------------------------------------------------
# Pallas kernels
# -----------------------------------------------------------------------------
def _gemm_bias_relu_kernel(x_ref, w_ref, b_ref, o_ref):
    """o = relu(x @ w + b); bf16 operands, f32 MXU accumulate, bf16 out."""
    acc = jnp.dot(x_ref[...], w_ref[...], preferred_element_type=jnp.float32)
    acc = jnp.maximum(acc + b_ref[...], 0.0)
    o_ref[...] = acc.astype(o_ref.dtype)


def conv_gemm(patches, w, b, *, num_tiles=2):
    """im2col-GEMM for one conv layer: relu(patches @ w + b).

    Gridded over M (rows = B*OH*OW) so v7x shards the tiles across its two
    TensorCores; on v5e/v6e it is just a short pipelined loop.  M is padded to
    a multiple of 8 per tile (sublane alignment); K / N are full-array blocks.
    """
    M, K = patches.shape
    N = w.shape[1]
    tile_m = _round_up(pl.cdiv(M, num_tiles), 8)
    m_pad = tile_m * num_tiles
    if m_pad != M:
        patches = jnp.pad(patches, ((0, m_pad - M), (0, 0)))
    out = pl.pallas_call(
        _gemm_bias_relu_kernel,
        out_shape=jax.ShapeDtypeStruct((m_pad, N), jnp.bfloat16),
        grid=(num_tiles,),
        in_specs=[
            pl.BlockSpec((tile_m, K), lambda i: (i, 0)),
            pl.BlockSpec((K, N), lambda i: (0, 0)),
            pl.BlockSpec((1, N), lambda i: (0, 0)),
        ],
        out_specs=pl.BlockSpec((tile_m, N), lambda i: (i, 0)),
        compiler_params=pltpu.CompilerParams(
            dimension_semantics=("parallel",),
            vmem_limit_bytes=VMEM_LIMIT,
        ),
    )(patches, w, b)
    return out[:M] if m_pad != M else out


def _fc_heads_kernel(f_ref, wfc_ref, bfc_ref, wh_ref, bh_ref, o_ref):
    """Fused trunk-Linear + ReLU + (actor | critic) heads.

    hidden = relu(f @ Wfc + bfc)     [B, 512]  (f32 accumulate)
    o      = hidden @ Whead + bhead  [B, 128]  (single dot for both heads)
    """
    h = jnp.dot(f_ref[...], wfc_ref[...], preferred_element_type=jnp.float32)
    h = jnp.maximum(h + bfc_ref[...], 0.0)
    o = jnp.dot(h.astype(wh_ref.dtype), wh_ref[...],
                preferred_element_type=jnp.float32)
    o_ref[...] = o + bh_ref[...]


def fc_heads(feat, wfc, bfc, wh, bh):
    # TODO(synk): cross-call prefetch (pl.ANY + make_async_copy + semaphore
    #             output) of wfc could hide its HBM->VMEM DMA behind the conv
    #             stack; not implemented here.
    B = feat.shape[0]
    N = wh.shape[1]
    vmem = pl.BlockSpec(memory_space=pltpu.MemorySpace.VMEM)
    return pl.pallas_call(
        _fc_heads_kernel,
        out_shape=jax.ShapeDtypeStruct((B, N), jnp.float32),
        in_specs=[vmem] * 5,
        out_specs=vmem,
        compiler_params=pltpu.CompilerParams(vmem_limit_bytes=VMEM_LIMIT),
    )(feat, wfc, bfc, wh, bh)


# -----------------------------------------------------------------------------
# Glue: im2col (pure data reshuffle, jitted XLA)
# -----------------------------------------------------------------------------
def im2col_nhwc(x, kh, kw, stride):
    """x: [B, H, W, C] -> patches [B*OH*OW, KH*KW*C], K in (kh, kw, c) order.

    # TODO(synk): move patch extraction in-kernel (strided pl.ds window reads
    #             on a VMEM-resident activation) to drop the HBM patch matrix.
    """
    B, H, W, C = x.shape
    oh = (H - kh) // stride + 1
    ow = (W - kw) // stride + 1
    cols = []
    for i in range(kh):
        for j in range(kw):
            cols.append(
                x[:, i:i + (oh - 1) * stride + 1:stride,
                      j:j + (ow - 1) * stride + 1:stride, :])      # [B,oh,ow,C]
    cols = jnp.stack(cols, axis=3)                                  # [B,oh,ow,kh*kw,C]
    return cols.reshape(B * oh * ow, kh * kw * C), oh, ow


# -----------------------------------------------------------------------------
# Parameter construction (synthetic, PyTorch layout -> pre-packed for kernels)
# -----------------------------------------------------------------------------
def init_params(action_dim, key):
    ks = jax.random.split(key, 6)

    def w(k, shape, scale=1.0):
        fan_in = 1
        for d in shape[1:]:
            fan_in *= d
        return jax.random.normal(k, shape, jnp.float32) * (scale / jnp.sqrt(fan_in))

    hidden = 512  # see TODO(synk) at top of file
    conv1_w = w(ks[0], (32, 4, 8, 8));   conv1_b = jnp.zeros((32,), jnp.float32)
    conv2_w = w(ks[1], (64, 32, 4, 4));  conv2_b = jnp.zeros((64,), jnp.float32)
    conv3_w = w(ks[2], (64, 64, 3, 3));  conv3_b = jnp.zeros((64,), jnp.float32)
    fc_w = w(ks[3], (hidden, 64 * 7 * 7)); fc_b = jnp.zeros((hidden,), jnp.float32)
    actor_w = w(ks[4], (action_dim, hidden), scale=0.01)
    actor_b = jnp.zeros((action_dim,), jnp.float32)
    critic_w = w(ks[5], (1, hidden));    critic_b = jnp.zeros((1,), jnp.float32)

    def pack_conv(w_oihw):
        oc, ic, kh, kw = w_oihw.shape
        # (kh, kw, ic) K-order matches the NHWC im2col patch order.
        return (w_oihw.transpose(2, 3, 1, 0)
                .reshape(kh * kw * ic, oc).astype(jnp.bfloat16))

    # Permute fc input rows so (NHWC flatten) @ fc_mat == torch NCHW flatten @ fc_w.T
    fc_mat = (fc_w.reshape(hidden, 64, 7, 7)
              .transpose(2, 3, 1, 0)
              .reshape(7 * 7 * 64, hidden).astype(jnp.bfloat16))

    # One lane-dense [hidden, 128] head matrix: actor cols, then critic, then 0-pad.
    head_n = 128
    head_w = jnp.concatenate([actor_w, critic_w], axis=0).T         # [hidden, A+1]
    head_w = jnp.pad(head_w, ((0, 0), (0, head_n - (action_dim + 1))))
    head_b = jnp.pad(jnp.concatenate([actor_b, critic_b]),
                     (0, head_n - (action_dim + 1)))

    return {
        "conv1_w": pack_conv(conv1_w), "conv1_b": conv1_b.reshape(1, -1),
        "conv2_w": pack_conv(conv2_w), "conv2_b": conv2_b.reshape(1, -1),
        "conv3_w": pack_conv(conv3_w), "conv3_b": conv3_b.reshape(1, -1),
        "fc_w": fc_mat, "fc_b": fc_b.reshape(1, -1),
        "head_w": head_w.astype(jnp.bfloat16), "head_b": head_b.reshape(1, -1),
    }


# -----------------------------------------------------------------------------
# Forward pass (== ActorCriticNet.forward, jitted end-to-end)
# -----------------------------------------------------------------------------
def actor_critic_forward(params, state, sample_key, *, action_dim):
    """state: [B, 4, 84, 84] f32 NCHW.  Returns (action [B] int, value [B] f32)."""
    B = state.shape[0]
    x = jnp.transpose(state, (0, 2, 3, 1)).astype(jnp.bfloat16)      # NHWC, bf16

    p, oh, ow = im2col_nhwc(x, 8, 8, 4)
    x = conv_gemm(p, params["conv1_w"], params["conv1_b"]).reshape(B, oh, ow, -1)

    p, oh, ow = im2col_nhwc(x, 4, 4, 2)
    x = conv_gemm(p, params["conv2_w"], params["conv2_b"]).reshape(B, oh, ow, -1)

    p, oh, ow = im2col_nhwc(x, 3, 3, 1)
    x = conv_gemm(p, params["conv3_w"], params["conv3_b"]).reshape(B, oh, ow, -1)

    feat = x.reshape(B, -1)                 # NHWC flatten (fc rows pre-permuted)
    out = fc_heads(feat, params["fc_w"], params["fc_b"],
                   params["head_w"], params["head_b"])               # [B, 128] f32

    logits = out[:, :action_dim]
    value = out[:, action_dim]
    # Categorical(logits).sample() -- sampling glue, done with jax.random.
    action = jax.random.categorical(sample_key, logits, axis=-1)
    return action, value


# -----------------------------------------------------------------------------
if __name__ == "__main__":
    ACTION_DIM = 6
    BATCH = 2

    root = jax.random.PRNGKey(0)
    k_param, k_state, k_sample = jax.random.split(root, 3)

    params = init_params(ACTION_DIM, k_param)
    state = jax.random.uniform(k_state, (BATCH, 4, 84, 84), jnp.float32)

    fwd = jax.jit(functools.partial(actor_critic_forward, action_dim=ACTION_DIM))
    action, value = fwd(params, state, k_sample)
    jax.block_until_ready((action, value))

    assert action.shape == (BATCH,)
    assert value.shape == (BATCH,)
    print("KERNEL_OK")
</pallas_src>

<mosaic_0001>
module attributes {stable_mosaic.version = 11 : i64} {
  func.func @_gemm_bias_relu_kernel(%arg0: i32, %arg1: memref<400x256xbf16, #tpu.memory_space<vmem>>, %arg2: memref<256x32xbf16, #tpu.memory_space<vmem>>, %arg3: memref<1x32xf32, #tpu.memory_space<vmem>>, %arg4: memref<400x32xbf16, #tpu.memory_space<vmem>>) attributes {dimension_semantics = [#tpu.dimension_semantics<parallel>], iteration_bounds = array<i64: 2>, scalar_prefetch = 0 : i64, scratch_operands = 0 : i64, tpu.core_type = #tpu.core_type<tc>, window_params = [{transform_indices = @transform_0, window_bounds = array<i64: 400, 256>}, {pipeline_mode = #tpu.pipeline_mode<synchronous>, transform_indices = @transform_1, window_bounds = array<i64: 256, 32>}, {pipeline_mode = #tpu.pipeline_mode<synchronous>, transform_indices = @transform_2, window_bounds = array<i64: 1, 32>}, {transform_indices = @transform_3, window_bounds = array<i64: 400, 32>}]} {
    %c0 = arith.constant 0 : index
    %c0_0 = arith.constant 0 : index
    %0 = vector.load %arg1[%c0, %c0_0] : memref<400x256xbf16, #tpu.memory_space<vmem>>, vector<400x256xbf16>
    %c0_1 = arith.constant 0 : index
    %c0_2 = arith.constant 0 : index
    %1 = vector.load %arg2[%c0_1, %c0_2] : memref<256x32xbf16, #tpu.memory_space<vmem>>, vector<256x32xbf16>
    %cst = arith.constant dense<0.000000e+00> : vector<400x32xf32>
    %2 = tpu.matmul %0, %1, %cst {dimension_numbers = #tpu.dot_dimension_numbers<[1], [0], [0], [1], [0, 0, 1, 1], [], []>} : vector<400x256xbf16>, vector<256x32xbf16>, vector<400x32xf32> -> vector<400x32xf32>
    %c0_3 = arith.constant 0 : index
    %c0_4 = arith.constant 0 : index
    %3 = vector.load %arg3[%c0_3, %c0_4] : memref<1x32xf32, #tpu.memory_space<vmem>>, vector<1x32xf32>
    %4 = vector.broadcast %3 : vector<1x32xf32> to vector<400x32xf32>
    %5 = arith.addf %2, %4 : vector<400x32xf32>
    %cst_5 = arith.constant 0.000000e+00 : f32
    %6 = vector.broadcast %cst_5 : f32 to vector<400x32xf32>
    %7 = arith.maximumf %5, %6 : vector<400x32xf32>
    %8 = arith.truncf %7 : vector<400x32xf32> to vector<400x32xbf16>
    %c0_6 = arith.constant 0 : index
    %c0_7 = arith.constant 0 : index
    %9 = vector.load %arg4[%c0_6, %c0_7] : memref<400x32xbf16, #tpu.memory_space<vmem>>, vector<400x32xbf16>
    tpu.vector_store %arg4[%c0_6, %c0_7], %8 {strides = array<i32>} : memref<400x32xbf16, #tpu.memory_space<vmem>>, vector<400x32xbf16>,
    return
  }
  func.func @transform_0(%arg0: i32) -> (i32, i32) {
    %c0_i32 = arith.constant 0 : i32
    %c0_i32_0 = arith.constant 0 : i32
    return %arg0, %c0_i32 : i32, i32
  }
  func.func @transform_1(%arg0: i32) -> (i32, i32) {
    %c0_i32 = arith.constant 0 : i32
    %c0_i32_0 = arith.constant 0 : i32
    %c0_i32_1 = arith.constant 0 : i32
    return %c0_i32, %c0_i32_0 : i32, i32
  }
  func.func @transform_2(%arg0: i32) -> (i32, i32) {
    %c0_i32 = arith.constant 0 : i32
    %c0_i32_0 = arith.constant 0 : i32
    %c0_i32_1 = arith.constant 0 : i32
    return %c0_i32, %c0_i32_0 : i32, i32
  }
  func.func @transform_3(%arg0: i32) -> (i32, i32) {
    %c0_i32 = arith.constant 0 : i32
    %c0_i32_0 = arith.constant 0 : i32
    return %arg0, %c0_i32 : i32, i32
  }
}

module attributes {stable_mosaic.version = 11 : i64} {
  func.func @_gemm_bias_relu_kernel(%arg0: i32, %arg1: memref<88x512xbf16, #tpu.memory_space<vmem>>, %arg2: memref<512x64xbf16, #tpu.memory_space<vmem>>, %arg3: memref<1x64xf32, #tpu.memory_space<vmem>>, %arg4: memref<88x64xbf16, #tpu.memory_space<vmem>>) attributes {dimension_semantics = [#tpu.dimension_semantics<parallel>], iteration_bounds = array<i64: 2>, scalar_prefetch = 0 : i64, scratch_operands = 0 : i64, tpu.core_type = #tpu.core_type<tc>, window_params = [{transform_indices = @transform_0, window_bounds = array<i64: 88, 512>}, {pipeline_mode = #tpu.pipeline_mode<synchronous>, transform_indices = @transform_1, window_bounds = array<i64: 512, 64>}, {pipeline_mode = #tpu.pipeline_mode<synchronous>, transform_indices = @transform_2, window_bounds = array<i64: 1, 64>}, {transform_indices = @transform_3, window_bounds = array<i64: 88, 64>}]} {
    %c0 = arith.constant 0 : index
    %c0_0 = arith.constant 0 : index
    %0 = vector.load %arg1[%c0, %c0_0] : memref<88x512xbf16, #tpu.memory_space<vmem>>, vector<88x512xbf16>
    %c0_1 = arith.constant 0 : index
    %c0_2 = arith.constant 0 : index
    %1 = vector.load %arg2[%c0_1, %c0_2] : memref<512x64xbf16, #tpu.memory_space<vmem>>, vector<512x64xbf16>
    %cst = arith.constant dense<0.000000e+00> : vector<88x64xf32>
    %2 = tpu.matmul %0, %1, %cst {dimension_numbers = #tpu.dot_dimension_numbers<[1], [0], [0], [1], [0, 0, 1, 1], [], []>} : vector<88x512xbf16>, vector<512x64xbf16>, vector<88x64xf32> -> vector<88x64xf32>
    %c0_3 = arith.constant 0 : index
    %c0_4 = arith.constant 0 : index
    %3 = vector.load %arg3[%c0_3, %c0_4] : memref<1x64xf32, #tpu.memory_space<vmem>>, vector<1x64xf32>
    %4 = vector.broadcast %3 : vector<1x64xf32> to vector<88x64xf32>
    %5 = arith.addf %2, %4 : vector<88x64xf32>
    %cst_5 = arith.constant 0.000000e+00 : f32
    %6 = vector.broadcast %cst_5 : f32 to vector<88x64xf32>
    %7 = arith.maximumf %5, %6 : vector<88x64xf32>
    %8 = arith.truncf %7 : vector<88x64xf32> to vector<88x64xbf16>
    %c0_6 = arith.constant 0 : index
    %c0_7 = arith.constant 0 : index
    %9 = vector.load %arg4[%c0_6, %c0_7] : memref<88x64xbf16, #tpu.memory_space<vmem>>, vector<88x64xbf16>
    tpu.vector_store %arg4[%c0_6, %c0_7], %8 {strides = array<i32>} : memref<88x64xbf16, #tpu.memory_space<vmem>>, vector<88x64xbf16>,
    return
  }
  func.func @transform_0(%arg0: i32) -> (i32, i32) {
    %c0_i32 = arith.constant 0 : i32
    %c0_i32_0 = arith.constant 0 : i32
    return %arg0, %c0_i32 : i32, i32
  }
  func.func @transform_1(%arg0: i32) -> (i32, i32) {
    %c0_i32 = arith.constant 0 : i32
    %c0_i32_0 = arith.constant 0 : i32
    %c0_i32_1 = arith.constant 0 : i32
    return %c0_i32, %c0_i32_0 : i32, i32
  }
  func.func @transform_2(%arg0: i32) -> (i32, i32) {
    %c0_i32 = arith.constant 0 : i32
    %c0_i32_0 = arith.constant 0 : i32
    %c0_i32_1 = arith.constant 0 : i32
    return %c0_i32, %c0_i32_0 : i32, i32
  }
  func.func @transform_3(%arg0: i32) -> (i32, i32) {
    %c0_i32 = arith.constant 0 : i32
    %c0_i32_0 = arith.constant 0 : i32
    return %arg0, %c0_i32 : i32, i32
  }
}

module attributes {stable_mosaic.version = 11 : i64} {
  func.func @_gemm_bias_relu_kernel(%arg0: i32, %arg1: memref<56x576xbf16, #tpu.memory_space<vmem>>, %arg2: memref<576x64xbf16, #tpu.memory_space<vmem>>, %arg3: memref<1x64xf32, #tpu.memory_space<vmem>>, %arg4: memref<56x64xbf16, #tpu.memory_space<vmem>>) attributes {dimension_semantics = [#tpu.dimension_semantics<parallel>], iteration_bounds = array<i64: 2>, scalar_prefetch = 0 : i64, scratch_operands = 0 : i64, tpu.core_type = #tpu.core_type<tc>, window_params = [{transform_indices = @transform_0, window_bounds = array<i64: 56, 576>}, {pipeline_mode = #tpu.pipeline_mode<synchronous>, transform_indices = @transform_1, window_bounds = array<i64: 576, 64>}, {pipeline_mode = #tpu.pipeline_mode<synchronous>, transform_indices = @transform_2, window_bounds = array<i64: 1, 64>}, {transform_indices = @transform_3, window_bounds = array<i64: 56, 64>}]} {
    %c0 = arith.constant 0 : index
    %c0_0 = arith.constant 0 : index
    %0 = vector.load %arg1[%c0, %c0_0] : memref<56x576xbf16, #tpu.memory_space<vmem>>, vector<56x576xbf16>
    %c0_1 = arith.constant 0 : index
    %c0_2 = arith.constant 0 : index
    %1 = vector.load %arg2[%c0_1, %c0_2] : memref<576x64xbf16, #tpu.memory_space<vmem>>, vector<576x64xbf16>
    %cst = arith.constant dense<0.000000e+00> : vector<56x64xf32>
    %2 = tpu.matmul %0, %1, %cst {dimension_numbers = #tpu.dot_dimension_numbers<[1], [0], [0], [1], [0, 0, 1, 1], [], []>} : vector<56x576xbf16>, vector<576x64xbf16>, vector<56x64xf32> -> vector<56x64xf32>
    %c0_3 = arith.constant 0 : index
    %c0_4 = arith.constant 0 : index
    %3 = vector.load %arg3[%c0_3, %c0_4] : memref<1x64xf32, #tpu.memory_space<vmem>>, vector<1x64xf32>
    %4 = vector.broadcast %3 : vector<1x64xf32> to vector<56x64xf32>
    %5 = arith.addf %2, %4 : vector<56x64xf32>
    %cst_5 = arith.constant 0.000000e+00 : f32
    %6 = vector.broadcast %cst_5 : f32 to vector<56x64xf32>
    %7 = arith.maximumf %5, %6 : vector<56x64xf32>
    %8 = arith.truncf %7 : vector<56x64xf32> to vector<56x64xbf16>
    %c0_6 = arith.constant 0 : index
    %c0_7 = arith.constant 0 : index
    %9 = vector.load %arg4[%c0_6, %c0_7] : memref<56x64xbf16, #tpu.memory_space<vmem>>, vector<56x64xbf16>
    tpu.vector_store %arg4[%c0_6, %c0_7], %8 {strides = array<i32>} : memref<56x64xbf16, #tpu.memory_space<vmem>>, vector<56x64xbf16>,
    return
  }
  func.func @transform_0(%arg0: i32) -> (i32, i32) {
    %c0_i32 = arith.constant 0 : i32
    %c0_i32_0 = arith.constant 0 : i32
    return %arg0, %c0_i32 : i32, i32
  }
  func.func @transform_1(%arg0: i32) -> (i32, i32) {
    %c0_i32 = arith.constant 0 : i32
    %c0_i32_0 = arith.constant 0 : i32
    %c0_i32_1 = arith.constant 0 : i32
    return %c0_i32, %c0_i32_0 : i32, i32
  }
  func.func @transform_2(%arg0: i32) -> (i32, i32) {
    %c0_i32 = arith.constant 0 : i32
    %c0_i32_0 = arith.constant 0 : i32
    %c0_i32_1 = arith.constant 0 : i32
    return %c0_i32, %c0_i32_0 : i32, i32
  }
  func.func @transform_3(%arg0: i32) -> (i32, i32) {
    %c0_i32 = arith.constant 0 : i32
    %c0_i32_0 = arith.constant 0 : i32
    return %arg0, %c0_i32 : i32, i32
  }
}

module attributes {stable_mosaic.version = 11 : i64} {
  func.func @_fc_heads_kernel(%arg0: memref<2x3136xbf16, #tpu.memory_space<vmem>>, %arg1: memref<3136x512xbf16, #tpu.memory_space<vmem>>, %arg2: memref<1x512xf32, #tpu.memory_space<vmem>>, %arg3: memref<512x128xbf16, #tpu.memory_space<vmem>>, %arg4: memref<1x128xf32, #tpu.memory_space<vmem>>, %arg5: memref<2x128xf32, #tpu.memory_space<vmem>>) attributes {dimension_semantics = [], scalar_prefetch = 0 : i64, scratch_operands = 0 : i64, tpu.core_type = #tpu.core_type<tc>} {
    %c0 = arith.constant 0 : index
    %c0_0 = arith.constant 0 : index
    %0 = vector.load %arg0[%c0, %c0_0] : memref<2x3136xbf16, #tpu.memory_space<vmem>>, vector<2x3136xbf16>
    %c0_1 = arith.constant 0 : index
    %c0_2 = arith.constant 0 : index
    %1 = vector.load %arg1[%c0_1, %c0_2] : memref<3136x512xbf16, #tpu.memory_space<vmem>>, vector<3136x512xbf16>
    %cst = arith.constant dense<0.000000e+00> : vector<2x512xf32>
    %2 = tpu.matmul %0, %1, %cst {dimension_numbers = #tpu.dot_dimension_numbers<[1], [0], [0], [1], [0, 0, 1, 1], [], []>} : vector<2x3136xbf16>, vector<3136x512xbf16>, vector<2x512xf32> -> vector<2x512xf32>
    %c0_3 = arith.constant 0 : index
    %c0_4 = arith.constant 0 : index
    %3 = vector.load %arg2[%c0_3, %c0_4] : memref<1x512xf32, #tpu.memory_space<vmem>>, vector<1x512xf32>
    %4 = vector.broadcast %3 : vector<1x512xf32> to vector<2x512xf32>
    %5 = arith.addf %2, %4 : vector<2x512xf32>
    %cst_5 = arith.constant 0.000000e+00 : f32
    %6 = vector.broadcast %cst_5 : f32 to vector<2x512xf32>
    %7 = arith.maximumf %5, %6 : vector<2x512xf32>
    %8 = arith.truncf %7 : vector<2x512xf32> to vector<2x512xbf16>
    %c0_6 = arith.constant 0 : index
    %c0_7 = arith.constant 0 : index
    %9 = vector.load %arg3[%c0_6, %c0_7] : memref<512x128xbf16, #tpu.memory_space<vmem>>, vector<512x128xbf16>
    %cst_8 = arith.constant dense<0.000000e+00> : vector<2x128xf32>
    %10 = tpu.matmul %8, %9, %cst_8 {dimension_numbers = #tpu.dot_dimension_numbers<[1], [0], [0], [1], [0, 0, 1, 1], [], []>} : vector<2x512xbf16>, vector<512x128xbf16>, vector<2x128xf32> -> vector<2x128xf32>
    %c0_9 = arith.constant 0 : index
    %c0_10 = arith.constant 0 : index
    %11 = vector.load %arg4[%c0_9, %c0_10] : memref<1x128xf32, #tpu.memory_space<vmem>>, vector<1x128xf32>
    %12 = vector.broadcast %11 : vector<1x128xf32> to vector<2x128xf32>
    %13 = arith.addf %10, %12 : vector<2x128xf32>
    %c0_11 = arith.constant 0 : index
    %c0_12 = arith.constant 0 : index
    %14 = vector.load %arg5[%c0_11, %c0_12] : memref<2x128xf32, #tpu.memory_space<vmem>>, vector<2x128xf32>
    tpu.vector_store %arg5[%c0_11, %c0_12], %13 {strides = array<i32>} : memref<2x128xf32, #tpu.memory_space<vmem>>, vector<2x128xf32>,
    return
  }
}

</mosaic_0001>

<bundles_post_ra>
// kernel: actor_critic_forward.4
= control target key start
LH: loop header
LB: loop body
LE: loop exit
PB: predicated region body
PF: predicated region fallthrough
CT: control target
= control target key end

     0   :  { %s1542_s12 = smov 0   ;;  %s1852_s0 = inlined_call_operand.vmem [shape: bf16[800,256], index: 0, kind: input, shape index: {}]   ;;  %s1853_s1 = inlined_call_operand.vmem [shape: bf16[256,32], index: 1, kind: input, shape index: {}]   ;;  %s1854_s2 = inlined_call_operand.vmem [shape: f32[1,32], index: 2, kind: input, shape index: {}]   ;;  %s1855_s3 = inlined_call_operand.vmem [shape: bf16[800,32], index: 3, kind: output, shape index: {}]  }
   0x1 LB: > { %s1203_s13 = sadd.s32 4294967295, %s1519_s12   ;;  %p1207_p0 = scmp.ge.s32.totalorder %s1519_s12, 1  ;;  %s1519_s12 = sphi %s1542_s12, %s13_s12  }
   0x2   : > { %p139_p1 = scmp.lt.s32.totalorder %s1519_s12, 3 }
   0x4   : > { %p140_p2 = pnand %p1207_p0, %p139_p1 }
   0x5   : > { %s164_s16 = smul.u32 (!%p140_p2), 50, %s1203_s13 }
   0x6   : > { %143 = sbr.rel (%p140_p2) target bundleno = 376 (0x178), region = 32 }
   0x7   : > { %p165_p3 = scmp.lt.s32.totalorder (!%p140_p2), %s164_s16, 99 }
   0xb   : > { %v1422_v0 = vld [vmem:[%s1853_s1 + $0x38] sm:$0xff]   ;;  %v1521_v1 = vmov 0   ;;  %v1423_v2 = vld [vmem:[%s1853_s1 + $0x30] sm:$0xff]   ;;  %v1424_v3 = vld [vmem:[%s1853_s1 + $0x28] sm:$0xff]   ;;  %s1857_s16 = smov (!%p165_p3, %s164_s16), 99  ;;  %vm1096_vm0 = vcmask 257024  }
   0xc   : > { %613 = vmatprep.subr.bf16.mxu0 %v1521_v1  ;;  %1381 = vmatprep.subr.bf16.mxu1 %v1521_v1  ;;  %v1425_v4 = vld [vmem:[%s1853_s1 + $0x20] sm:$0xff]   ;;  %s1330_s23 = sshll.u32 %s1857_s16, 3  ;;  %v1426_v5 = vld [vmem:[%s1853_s1 + $0x18] sm:$0xff]   ;;  %v1427_v7 = vld [vmem:[%s1853_s1 + $0x10] sm:$0xff]   ;;  %s1210_s29 = sshll.u32 %s1857_s16, 2 }
   0xd   : > { %614 = vmatpush1.bf16.msra.mxu0 %v1422_v0  ;;  %1397 = vmatpush1.bf16.msra.mxu1 %v1422_v0  ;;  %s1579_s28 = scalar_lea.vmem %s1852_s0, %s1330_s23  ;;  %v1428_v9 = vld [vmem:[%s1853_s1 + $0x8] sm:$0xff]   ;;  %v1429_v10 = vld [vmem:[%s1853_s1] sm:$0xff]   ;;  %v1430_v11 = vld [vmem:[%s1853_s1 + $0x78] sm:$0xff]  }
   0xe   : > { %615 = vmatprep.subr.bf16.mxu0 %v1521_v1  ;;  %1382 = vmatprep.subr.bf16.mxu1 %v1521_v1  ;;  %v1440_v6 = vld [vmem:[%s1579_s28 + $0x4] ss:$8 sps:$4 sm:$0xff]   ;;  %v1443_v8 = vld [vmem:[%s1579_s28 + $0xd4] ss:$8 sps:$4 sm:$0xff]   ;;  %v1438_v19 = vld [vmem:[%s1579_s28] ss:$8 sps:$4 sm:$0xff]  }
   0xf   : > { %645 = vmatprep.mubr.bf16.mxu0 %v1440_v6  ;;  %749 = vmatprep.mubr.bf16.mxu1 %v1443_v8  ;;  %v1431_v12 = vld [vmem:[%s1853_s1 + $0x70] sm:$0xff]   ;;  %v1432_v13 = vld [vmem:[%s1853_s1 + $0x68] sm:$0xff]   ;;  %v1433_v14 = vld [vmem:[%s1853_s1 + $0x60] sm:$0xff]  }
  0x10   : > { %v1434_v15 = vld [vmem:[%s1853_s1 + $0x58] sm:$0xff]   ;;  %v1435_v16 = vld [vmem:[%s1853_s1 + $0x50] sm:$0xff]   ;;  %v1436_v17 = vld [vmem:[%s1853_s1 + $0x48] sm:$0xff]  }
  0x11   : > { %616 = vmatpush1.bf16.msra.mxu0 %v1423_v2  ;;  %1398 = vmatpush1.bf16.msra.mxu1 %v1423_v2  ;;  %v1437_v18 = vld [vmem:[%s1853_s1 + $0x40] sm:$0xff]   ;;  %v1441_v20 = vld [vmem:[%s1579_s28 + $0xd0] ss:$8 sps:$4 sm:$0xff]   ;;  %v1444_v21 = vld [vmem:[%s1579_s28 + $0x14] ss:$8 sps:$4 sm:$0xff]  }
  0x12   : > { %617 = vmatprep.subr.bf16.mxu0 %v1521_v1  ;;  %1383 = vmatprep.subr.bf16.mxu1 %v1521_v1  ;;  %v1447_v22 = vld [vmem:[%s1579_s28 + $0xe4] ss:$8 sps:$4 sm:$0xff]   ;;  %v1446_v23 = vld [vmem:[%s1579_s28 + $0x10] ss:$8 sps:$4 sm:$0xff]   ;;  %v1449_v24 = vld [vmem:[%s1579_s28 + $0xe0] ss:$8 sps:$4 sm:$0xff]  }
  0x13   : > { %v1450_v25 = vld [vmem:[%s1579_s28 + $0x24] ss:$8 sps:$4 sm:$0xff]   ;;  %v1453_v26 = vld [vmem:[%s1579_s28 + $0xf4] ss:$8 sps:$4 sm:$0xff]   ;;  %v1452_v27 = vld [vmem:[%s1579_s28 + $0x20] ss:$8 sps:$4 sm:$0xff]  }
  0x14   : > { %v1455_v28 = vld [vmem:[%s1579_s28 + $0xf0] ss:$8 sps:$4 sm:$0xff]   ;;  %v1456_v29 = vld [vmem:[%s1579_s28 + $0x34] ss:$8 sps:$4 sm:$0xff]   ;;  %v1459_v30 = vld [vmem:[%s1579_s28 + $0x104] ss:$8 sps:$4 sm:$0xff]  }
  0x15   : > { %618 = vmatpush1.bf16.msra.mxu0 %v1424_v3  ;;  %1399 = vmatpush1.bf16.msra.mxu1 %v1424_v3  ;;  %v1458_v31 = vld [vmem:[%s1579_s28 + $0x30] ss:$8 sps:$4 sm:$0xff]   ;;  %v1461_v32 = vld [vmem:[%s1579_s28 + $0x100] ss:$8 sps:$4 sm:$0xff]   ;;  %v1462_v33 = vld [vmem:[%s1579_s28 + $0x44] ss:$8 sps:$4 sm:$0xff]  }
  0x16   : > { %619 = vmatprep.subr.bf16.mxu0 %v1521_v1  ;;  %1384 = vmatprep.subr.bf16.mxu1 %v1521_v1  ;;  %v1465_v34 = vld [vmem:[%s1579_s28 + $0x114] ss:$8 sps:$4 sm:$0xff]   ;;  %v1464_v35 = vld [vmem:[%s1579_s28 + $0x40] ss:$8 sps:$4 sm:$0xff]   ;;  %v1467_v36 = vld [vmem:[%s1579_s28 + $0x110] ss:$8 sps:$4 sm:$0xff]  }
  0x17   : > { %v1468_v37 = vld [vmem:[%s1579_s28 + $0x54] ss:$8 sps:$4 sm:$0xff]   ;;  %v1471_v38 = vld [vmem:[%s1579_s28 + $0x124] ss:$8 sps:$4 sm:$0xff]   ;;  %v1470_v39 = vld [vmem:[%s1579_s28 + $0x50] ss:$8 sps:$4 sm:$0xff]  }
  0x18   : > { %v1473_v40 = vld [vmem:[%s1579_s28 + $0x120] ss:$8 sps:$4 sm:$0xff]   ;;  %v1474_v41 = vld [vmem:[%s1579_s28 + $0x64] ss:$8 sps:$4 sm:$0xff]   ;;  %v1477_v42 = vld [vmem:[%s1579_s28 + $0x134] ss:$8 sps:$4 sm:$0xff]  }
  0x19   : > { %620 = vmatpush1.bf16.msra.mxu0 %v1425_v4  ;;  %1400 = vmatpush1.bf16.msra.mxu1 %v1425_v4  ;;  %v1476_v43 = vld [vmem:[%s1579_s28 + $0x60] ss:$8 sps:$4 sm:$0xff]   ;;  %v1479_v44 = vld [vmem:[%s1579_s28 + $0x130] ss:$8 sps:$4 sm:$0xff]   ;;  %v1480_v45 = vld [vmem:[%s1579_s28 + $0x74] ss:$8 sps:$4 sm:$0xff]  }
  0x1a   : > { %621 = vmatprep.subr.bf16.mxu0 %v1521_v1  ;;  %1385 = vmatprep.subr.bf16.mxu1 %v1521_v1  ;;  %v1483_v46 = vld [vmem:[%s1579_s28 + $0x144] ss:$8 sps:$4 sm:$0xff]   ;;  %v1482_v47 = vld [vmem:[%s1579_s28 + $0x70] ss:$8 sps:$4 sm:$0xff]   ;;  %v1485_v48 = vld [vmem:[%s1579_s28 + $0x140] ss:$8 sps:$4 sm:$0xff]  }
  0x1b   : > { %v1486_v49 = vld [vmem:[%s1579_s28 + $0x84] ss:$8 sps:$4 sm:$0xff]   ;;  %v1489_v50 = vld [vmem:[%s1579_s28 + $0x154] ss:$8 sps:$4 sm:$0xff]   ;;  %v1488_v51 = vld [vmem:[%s1579_s28 + $0x80] ss:$8 sps:$4 sm:$0xff]  }
  0x1c   : > { %v1491_v52 = vld [vmem:[%s1579_s28 + $0x150] ss:$8 sps:$4 sm:$0xff]   ;;  %v1492_v53 = vld [vmem:[%s1579_s28 + $0x94] ss:$8 sps:$4 sm:$0xff]   ;;  %v1495_v54 = vld [vmem:[%s1579_s28 + $0x164] ss:$8 sps:$4 sm:$0xff]  }
  0x1d   : > { %622 = vmatpush1.bf16.msra.mxu0 %v1426_v5  ;;  %1401 = vmatpush1.bf16.msra.mxu1 %v1426_v5  ;;  %v1494_v55 = vld [vmem:[%s1579_s28 + $0x90] ss:$8 sps:$4 sm:$0xff]   ;;  %v1497_v56 = vld [vmem:[%s1579_s28 + $0x160] ss:$8 sps:$4 sm:$0xff]   ;;  %v1498_v57 = vld [vmem:[%s1579_s28 + $0xa4] ss:$8 sps:$4 sm:$0xff]  }
  0x1e   : > { %623 = vmatprep.subr.bf16.mxu0 %v1521_v1  ;;  %1386 = vmatprep.subr.bf16.mxu1 %v1521_v1  ;;  %v1501_v58 = vld [vmem:[%s1579_s28 + $0x174] ss:$8 sps:$4 sm:$0xff]   ;;  %v1500_v59 = vld [vmem:[%s1579_s28 + $0xa0] ss:$8 sps:$4 sm:$0xff]   ;;  %v1503_v60 = vld [vmem:[%s1579_s28 + $0x170] ss:$8 sps:$4 sm:$0xff]  }
  0x1f   : > { %v1504_v61 = vld [vmem:[%s1579_s28 + $0xb4] ss:$8 sps:$4 sm:$0xff]   ;;  %v1507_v62 = vld [vmem:[%s1579_s28 + $0x184] ss:$8 sps:$4 sm:$0xff]   ;;  %v1506_v63 = vld [vmem:[%s1579_s28 + $0xb0] ss:$8 sps:$4 sm:$0xff]  }
  0x20   : > { %v1509_v0 = vld [vmem:[%s1579_s28 + $0x180] ss:$8 sps:$4 sm:$0xff]  }
  0x21   : > { %624 = vmatpush1.bf16.msra.mxu0 %v1427_v7  ;;  %1402 = vmatpush1.bf16.msra.mxu1 %v1427_v7  ;;  %v1512_v2 = vld [vmem:[%s1579_s28 + $0xc0] ss:$8 sps:$4 sm:$0xff]  }
  0x22   : > { %625 = vmatprep.subr.bf16.mxu0 %v1521_v1  ;;  %1387 = vmatprep.subr.bf16.mxu1 %v1521_v1  ;;  %v1691_v3 = vld [vmem:[%s1854_s2] ss:$0 sm:$0xff] }
  0x25   : > { %626 = vmatpush1.bf16.msra.mxu0 %v1428_v9  ;;  %1403 = vmatpush1.bf16.msra.mxu1 %v1428_v9 }
  0x26   : > { %627 = vmatprep.subr.bf16.mxu0 %v1521_v1  ;;  %1388 = vmatprep.subr.bf16.mxu1 %v1521_v1 }
  0x29   : > { %628 = vmatpush1.bf16.msra.mxu0 %v1429_v10  ;;  %1404 = vmatpush1.bf16.msra.mxu1 %v1429_v10 }
  0x2a   : > { %629 = vmatprep.subr.bf16.mxu0 %v1521_v1  ;;  %1389 = vmatprep.subr.bf16.mxu1 %v1521_v1 }
  0x2d   : > { %630 = vmatpush2.bf16.msra.mxu0 %v1430_v11  ;;  %1405 = vmatpush2.bf16.msra.mxu1 %v1430_v11 }
  0x2e   : > { %631 = vmatprep.subr.bf16.mxu0 %v1521_v1  ;;  %1390 = vmatprep.subr.bf16.mxu1 %v1521_v1 }
  0x31   : > { %632 = vmatpush2.bf16.msra.mxu0 %v1431_v12  ;;  %1406 = vmatpush2.bf16.msra.mxu1 %v1431_v12 }
  0x32   : > { %633 = vmatprep.subr.bf16.mxu0 %v1521_v1  ;;  %1391 = vmatprep.subr.bf16.mxu1 %v1521_v1 }
  0x35   : > { %634 = vmatpush2.bf16.msra.mxu0 %v1432_v13  ;;  %1407 = vmatpush2.bf16.msra.mxu1 %v1432_v13 }
  0x36   : > { %635 = vmatprep.subr.bf16.mxu0 %v1521_v1  ;;  %1392 = vmatprep.subr.bf16.mxu1 %v1521_v1 }
  0x39   : > { %636 = vmatpush2.bf16.msra.mxu0 %v1433_v14  ;;  %1408 = vmatpush2.bf16.msra.mxu1 %v1433_v14 }
  0x3a   : > { %637 = vmatprep.subr.bf16.mxu0 %v1521_v1  ;;  %1393 = vmatprep.subr.bf16.mxu1 %v1521_v1 }
  0x3d   : > { %638 = vmatpush2.bf16.msra.mxu0 %v1434_v15  ;;  %1409 = vmatpush2.bf16.msra.mxu1 %v1434_v15 }
  0x3e   : > { %639 = vmatprep.subr.bf16.mxu0 %v1521_v1  ;;  %1394 = vmatprep.subr.bf16.mxu1 %v1521_v1 }
  0x41   : > { %640 = vmatpush2.bf16.msra.mxu0 %v1435_v16  ;;  %1410 = vmatpush2.bf16.msra.mxu1 %v1435_v16 }
  0x42   : > { %641 = vmatprep.subr.bf16.mxu0 %v1521_v1  ;;  %1395 = vmatprep.subr.bf16.mxu1 %v1521_v1 }
  0x45   : > { %642 = vmatpush2.bf16.msra.mxu0 %v1436_v17  ;;  %1411 = vmatpush2.bf16.msra.mxu1 %v1436_v17 }
  0x46   : > { %643 = vmatprep.subr.bf16.mxu0 %v1521_v1  ;;  %1396 = vmatprep.subr.bf16.mxu1 %v1521_v1  ;;  %v1510_v1 = vld [vmem:[%s1579_s28 + $0xc4] ss:$8 sps:$4 sm:$0xff]   ;;  %s1699_s28 = scalar_lea.vmem %s1855_s3, %s1210_s29 }
  0x49   : > { %644 = vmatpush2.bf16.msra.mxu0 %v1437_v18  ;;  %1412 = vmatpush2.bf16.msra.mxu1 %v1437_v18 }
  0x4c   : > { %646 = vmatmul.mubr.bf16.vlgmr.msra.gmra.mxu0 %v1438_v19  ;;  %750 = vmatmul.mubr.bf16.vlgmr.msra.gmra.mxu1 %v1441_v20 }
  0x4d   : > { %653 = vmatprep.mubr.bf16.mxu0 %v1444_v21  ;;  %757 = vmatprep.mubr.bf16.mxu1 %v1447_v22 }
  0x54   : > { %654 = vmatmul.mubr.bf16.gmra.mxu0 %v1446_v23  ;;  %758 = vmatmul.mubr.bf16.gmra.mxu1 %v1449_v24 }
  0x55   : > { %661 = vmatprep.mubr.bf16.mxu0 %v1450_v25  ;;  %765 = vmatprep.mubr.bf16.mxu1 %v1453_v26 }
  0x5c   : > { %662 = vmatmul.mubr.bf16.gmra.mxu0 %v1452_v27  ;;  %766 = vmatmul.mubr.bf16.gmra.mxu1 %v1455_v28 }
  0x5d   : > { %669 = vmatprep.mubr.bf16.mxu0 %v1456_v29  ;;  %773 = vmatprep.mubr.bf16.mxu1 %v1459_v30 }
  0x64   : > { %670 = vmatmul.mubr.bf16.gmra.mxu0 %v1458_v31  ;;  %774 = vmatmul.mubr.bf16.gmra.mxu1 %v1461_v32 }
  0x65   : > { %677 = vmatprep.mubr.bf16.mxu0 %v1462_v33  ;;  %781 = vmatprep.mubr.bf16.mxu1 %v1465_v34 }
  0x6c   : > { %678 = vmatmul.mubr.bf16.gmra.mxu0 %v1464_v35  ;;  %782 = vmatmul.mubr.bf16.gmra.mxu1 %v1467_v36 }
  0x6d   : > { %685 = vmatprep.mubr.bf16.mxu0 %v1468_v37  ;;  %789 = vmatprep.mubr.bf16.mxu1 %v1471_v38 }
  0x74   : > { %686 = vmatmul.mubr.bf16.gmra.mxu0 %v1470_v39  ;;  %790 = vmatmul.mubr.bf16.gmra.mxu1 %v1473_v40 }
  0x75   : > { %693 = vmatprep.mubr.bf16.mxu0 %v1474_v41  ;;  %797 = vmatprep.mubr.bf16.mxu1 %v1477_v42 }
  0x7c   : > { %694 = vmatmul.mubr.bf16.gmra.mxu0 %v1476_v43  ;;  %798 = vmatmul.mubr.bf16.gmra.mxu1 %v1479_v44 }
  0x7d   : > { %701 = vmatprep.mubr.bf16.mxu0 %v1480_v45  ;;  %805 = vmatprep.mubr.bf16.mxu1 %v1483_v46 }
  0x84   : > { %702 = vmatmul.mubr.bf16.gmra.mxu0 %v1482_v47  ;;  %806 = vmatmul.mubr.bf16.gmra.mxu1 %v1485_v48 }
  0x85   : > { %709 = vmatprep.mubr.bf16.mxu0 %v1486_v49  ;;  %813 = vmatprep.mubr.bf16.mxu1 %v1489_v50 }
  0x8c   : > { %710 = vmatmul.mubr.bf16.gmra.mxu0 %v1488_v51  ;;  %814 = vmatmul.mubr.bf16.gmra.mxu1 %v1491_v52 }
  0x8d   : > { %717 = vmatprep.mubr.bf16.mxu0 %v1492_v53  ;;  %821 = vmatprep.mubr.bf16.mxu1 %v1495_v54 }
  0x94   : > { %718 = vmatmul.mubr.bf16.gmra.mxu0 %v1494_v55  ;;  %822 = vmatmul.mubr.bf16.gmra.mxu1 %v1497_v56 }
  0x95   : > { %725 = vmatprep.mubr.bf16.mxu0 %v1498_v57  ;;  %829 = vmatprep.mubr.bf16.mxu1 %v1501_v58 }
  0x9c   : > { %726 = vmatmul.mubr.bf16.gmra.mxu0 %v1500_v59  ;;  %830 = vmatmul.mubr.bf16.gmra.mxu1 %v1503_v60 }
  0x9d   : > { %733 = vmatprep.mubr.bf16.mxu0 %v1504_v61  ;;  %837 = vmatprep.mubr.bf16.mxu1 %v1507_v62 }
  0xa4   : > { %734 = vmatmul.mubr.bf16.gmra.mxu0 %v1506_v63  ;;  %838 = vmatmul.mubr.bf16.gmra.mxu1 %v1509_v0 }
  0xa5   : > { %741 = vmatprep.mubr.bf16.mxu0 %v1510_v1 }
  0xac   : > { %742 = vmatmul.mubr.bf16.gmra.mxu0 %v1512_v2 }
 0x10c   : > { %v647_v4 = vpop.f32.mrf.mxu0  ;;  %v751_v5 = vpop.f32.mrf.mxu1 }
 0x10d   : > { %v648_v6 = vadd.f32 %v1691_v3, %v647_v4  ;;  %v752_v7 = vadd.f32 %v1691_v3, %v751_v5 }
 0x10e   : > { %v649_v8 = vpop.f32.mrf.mxu0  ;;  %v753_v9 = vpop.f32.mrf.mxu1 }
 0x10f   : > { %v846_v10 = vmax.f32 %v648_v6, 0.0  ;;  %v872_v11 = vmax.f32 %v752_v7, 0.0 }
 0x110   : > { %v650_v12 = vpop.f32.mrf.mxu0  ;;  %v754_v13 = vpop.f32.mrf.mxu1 }
 0x111   : > { %v1331_v14 = vpack.c.bf16 %v846_v10, %v846_v10  ;;  %v1357_v15 = vpack.c.bf16 %v872_v11, %v872_v11  ;;  %v651_v16 = vadd.f32 %v1691_v3, %v650_v12  ;;  %v755_v17 = vadd.f32 %v1691_v3, %v754_v13 }
 0x112   : > { %v652_v18 = vpop.f32.mrf.mxu0  ;;  %v756_v19 = vpop.f32.mrf.mxu1 }
 0x113   : > { %1097 = vst.msk [vmem:[%s1699_s28] sm:$0xf] %vm1096_vm0, %v1331_v14  ;;  %1123 = vst.msk [vmem:[%s1699_s28 + $0x68] sm:$0xf] %vm1096_vm0, %v1357_v15  ;;  %v847_v20 = vmax.f32 %v651_v16, 0.0  ;;  %v873_v21 = vmax.f32 %v755_v17, 0.0 }
 0x114   : > { %v655_v22 = vpop.f32.mrf.mxu0  ;;  %v759_v23 = vpop.f32.mrf.mxu1 }
 0x115   : > { %v1332_v24 = vpack.c.bf16 %v847_v20, %v847_v20  ;;  %v1358_v25 = vpack.c.bf16 %v873_v21, %v873_v21  ;;  %v656_v26 = vadd.f32 %v1691_v3, %v655_v22  ;;  %v760_v27 = vadd.f32 %v1691_v3, %v759_v23 }
 0x116   : > { %v657_v28 = vpop.f32.mrf.mxu0  ;;  %v761_v29 = vpop.f32.mrf.mxu1 }
 0x117   : > { %1098 = vst.msk [vmem:[%s1699_s28 + $0x4] sm:$0xf] %vm1096_vm0, %v1332_v24  ;;  %1124 = vst.msk [vmem:[%s1699_s28 + $0x6c] sm:$0xf] %vm1096_vm0, %v1358_v25  ;;  %v848_v30 = vmax.f32 %v656_v26, 0.0  ;;  %v874_v31 = vmax.f32 %v760_v27, 0.0 }
 0x118   : > { %v658_v32 = vpop.f32.mrf.mxu0  ;;  %v762_v33 = vpop.f32.mrf.mxu1 }
 0x119   : > { %v1333_v34 = vpack.c.bf16 %v848_v30, %v848_v30  ;;  %v1359_v35 = vpack.c.bf16 %v874_v31, %v874_v31  ;;  %v659_v36 = vadd.f32 %v1691_v3, %v658_v32  ;;  %v763_v37 = vadd.f32 %v1691_v3, %v762_v33 }
 0x11a   : > { %v660_v38 = vpop.f32.mrf.mxu0  ;;  %v764_v39 = vpop.f32.mrf.mxu1 }
 0x11b   : > { %1099 = vst.msk [vmem:[%s1699_s28 + $0x8] sm:$0xf] %vm1096_vm0, %v1333_v34  ;;  %1125 = vst.msk [vmem:[%s1699_s28 + $0x70] sm:$0xf] %vm1096_vm0, %v1359_v35  ;;  %v849_v40 = vmax.f32 %v659_v36, 0.0  ;;  %v875_v41 = vmax.f32 %v763_v37, 0.0 }
 0x11c   : > { %v663_v42 = vpop.f32.mrf.mxu0  ;;  %v767_v43 = vpop.f32.mrf.mxu1 }
 0x11d   : > { %v1334_v44 = vpack.c.bf16 %v849_v40, %v849_v40  ;;  %v1360_v45 = vpack.c.bf16 %v875_v41, %v875_v41  ;;  %v664_v46 = vadd.f32 %v1691_v3, %v663_v42  ;;  %v768_v47 = vadd.f32 %v1691_v3, %v767_v43 }
 0x11e   : > { %v665_v48 = vpop.f32.mrf.mxu0  ;;  %v769_v49 = vpop.f32.mrf.mxu1 }
 0x11f   : > { %1100 = vst.msk [vmem:[%s1699_s28 + $0xc] sm:$0xf] %vm1096_vm0, %v1334_v44  ;;  %1126 = vst.msk [vmem:[%s1699_s28 + $0x74] sm:$0xf] %vm1096_vm0, %v1360_v45  ;;  %v850_v50 = vmax.f32 %v664_v46, 0.0  ;;  %v876_v51 = vmax.f32 %v768_v47, 0.0 }
 0x120   : > { %v666_v52 = vpop.f32.mrf.mxu0  ;;  %v770_v53 = vpop.f32.mrf.mxu1 }
 0x121   : > { %v1335_v54 = vpack.c.bf16 %v850_v50, %v850_v50  ;;  %v1361_v55 = vpack.c.bf16 %v876_v51, %v876_v51  ;;  %v667_v56 = vadd.f32 %v1691_v3, %v666_v52  ;;  %v771_v57 = vadd.f32 %v1691_v3, %v770_v53 }
 0x122   : > { %v668_v58 = vpop.f32.mrf.mxu0  ;;  %v772_v59 = vpop.f32.mrf.mxu1 }
 0x123   : > { %1101 = vst.msk [vmem:[%s1699_s28 + $0x10] sm:$0xf] %vm1096_vm0, %v1335_v54  ;;  %1127 = vst.msk [vmem:[%s1699_s28 + $0x78] sm:$0xf] %vm1096_vm0, %v1361_v55  ;;  %v851_v60 = vmax.f32 %v667_v56, 0.0  ;;  %v877_v61 = vmax.f32 %v771_v57, 0.0 }
 0x124   : > { %v671_v62 = vpop.f32.mrf.mxu0  ;;  %v775_v63 = vpop.f32.mrf.mxu1 }
 0x125   : > { %v1336_v0 = vpack.c.bf16 %v851_v60, %v851_v60  ;;  %v1362_v1 = vpack.c.bf16 %v877_v61, %v877_v61  ;;  %v672_v2 = vadd.f32 %v1691_v3, %v671_v62  ;;  %v776_v4 = vadd.f32 %v1691_v3, %v775_v63 }
 0x126   : > { %v673_v5 = vpop.f32.mrf.mxu0  ;;  %v777_v6 = vpop.f32.mrf.mxu1 }
 0x127   : > { %1102 = vst.msk [vmem:[%s1699_s28 + $0x14] sm:$0xf] %vm1096_vm0, %v1336_v0  ;;  %1128 = vst.msk [vmem:[%s1699_s28 + $0x7c] sm:$0xf] %vm1096_vm0, %v1362_v1  ;;  %v852_v7 = vmax.f32 %v672_v2, 0.0  ;;  %v878_v8 = vmax.f32 %v776_v4, 0.0 }
 0x128   : > { %v674_v9 = vpop.f32.mrf.mxu0  ;;  %v778_v10 = vpop.f32.mrf.mxu1 }
 0x129   : > { %v1337_v11 = vpack.c.bf16 %v852_v7, %v852_v7  ;;  %v1363_v12 = vpack.c.bf16 %v878_v8, %v878_v8  ;;  %v675_v13 = vadd.f32 %v1691_v3, %v674_v9  ;;  %v779_v14 = vadd.f32 %v1691_v3, %v778_v10 }
 0x12a   : > { %v676_v15 = vpop.f32.mrf.mxu0  ;;  %v780_v16 = vpop.f32.mrf.mxu1 }
 0x12b   : > { %1103 = vst.msk [vmem:[%s1699_s28 + $0x18] sm:$0xf] %vm1096_vm0, %v1337_v11  ;;  %1129 = vst.msk [vmem:[%s1699_s28 + $0x80] sm:$0xf] %vm1096_vm0, %v1363_v12  ;;  %v853_v17 = vmax.f32 %v675_v13, 0.0  ;;  %v879_v18 = vmax.f32 %v779_v14, 0.0 }
 0x12c   : > { %v679_v19 = vpop.f32.mrf.mxu0  ;;  %v783_v20 = vpop.f32.mrf.mxu1 }
 0x12d   : > { %v1338_v21 = vpack.c.bf16 %v853_v17, %v853_v17  ;;  %v1364_v22 = vpack.c.bf16 %v879_v18, %v879_v18  ;;  %v680_v23 = vadd.f32 %v1691_v3, %v679_v19  ;;  %v784_v24 = vadd.f32 %v1691_v3, %v783_v20 }
 0x12e   : > { %v681_v25 = vpop.f32.mrf.mxu0  ;;  %v785_v26 = vpop.f32.mrf.mxu1 }
 0x12f   : > { %1104 = vst.msk [vmem:[%s1699_s28 + $0x1c] sm:$0xf] %vm1096_vm0, %v1338_v21  ;;  %1130 = vst.msk [vmem:[%s1699_s28 + $0x84] sm:$0xf] %vm1096_vm0, %v1364_v22  ;;  %v854_v27 = vmax.f32 %v680_v23, 0.0  ;;  %v880_v28 = vmax.f32 %v784_v24, 0.0 }
 0x130   : > { %v682_v29 = vpop.f32.mrf.mxu0  ;;  %v786_v30 = vpop.f32.mrf.mxu1 }
 0x131   : > { %v1339_v31 = vpack.c.bf16 %v854_v27, %v854_v27  ;;  %v1365_v32 = vpack.c.bf16 %v880_v28, %v880_v28  ;;  %v683_v33 = vadd.f32 %v1691_v3, %v682_v29  ;;  %v787_v34 = vadd.f32 %v1691_v3, %v786_v30 }
 0x132   : > { %v684_v35 = vpop.f32.mrf.mxu0  ;;  %v788_v36 = vpop.f32.mrf.mxu1 }
 0x133   : > { %1105 = vst.msk [vmem:[%s1699_s28 + $0x20] sm:$0xf] %vm1096_vm0, %v1339_v31  ;;  %1131 = vst.msk [vmem:[%s1699_s28 + $0x88] sm:$0xf] %vm1096_vm0, %v1365_v32  ;;  %v855_v37 = vmax.f32 %v683_v33, 0.0  ;;  %v881_v38 = vmax.f32 %v787_v34, 0.0 }
 0x134   : > { %v687_v39 = vpop.f32.mrf.mxu0  ;;  %v791_v40 = vpop.f32.mrf.mxu1 }
 0x135   : > { %v1340_v41 = vpack.c.bf16 %v855_v37, %v855_v37  ;;  %v1366_v42 = vpack.c.bf16 %v881_v38, %v881_v38  ;;  %v688_v43 = vadd.f32 %v1691_v3, %v687_v39  ;;  %v792_v44 = vadd.f32 %v1691_v3, %v791_v40 }
 0x136   : > { %v689_v45 = vpop.f32.mrf.mxu0  ;;  %v793_v46 = vpop.f32.mrf.mxu1 }
 0x137   : > { %1106 = vst.msk [vmem:[%s1699_s28 + $0x24] sm:$0xf] %vm1096_vm0, %v1340_v41  ;;  %1132 = vst.msk [vmem:[%s1699_s28 + $0x8c] sm:$0xf] %vm1096_vm0, %v1366_v42  ;;  %v856_v47 = vmax.f32 %v688_v43, 0.0  ;;  %v882_v48 = vmax.f32 %v792_v44, 0.0 }
 0x138   : > { %v690_v49 = vpop.f32.mrf.mxu0  ;;  %v794_v50 = vpop.f32.mrf.mxu1 }
 0x139   : > { %v1341_v51 = vpack.c.bf16 %v856_v47, %v856_v47  ;;  %v1367_v52 = vpack.c.bf16 %v882_v48, %v882_v48  ;;  %v691_v53 = vadd.f32 %v1691_v3, %v690_v49  ;;  %v795_v54 = vadd.f32 %v1691_v3, %v794_v50 }
 0x13a   : > { %v692_v55 = vpop.f32.mrf.mxu0  ;;  %v796_v56 = vpop.f32.mrf.mxu1 }
 0x13b   : > { %1107 = vst.msk [vmem:[%s1699_s28 + $0x28] sm:$0xf] %vm1096_vm0, %v1341_v51  ;;  %1133 = vst.msk [vmem:[%s1699_s28 + $0x90] sm:$0xf] %vm1096_vm0, %v1367_v52  ;;  %v857_v57 = vmax.f32 %v691_v53, 0.0  ;;  %v883_v58 = vmax.f32 %v795_v54, 0.0 }
 0x13c   : > { %v695_v59 = vpop.f32.mrf.mxu0  ;;  %v799_v60 = vpop.f32.mrf.mxu1 }
 0x13d   : > { %v1342_v61 = vpack.c.bf16 %v857_v57, %v857_v57  ;;  %v1368_v62 = vpack.c.bf16 %v883_v58, %v883_v58  ;;  %v696_v63 = vadd.f32 %v1691_v3, %v695_v59  ;;  %v800_v0 = vadd.f32 %v1691_v3, %v799_v60 }
 0x13e   : > { %v697_v1 = vpop.f32.mrf.mxu0  ;;  %v801_v2 = vpop.f32.mrf.mxu1 }
 0x13f   : > { %1108 = vst.msk [vmem:[%s1699_s28 + $0x2c] sm:$0xf] %vm1096_vm0, %v1342_v61  ;;  %1134 = vst.msk [vmem:[%s1699_s28 + $0x94] sm:$0xf] %vm1096_vm0, %v1368_v62  ;;  %v858_v4 = vmax.f32 %v696_v63, 0.0  ;;  %v884_v5 = vmax.f32 %v800_v0, 0.0 }
 0x140   : > { %v698_v6 = vpop.f32.mrf.mxu0  ;;  %v802_v7 = vpop.f32.mrf.mxu1 }
 0x141   : > { %v1343_v8 = vpack.c.bf16 %v858_v4, %v858_v4  ;;  %v1369_v9 = vpack.c.bf16 %v884_v5, %v884_v5  ;;  %v699_v10 = vadd.f32 %v1691_v3, %v698_v6  ;;  %v803_v11 = vadd.f32 %v1691_v3, %v802_v7 }
 0x142   : > { %v700_v12 = vpop.f32.mrf.mxu0  ;;  %v804_v13 = vpop.f32.mrf.mxu1 }
 0x143   : > { %1109 = vst.msk [vmem:[%s1699_s28 + $0x30] sm:$0xf] %vm1096_vm0, %v1343_v8  ;;  %1135 = vst.msk [vmem:[%s1699_s28 + $0x98] sm:$0xf] %vm1096_vm0, %v1369_v9  ;;  %v859_v14 = vmax.f32 %v699_v10, 0.0  ;;  %v885_v15 = vmax.f32 %v803_v11, 0.0 }
 0x144   : > { %v703_v16 = vpop.f32.mrf.mxu0  ;;  %v807_v17 = vpop.f32.mrf.mxu1 }
 0x145   : > { %v1344_v18 = vpack.c.bf16 %v859_v14, %v859_v14  ;;  %v1370_v19 = vpack.c.bf16 %v885_v15, %v885_v15  ;;  %v704_v20 = vadd.f32 %v1691_v3, %v703_v16  ;;  %v808_v21 = vadd.f32 %v1691_v3, %v807_v17 }
 0x146   : > { %v705_v22 = vpop.f32.mrf.mxu0  ;;  %v809_v23 = vpop.f32.mrf.mxu1 }
 0x147   : > { %1110 = vst.msk [vmem:[%s1699_s28 + $0x34] sm:$0xf] %vm1096_vm0, %v1344_v18  ;;  %1136 = vst.msk [vmem:[%s1699_s28 + $0x9c] sm:$0xf] %vm1096_vm0, %v1370_v19  ;;  %v860_v24 = vmax.f32 %v704_v20, 0.0  ;;  %v886_v25 = vmax.f32 %v808_v21, 0.0 }
 0x148   : > { %v706_v26 = vpop.f32.mrf.mxu0  ;;  %v810_v27 = vpop.f32.mrf.mxu1 }
 0x149   : > { %v1345_v28 = vpack.c.bf16 %v860_v24, %v860_v24  ;;  %v1371_v29 = vpack.c.bf16 %v886_v25, %v886_v25  ;;  %v707_v30 = vadd.f32 %v1691_v3, %v706_v26  ;;  %v811_v31 = vadd.f32 %v1691_v3, %v810_v27 }
 0x14a   : > { %v708_v32 = vpop.f32.mrf.mxu0  ;;  %v812_v33 = vpop.f32.mrf.mxu1 }
 0x14b   : > { %1111 = vst.msk [vmem:[%s1699_s28 + $0x38] sm:$0xf] %vm1096_vm0, %v1345_v28  ;;  %1137 = vst.msk [vmem:[%s1699_s28 + $0xa0] sm:$0xf] %vm1096_vm0, %v1371_v29  ;;  %v861_v34 = vmax.f32 %v707_v30, 0.0  ;;  %v887_v35 = vmax.f32 %v811_v31, 0.0 }
 0x14c   : > { %v711_v36 = vpop.f32.mrf.mxu0  ;;  %v815_v37 = vpop.f32.mrf.mxu1 }
 0x14d   : > { %v1346_v38 = vpack.c.bf16 %v861_v34, %v861_v34  ;;  %v1372_v39 = vpack.c.bf16 %v887_v35, %v887_v35  ;;  %v712_v40 = vadd.f32 %v1691_v3, %v711_v36  ;;  %v816_v41 = vadd.f32 %v1691_v3, %v815_v37 }
 0x14e   : > { %v713_v42 = vpop.f32.mrf.mxu0  ;;  %v817_v43 = vpop.f32.mrf.mxu1 }
 0x14f   : > { %1112 = vst.msk [vmem:[%s1699_s28 + $0x3c] sm:$0xf] %vm1096_vm0, %v1346_v38  ;;  %1138 = vst.msk [vmem:[%s1699_s28 + $0xa4] sm:$0xf] %vm1096_vm0, %v1372_v39  ;;  %v862_v44 = vmax.f32 %v712_v40, 0.0  ;;  %v888_v45 = vmax.f32 %v816_v41, 0.0 }
 0x150   : > { %v714_v46 = vpop.f32.mrf.mxu0  ;;  %v818_v47 = vpop.f32.mrf.mxu1 }
 0x151   : > { %v1347_v48 = vpack.c.bf16 %v862_v44, %v862_v44  ;;  %v1373_v49 = vpack.c.bf16 %v888_v45, %v888_v45  ;;  %v715_v50 = vadd.f32 %v1691_v3, %v714_v46  ;;  %v819_v51 = vadd.f32 %v1691_v3, %v818_v47 }
 0x152   : > { %v716_v52 = vpop.f32.mrf.mxu0  ;;  %v820_v53 = vpop.f32.mrf.mxu1 }
 0x153   : > { %1113 = vst.msk [vmem:[%s1699_s28 + $0x40] sm:$0xf] %vm1096_vm0, %v1347_v48  ;;  %1139 = vst.msk [vmem:[%s1699_s28 + $0xa8] sm:$0xf] %vm1096_vm0, %v1373_v49  ;;  %v863_v54 = vmax.f32 %v715_v50, 0.0  ;;  %v889_v55 = vmax.f32 %v819_v51, 0.0 }
 0x154   : > { %v719_v56 = vpop.f32.mrf.mxu0  ;;  %v823_v57 = vpop.f32.mrf.mxu1 }
 0x155   : > { %v1348_v58 = vpack.c.bf16 %v863_v54, %v863_v54  ;;  %v1374_v59 = vpack.c.bf16 %v889_v55, %v889_v55  ;;  %v720_v60 = vadd.f32 %v1691_v3, %v719_v56  ;;  %v824_v61 = vadd.f32 %v1691_v3, %v823_v57 }
 0x156   : > { %v721_v62 = vpop.f32.mrf.mxu0  ;;  %v825_v63 = vpop.f32.mrf.mxu1 }
 0x157   : > { %1114 = vst.msk [vmem:[%s1699_s28 + $0x44] sm:$0xf] %vm1096_vm0, %v1348_v58  ;;  %1140 = vst.msk [vmem:[%s1699_s28 + $0xac] sm:$0xf] %vm1096_vm0, %v1374_v59  ;;  %v864_v0 = vmax.f32 %v720_v60, 0.0  ;;  %v890_v1 = vmax.f32 %v824_v61, 0.0 }
 0x158   : > { %v722_v2 = vpop.f32.mrf.mxu0  ;;  %v826_v4 = vpop.f32.mrf.mxu1 }
 0x159   : > { %v1349_v5 = vpack.c.bf16 %v864_v0, %v864_v0  ;;  %v1375_v6 = vpack.c.bf16 %v890_v1, %v890_v1  ;;  %v723_v7 = vadd.f32 %v1691_v3, %v722_v2  ;;  %v827_v8 = vadd.f32 %v1691_v3, %v826_v4 }
 0x15a   : > { %v724_v9 = vpop.f32.mrf.mxu0  ;;  %v828_v10 = vpop.f32.mrf.mxu1 }
 0x15b   : > { %1115 = vst.msk [vmem:[%s1699_s28 + $0x48] sm:$0xf] %vm1096_vm0, %v1349_v5  ;;  %1141 = vst.msk [vmem:[%s1699_s28 + $0xb0] sm:$0xf] %vm1096_vm0, %v1375_v6  ;;  %v865_v11 = vmax.f32 %v723_v7, 0.0  ;;  %v891_v12 = vmax.f32 %v827_v8, 0.0 }
 0x15c   : > { %v727_v13 = vpop.f32.mrf.mxu0  ;;  %v831_v14 = vpop.f32.mrf.mxu1 }
 0x15d   : > { %v1350_v15 = vpack.c.bf16 %v865_v11, %v865_v11  ;;  %v1376_v16 = vpack.c.bf16 %v891_v12, %v891_v12  ;;  %v728_v17 = vadd.f32 %v1691_v3, %v727_v13  ;;  %v832_v18 = vadd.f32 %v1691_v3, %v831_v14 }
 0x15e   : > { %v729_v19 = vpop.f32.mrf.mxu0  ;;  %v833_v20 = vpop.f32.mrf.mxu1 }
 0x15f   : > { %1116 = vst.msk [vmem:[%s1699_s28 + $0x4c] sm:$0xf] %vm1096_vm0, %v1350_v15  ;;  %1142 = vst.msk [vmem:[%s1699_s28 + $0xb4] sm:$0xf] %vm1096_vm0, %v1376_v16  ;;  %v866_v21 = vmax.f32 %v728_v17, 0.0  ;;  %v892_v22 = vmax.f32 %v832_v18, 0.0 }
 0x160   : > { %v730_v23 = vpop.f32.mrf.mxu0  ;;  %v834_v24 = vpop.f32.mrf.mxu1 }
 0x161   : > { %v1351_v25 = vpack.c.bf16 %v866_v21, %v866_v21  ;;  %v1377_v26 = vpack.c.bf16 %v892_v22, %v892_v22  ;;  %v731_v27 = vadd.f32 %v1691_v3, %v730_v23  ;;  %v835_v28 = vadd.f32 %v1691_v3, %v834_v24 }
 0x162   : > { %v732_v29 = vpop.f32.mrf.mxu0  ;;  %v836_v30 = vpop.f32.mrf.mxu1 }
 0x163   : > { %1117 = vst.msk [vmem:[%s1699_s28 + $0x50] sm:$0xf] %vm1096_vm0, %v1351_v25  ;;  %1143 = vst.msk [vmem:[%s1699_s28 + $0xb8] sm:$0xf] %vm1096_vm0, %v1377_v26  ;;  %v867_v31 = vmax.f32 %v731_v27, 0.0  ;;  %v893_v32 = vmax.f32 %v835_v28, 0.0 }
 0x164   : > { %v735_v33 = vpop.f32.mrf.mxu0  ;;  %v839_v34 = vpop.f32.mrf.mxu1 }
 0x165   : > { %v1352_v35 = vpack.c.bf16 %v867_v31, %v867_v31  ;;  %v1378_v36 = vpack.c.bf16 %v893_v32, %v893_v32  ;;  %v736_v37 = vadd.f32 %v1691_v3, %v735_v33  ;;  %v840_v38 = vadd.f32 %v1691_v3, %v839_v34 }
 0x166   : > { %v737_v39 = vpop.f32.mrf.mxu0  ;;  %v841_v40 = vpop.f32.mrf.mxu1 }
 0x167   : > { %1118 = vst.msk [vmem:[%s1699_s28 + $0x54] sm:$0xf] %vm1096_vm0, %v1352_v35  ;;  %1144 = vst.msk [vmem:[%s1699_s28 + $0xbc] sm:$0xf] %vm1096_vm0, %v1378_v36  ;;  %v868_v41 = vmax.f32 %v736_v37, 0.0  ;;  %v894_v42 = vmax.f32 %v840_v38, 0.0 }
 0x168   : > { %v738_v43 = vpop.f32.mrf.mxu0  ;;  %v842_v44 = vpop.f32.mrf.mxu1 }
 0x169   : > { %v1353_v45 = vpack.c.bf16 %v868_v41, %v868_v41  ;;  %v1379_v46 = vpack.c.bf16 %v894_v42, %v894_v42  ;;  %v739_v47 = vadd.f32 %v1691_v3, %v738_v43  ;;  %v843_v48 = vadd.f32 %v1691_v3, %v842_v44 }
 0x16a   : > { %v740_v49 = vpop.f32.mrf.mxu0  ;;  %v844_v50 = vpop.f32.mrf.mxu1 }
 0x16b   : > { %1119 = vst.msk [vmem:[%s1699_s28 + $0x58] sm:$0xf] %vm1096_vm0, %v1353_v45  ;;  %1145 = vst.msk [vmem:[%s1699_s28 + $0xc0] sm:$0xf] %vm1096_vm0, %v1379_v46  ;;  %v869_v51 = vmax.f32 %v739_v47, 0.0  ;;  %v895_v52 = vmax.f32 %v843_v48, 0.0 }
 0x16c   : > { %v743_v53 = vpop.f32.mrf.mxu0 }
 0x16d   : > { %v1354_v54 = vpack.c.bf16 %v869_v51, %v869_v51  ;;  %v1380_v55 = vpack.c.bf16 %v895_v52, %v895_v52  ;;  %v744_v56 = vadd.f32 %v1691_v3, %v743_v53 }
 0x16e   : > { %v745_v57 = vpop.f32.mrf.mxu0 }
 0x16f   : > { %1120 = vst.msk [vmem:[%s1699_s28 + $0x5c] sm:$0xf] %vm1096_vm0, %v1354_v54  ;;  %1146 = vst.msk [vmem:[%s1699_s28 + $0xc4] sm:$0xf] %vm1096_vm0, %v1380_v55  ;;  %v870_v58 = vmax.f32 %v744_v56, 0.0 }
 0x170   : > { %v746_v59 = vpop.f32.mrf.mxu0 }
 0x171   : > { %v1355_v60 = vpack.c.bf16 %v870_v58, %v870_v58  ;;  %v747_v61 = vadd.f32 %v1691_v3, %v746_v59 }
 0x172   : > { %v748_v62 = vpop.f32.mrf.mxu0 }
 0x173   : > { %1121 = vst.msk [vmem:[%s1699_s28 + $0x60] sm:$0xf] %vm1096_vm0, %v1355_v60  ;;  %v871_v63 = vmax.f32 %v747_v61, 0.0 }
 0x175   : > { %v1356_v0 = vpack.c.bf16 %v871_v63, %v871_v63 }
 0x177   : > { %1122 = vst.msk [vmem:[%s1699_s28 + $0x64] sm:$0xf] %vm1096_vm0, %v1356_v0 }
 0x178 PF: > { %s13_s12 = sadd.s32 1, %s1519_s12  }
 0x179   : > { %p10_p4 = scmp.ge.s32.totalorder %s13_s12, 4  }
 0x17b   :  { %12 = sbr.rel (!%p10_p4) target bundleno = 1 (0x1), region = 62 }

// kernel: actor_critic_forward.5
= control target key start
LH: loop header
LB: loop body
LE: loop exit
PB: predicated region body
PF: predicated region fallthrough
CT: control target
= control target key end

     0   :  { %s1157_s12 = smov 0   ;;  %s1340_s0 = inlined_call_operand.vmem [shape: bf16[176,512], index: 0, kind: input, shape index: {}]   ;;  %s1341_s1 = inlined_call_operand.vmem [shape: bf16[512,64], index: 1, kind: input, shape index: {}]   ;;  %s1342_s2 = inlined_call_operand.vmem [shape: f32[1,64], index: 2, kind: input, shape index: {}]   ;;  %s1343_s3 = inlined_call_operand.vmem [shape: bf16[176,64], index: 3, kind: output, shape index: {}]  }
   0x1 LB: > { %s861_s13 = sadd.s32 4294967295, %s1135_s12   ;;  %p865_p0 = scmp.ge.s32.totalorder %s1135_s12, 1  ;;  %s1135_s12 = sphi %s1157_s12, %s13_s12  }
   0x2   : > { %p139_p1 = scmp.lt.s32.totalorder %s1135_s12, 3 }
   0x4   : > { %p140_p2 = pnand %p865_p0, %p139_p1 }
   0x5   : > { %s164_s19 = smul.u32 (!%p140_p2), 11, %s861_s13 }
   0x6   : > { %143 = sbr.rel (%p140_p2) target bundleno = 291 (0x123), region = 32 }
   0x7   : > { %p165_p3 = scmp.lt.s32.totalorder (!%p140_p2), %s164_s19, 21 }
   0xb   : > { %v1063_v0 = vld [vmem:[%s1341_s1 + $0x78] sm:$0xff]   ;;  %v1067_v4 = vld [vmem:[%s1341_s1 + $0x70] sm:$0xff]   ;;  %v1071_v8 = vld [vmem:[%s1341_s1 + $0x68] sm:$0xff]   ;;  %s1345_s19 = smov (!%p165_p3, %s164_s19), 21  ;;  %vm793_vm0 = vcmask 519168  }
   0xc   : > { %v1064_v1 = vld [vmem:[%s1341_s1 + $0xf8] sm:$0xff]   ;;  %951 = vmatprep.subr.bf16.mxu0 %v1063_v0  ;;  %v1068_v5 = vld [vmem:[%s1341_s1 + $0xf0] sm:$0xff]   ;;  %v1072_v9 = vld [vmem:[%s1341_s1 + $0xe8] sm:$0xff]   ;;  %s939_s18 = sshll.u32 %s1345_s19, 4  ;;  %s868_s7 = sshll.u32 %s1345_s19, 2 }
   0xd   : > { %v1065_v2 = vld [vmem:[%s1341_s1 + $0x38] sm:$0xff]   ;;  %1003 = vmatprep.subr.bf16.mxu1 %v1064_v1  ;;  %v1069_v6 = vld [vmem:[%s1341_s1 + $0x30] sm:$0xff]   ;;  %v1073_v10 = vld [vmem:[%s1341_s1 + $0x28] sm:$0xff]   ;;  %s1263_s13 = scalar_lea.vmem %s1340_s0, %s939_s18  ;;  %s1304_s10 = scalar_lea.vmem %s1343_s3, %s868_s7 }
   0xe   : > { %v1066_v3 = vld [vmem:[%s1341_s1 + $0xb8] sm:$0xff]   ;;  %952 = vmatpush3.bf16.msra.mxu0 %v1065_v2  ;;  %v1070_v7 = vld [vmem:[%s1341_s1 + $0xb0] sm:$0xff]   ;;  %v1074_v11 = vld [vmem:[%s1341_s1 + $0xa8] sm:$0xff]  }
   0xf   : > { %1004 = vmatpush3.bf16.msra.mxu1 %v1066_v3  ;;  %953 = vmatprep.subr.bf16.mxu0 %v1067_v4  ;;  %v1075_v12 = vld [vmem:[%s1341_s1 + $0x60] sm:$0xff]   ;;  %v1079_v16 = vld [vmem:[%s1341_s1 + $0x58] sm:$0xff]   ;;  %v1083_v20 = vld [vmem:[%s1341_s1 + $0x50] sm:$0xff]  }
  0x10   : > { %1005 = vmatprep.subr.bf16.mxu1 %v1068_v5  ;;  %v1076_v13 = vld [vmem:[%s1341_s1 + $0xe0] sm:$0xff]   ;;  %v1080_v17 = vld [vmem:[%s1341_s1 + $0xd8] sm:$0xff]   ;;  %v1084_v21 = vld [vmem:[%s1341_s1 + $0xd0] sm:$0xff]  }
  0x11   : > { %v1077_v14 = vld [vmem:[%s1341_s1 + $0x20] sm:$0xff]   ;;  %v1081_v18 = vld [vmem:[%s1341_s1 + $0x18] sm:$0xff]   ;;  %v1085_v22 = vld [vmem:[%s1341_s1 + $0x10] sm:$0xff]  }
  0x12   : > { %954 = vmatpush3.bf16.msra.mxu0 %v1069_v6  ;;  %v1078_v15 = vld [vmem:[%s1341_s1 + $0xa0] sm:$0xff]   ;;  %v1082_v19 = vld [vmem:[%s1341_s1 + $0x98] sm:$0xff]   ;;  %v1086_v23 = vld [vmem:[%s1341_s1 + $0x90] sm:$0xff]  }
  0x13   : > { %1006 = vmatpush3.bf16.msra.mxu1 %v1070_v7  ;;  %955 = vmatprep.subr.bf16.mxu0 %v1071_v8  ;;  %v1087_v24 = vld [vmem:[%s1341_s1 + $0x48] sm:$0xff]   ;;  %v1091_v28 = vld [vmem:[%s1341_s1 + $0x40] sm:$0xff]  }
  0x14   : > { %1007 = vmatprep.subr.bf16.mxu1 %v1072_v9  ;;  %v1088_v25 = vld [vmem:[%s1341_s1 + $0xc8] sm:$0xff]   ;;  %v1092_v29 = vld [vmem:[%s1341_s1 + $0xc0] sm:$0xff]  }
  0x15   : > { %v1089_v26 = vld [vmem:[%s1341_s1 + $0x8] sm:$0xff]   ;;  %v1093_v30 = vld [vmem:[%s1341_s1] sm:$0xff]  }
  0x16   : > { %956 = vmatpush3.bf16.msra.mxu0 %v1073_v10  ;;  %v1090_v27 = vld [vmem:[%s1341_s1 + $0x88] sm:$0xff]   ;;  %v1094_v31 = vld [vmem:[%s1341_s1 + $0x80] sm:$0xff]  }
  0x17   : > { %1008 = vmatpush3.bf16.msra.mxu1 %v1074_v11  ;;  %957 = vmatprep.subr.bf16.mxu0 %v1075_v12  ;;  %v1095_v32 = vld [vmem:[%s1263_s13] ss:$16 sps:$4 sm:$0xff]   ;;  %v1097_v33 = vld [vmem:[%s1263_s13 + $0x4] ss:$16 sps:$4 sm:$0xff]   ;;  %v1098_v34 = vld [vmem:[%s1263_s13 + $0x8] ss:$16 sps:$4 sm:$0xff]  }
  0x18   : > { %1009 = vmatprep.subr.bf16.mxu1 %v1076_v13  ;;  %v1100_v35 = vld [vmem:[%s1263_s13 + $0xc] ss:$16 sps:$4 sm:$0xff]   ;;  %609 = vmatprep.mubr.bf16.mxu0 %v1097_v33  ;;  %v1101_v36 = vld [vmem:[%s1263_s13 + $0x24] ss:$16 sps:$4 sm:$0xff]   ;;  %v1105_v38 = vld [vmem:[%s1263_s13 + $0x20] ss:$16 sps:$4 sm:$0xff]  }
  0x19   : > { %689 = vmatprep.mubr.bf16.mxu1 %v1100_v35  ;;  %v1103_v37 = vld [vmem:[%s1263_s13 + $0x2c] ss:$16 sps:$4 sm:$0xff]   ;;  %v1106_v39 = vld [vmem:[%s1263_s13 + $0x28] ss:$16 sps:$4 sm:$0xff]   ;;  %v1107_v40 = vld [vmem:[%s1263_s13 + $0x44] ss:$16 sps:$4 sm:$0xff]  }
  0x1a   : > { %958 = vmatpush3.bf16.msra.mxu0 %v1077_v14  ;;  %v1109_v41 = vld [vmem:[%s1263_s13 + $0x4c] ss:$16 sps:$4 sm:$0xff]   ;;  %v1111_v42 = vld [vmem:[%s1263_s13 + $0x40] ss:$16 sps:$4 sm:$0xff]   ;;  %v1112_v43 = vld [vmem:[%s1263_s13 + $0x48] ss:$16 sps:$4 sm:$0xff]  }
  0x1b   : > { %1010 = vmatpush3.bf16.msra.mxu1 %v1078_v15  ;;  %959 = vmatprep.subr.bf16.mxu0 %v1079_v16  ;;  %v1113_v44 = vld [vmem:[%s1263_s13 + $0x64] ss:$16 sps:$4 sm:$0xff]   ;;  %v1115_v45 = vld [vmem:[%s1263_s13 + $0x6c] ss:$16 sps:$4 sm:$0xff]   ;;  %v1117_v46 = vld [vmem:[%s1263_s13 + $0x60] ss:$16 sps:$4 sm:$0xff]  }
  0x1c   : > { %1011 = vmatprep.subr.bf16.mxu1 %v1080_v17  ;;  %v1118_v47 = vld [vmem:[%s1263_s13 + $0x68] ss:$16 sps:$4 sm:$0xff]   ;;  %v1119_v48 = vld [vmem:[%s1263_s13 + $0x84] ss:$16 sps:$4 sm:$0xff]   ;;  %v1121_v49 = vld [vmem:[%s1263_s13 + $0x8c] ss:$16 sps:$4 sm:$0xff]  }
  0x1d   : > { %v198_v50 = vld [vmem:[%s1263_s13 + $0xa0] sm:$0xff]  ;;  %v199_v51 = vld [vmem:[%s1263_s13 + $0xa8] sm:$0xff] }
  0x1e   : > { %960 = vmatpush3.bf16.msra.mxu0 %v1081_v18  ;;  %v1123_v52 = vld [vmem:[%s1263_s13 + $0x80] ss:$16 sps:$4 sm:$0xff]   ;;  %v1124_v53 = vld [vmem:[%s1263_s13 + $0x88] ss:$16 sps:$4 sm:$0xff]   ;;  %v891_v54 = vcombine.high %v198_v50, %v198_v50  ;;  %v893_v55 = vcombine.high %v199_v51, %v199_v51  ;;  %v890_v56 = vcombine.low %v198_v50, %v198_v50  ;;  %v892_v57 = vcombine.low %v199_v51, %v199_v51 }
  0x1f   : > { %1012 = vmatpush3.bf16.msra.mxu1 %v1082_v19  ;;  %961 = vmatprep.subr.bf16.mxu0 %v1083_v20  ;;  %v1296_v60 = vld [vmem:[%s1342_s2] ss:$0 sm:$0xff] }
  0x20   : > { %1013 = vmatprep.subr.bf16.mxu1 %v1084_v21 }
  0x22   : > { %962 = vmatpush3.bf16.msra.mxu0 %v1085_v22 }
  0x23   : > { %1014 = vmatpush3.bf16.msra.mxu1 %v1086_v23  ;;  %963 = vmatprep.subr.bf16.mxu0 %v1087_v24 }
  0x24   : > { %1015 = vmatprep.subr.bf16.mxu1 %v1088_v25 }
  0x26   : > { %964 = vmatpush3.bf16.msra.mxu0 %v1089_v26 }
  0x27   : > { %1016 = vmatpush3.bf16.msra.mxu1 %v1090_v27  ;;  %965 = vmatprep.subr.bf16.mxu0 %v1091_v28 }
  0x28   : > { %1017 = vmatprep.subr.bf16.mxu1 %v1092_v29 }
  0x2a   : > { %966 = vmatpush3.bf16.msra.mxu0 %v1093_v30 }
  0x2b   : > { %1018 = vmatpush3.bf16.msra.mxu1 %v1094_v31 }
  0x2d   : > { %610 = vmatmul.mubr.bf16.vlgmr.msra.gmra.mxu0 %v1095_v32 }
  0x2e   : > { %690 = vmatmul.mubr.bf16.vlgmr.msra.gmra.mxu1 %v1098_v34  ;;  %617 = vmatprep.mubr.bf16.mxu0 %v1101_v36 }
  0x2f   : > { %697 = vmatprep.mubr.bf16.mxu1 %v1103_v37 }
  0x35   : > { %618 = vmatmul.mubr.bf16.gmra.mxu0 %v1105_v38 }
  0x36   : > { %698 = vmatmul.mubr.bf16.gmra.mxu1 %v1106_v39  ;;  %625 = vmatprep.mubr.bf16.mxu0 %v1107_v40 }
  0x37   : > { %705 = vmatprep.mubr.bf16.mxu1 %v1109_v41 }
  0x3d   : > { %626 = vmatmul.mubr.bf16.gmra.mxu0 %v1111_v42 }
  0x3e   : > { %706 = vmatmul.mubr.bf16.gmra.mxu1 %v1112_v43  ;;  %633 = vmatprep.mubr.bf16.mxu0 %v1113_v44 }
  0x3f   : > { %713 = vmatprep.mubr.bf16.mxu1 %v1115_v45 }
  0x45   : > { %634 = vmatmul.mubr.bf16.gmra.mxu0 %v1117_v46 }
  0x46   : > { %714 = vmatmul.mubr.bf16.gmra.mxu1 %v1118_v47  ;;  %641 = vmatprep.mubr.bf16.mxu0 %v1119_v48 }
  0x47   : > { %721 = vmatprep.mubr.bf16.mxu1 %v1121_v49 }
  0x4d   : > { %642 = vmatmul.mubr.bf16.gmra.mxu0 %v1123_v52 }
  0x4e   : > { %722 = vmatmul.mubr.bf16.gmra.mxu1 %v1124_v53  ;;  %649 = vmatprep.mubr.bf16.mxu0 %v891_v54 }
  0x4f   : > { %729 = vmatprep.mubr.bf16.mxu1 %v893_v55 }
  0x55   : > { %650 = vmatmul.mubr.bf16.gmra.mxu0 %v890_v56 }
  0x56   : > { %730 = vmatmul.mubr.bf16.gmra.mxu1 %v892_v57 }
  0xed   : > { %v967_v58 = vpop.f32.mrf.mxu0 }
  0xee   : > { %v1019_v59 = vpop.f32.mrf.mxu1 }
  0xef   : > { %v968_v61 = vpop.f32.mrf.mxu0 }
  0xf0   : > { %v969_v62 = vadd.f32 %v968_v61, %v967_v58  ;;  %v1020_v63 = vpop.f32.mrf.mxu1 }
  0xf1   : > { %v970_v0 = vpop.f32.mrf.mxu0  ;;  %v1021_v2 = vadd.f32 %v1020_v63, %v1019_v59 }
  0xf2   : > { %v612_v1 = vadd.f32 %v969_v62, %v1296_v60  ;;  %v1022_v3 = vpop.f32.mrf.mxu1 }
  0xf3   : > { %v971_v4 = vpop.f32.mrf.mxu0 }
  0xf4   : > { %v692_v5 = vadd.f32 %v1021_v2, %v612_v1  ;;  %v972_v6 = vadd.f32 %v971_v4, %v970_v0  ;;  %v1023_v7 = vpop.f32.mrf.mxu1 }
  0xf5   : > { %v973_v8 = vpop.f32.mrf.mxu0  ;;  %v1024_v11 = vadd.f32 %v1023_v7, %v1022_v3 }
  0xf6   : > { %v737_v9 = vmax.f32 %v692_v5, 0.0  ;;  %v615_v10 = vadd.f32 %v972_v6, %v1296_v60  ;;  %v1025_v12 = vpop.f32.mrf.mxu1 }
  0xf7   : > { %v974_v13 = vpop.f32.mrf.mxu0 }
  0xf8   : > { %v940_v14 = vpack.c.bf16 %v737_v9, %v737_v9  ;;  %v695_v15 = vadd.f32 %v1024_v11, %v615_v10  ;;  %v975_v16 = vadd.f32 %v974_v13, %v973_v8  ;;  %v1026_v17 = vpop.f32.mrf.mxu1 }
  0xf9   : > { %v976_v18 = vpop.f32.mrf.mxu0  ;;  %v1027_v21 = vadd.f32 %v1026_v17, %v1025_v12 }
  0xfa   : > { %794 = vst.msk [vmem:[%s1304_s10] sm:$0xf] %vm793_vm0, %v940_v14  ;;  %v738_v19 = vmax.f32 %v695_v15, 0.0  ;;  %v620_v20 = vadd.f32 %v975_v16, %v1296_v60  ;;  %v1028_v22 = vpop.f32.mrf.mxu1 }
  0xfb   : > { %v977_v23 = vpop.f32.mrf.mxu0 }
  0xfc   : > { %v941_v24 = vpack.c.bf16 %v738_v19, %v738_v19  ;;  %v700_v25 = vadd.f32 %v1027_v21, %v620_v20  ;;  %v978_v26 = vadd.f32 %v977_v23, %v976_v18  ;;  %v1029_v27 = vpop.f32.mrf.mxu1 }
  0xfd   : > { %v979_v28 = vpop.f32.mrf.mxu0  ;;  %v1030_v31 = vadd.f32 %v1029_v27, %v1028_v22 }
  0xfe   : > { %795 = vst.msk [vmem:[%s1304_s10 + $0x4] sm:$0xf] %vm793_vm0, %v941_v24  ;;  %v739_v29 = vmax.f32 %v700_v25, 0.0  ;;  %v623_v30 = vadd.f32 %v978_v26, %v1296_v60  ;;  %v1031_v32 = vpop.f32.mrf.mxu1 }
  0xff   : > { %v980_v33 = vpop.f32.mrf.mxu0 }
 0x100   : > { %v942_v34 = vpack.c.bf16 %v739_v29, %v739_v29  ;;  %v703_v35 = vadd.f32 %v1030_v31, %v623_v30  ;;  %v981_v36 = vadd.f32 %v980_v33, %v979_v28  ;;  %v1032_v37 = vpop.f32.mrf.mxu1 }
 0x101   : > { %v982_v38 = vpop.f32.mrf.mxu0  ;;  %v1033_v41 = vadd.f32 %v1032_v37, %v1031_v32 }
 0x102   : > { %796 = vst.msk [vmem:[%s1304_s10 + $0x8] sm:$0xf] %vm793_vm0, %v942_v34  ;;  %v740_v39 = vmax.f32 %v703_v35, 0.0  ;;  %v628_v40 = vadd.f32 %v981_v36, %v1296_v60  ;;  %v1034_v42 = vpop.f32.mrf.mxu1 }
 0x103   : > { %v983_v43 = vpop.f32.mrf.mxu0 }
 0x104   : > { %v943_v44 = vpack.c.bf16 %v740_v39, %v740_v39  ;;  %v708_v45 = vadd.f32 %v1033_v41, %v628_v40  ;;  %v984_v46 = vadd.f32 %v983_v43, %v982_v38  ;;  %v1035_v47 = vpop.f32.mrf.mxu1 }
 0x105   : > { %v985_v48 = vpop.f32.mrf.mxu0  ;;  %v1036_v51 = vadd.f32 %v1035_v47, %v1034_v42 }
 0x106   : > { %797 = vst.msk [vmem:[%s1304_s10 + $0xc] sm:$0xf] %vm793_vm0, %v943_v44  ;;  %v741_v49 = vmax.f32 %v708_v45, 0.0  ;;  %v631_v50 = vadd.f32 %v984_v46, %v1296_v60  ;;  %v1037_v52 = vpop.f32.mrf.mxu1 }
 0x107   : > { %v986_v53 = vpop.f32.mrf.mxu0 }
 0x108   : > { %v944_v54 = vpack.c.bf16 %v741_v49, %v741_v49  ;;  %v711_v55 = vadd.f32 %v1036_v51, %v631_v50  ;;  %v987_v56 = vadd.f32 %v986_v53, %v985_v48  ;;  %v1038_v57 = vpop.f32.mrf.mxu1 }
 0x109   : > { %v988_v58 = vpop.f32.mrf.mxu0  ;;  %v1039_v62 = vadd.f32 %v1038_v57, %v1037_v52 }
 0x10a   : > { %798 = vst.msk [vmem:[%s1304_s10 + $0x10] sm:$0xf] %vm793_vm0, %v944_v54  ;;  %v742_v59 = vmax.f32 %v711_v55, 0.0  ;;  %v636_v61 = vadd.f32 %v987_v56, %v1296_v60  ;;  %v1040_v63 = vpop.f32.mrf.mxu1 }
 0x10b   : > { %v989_v0 = vpop.f32.mrf.mxu0 }
 0x10c   : > { %v945_v1 = vpack.c.bf16 %v742_v59, %v742_v59  ;;  %v716_v2 = vadd.f32 %v1039_v62, %v636_v61  ;;  %v990_v3 = vadd.f32 %v989_v0, %v988_v58  ;;  %v1041_v4 = vpop.f32.mrf.mxu1 }
 0x10d   : > { %v991_v5 = vpop.f32.mrf.mxu0  ;;  %v1042_v8 = vadd.f32 %v1041_v4, %v1040_v63 }
 0x10e   : > { %799 = vst.msk [vmem:[%s1304_s10 + $0x14] sm:$0xf] %vm793_vm0, %v945_v1  ;;  %v743_v6 = vmax.f32 %v716_v2, 0.0  ;;  %v639_v7 = vadd.f32 %v990_v3, %v1296_v60  ;;  %v1043_v9 = vpop.f32.mrf.mxu1 }
 0x10f   : > { %v992_v10 = vpop.f32.mrf.mxu0 }
 0x110   : > { %v946_v11 = vpack.c.bf16 %v743_v6, %v743_v6  ;;  %v719_v12 = vadd.f32 %v1042_v8, %v639_v7  ;;  %v993_v13 = vadd.f32 %v992_v10, %v991_v5  ;;  %v1044_v14 = vpop.f32.mrf.mxu1 }
 0x111   : > { %v994_v15 = vpop.f32.mrf.mxu0  ;;  %v1045_v18 = vadd.f32 %v1044_v14, %v1043_v9 }
 0x112   : > { %800 = vst.msk [vmem:[%s1304_s10 + $0x18] sm:$0xf] %vm793_vm0, %v946_v11  ;;  %v744_v16 = vmax.f32 %v719_v12, 0.0  ;;  %v644_v17 = vadd.f32 %v993_v13, %v1296_v60  ;;  %v1046_v19 = vpop.f32.mrf.mxu1 }
 0x113   : > { %v995_v20 = vpop.f32.mrf.mxu0 }
 0x114   : > { %v947_v21 = vpack.c.bf16 %v744_v16, %v744_v16  ;;  %v724_v22 = vadd.f32 %v1045_v18, %v644_v17  ;;  %v996_v23 = vadd.f32 %v995_v20, %v994_v15  ;;  %v1047_v24 = vpop.f32.mrf.mxu1 }
 0x115   : > { %v997_v25 = vpop.f32.mrf.mxu0  ;;  %v1048_v28 = vadd.f32 %v1047_v24, %v1046_v19 }
 0x116   : > { %801 = vst.msk [vmem:[%s1304_s10 + $0x1c] sm:$0xf] %vm793_vm0, %v947_v21  ;;  %v745_v26 = vmax.f32 %v724_v22, 0.0  ;;  %v647_v27 = vadd.f32 %v996_v23, %v1296_v60  ;;  %v1049_v29 = vpop.f32.mrf.mxu1 }
 0x117   : > { %v998_v30 = vpop.f32.mrf.mxu0 }
 0x118   : > { %v948_v31 = vpack.c.bf16 %v745_v26, %v745_v26  ;;  %v727_v32 = vadd.f32 %v1048_v28, %v647_v27  ;;  %v999_v33 = vadd.f32 %v998_v30, %v997_v25  ;;  %v1050_v34 = vpop.f32.mrf.mxu1 }
 0x119   : > { %v1000_v35 = vpop.f32.mrf.mxu0  ;;  %v1051_v38 = vadd.f32 %v1050_v34, %v1049_v29 }
 0x11a   : > { %802 = vst.msk [vmem:[%s1304_s10 + $0x20] sm:$0xf] %vm793_vm0, %v948_v31  ;;  %v746_v36 = vmax.f32 %v727_v32, 0.0  ;;  %v652_v37 = vadd.f32 %v999_v33, %v1296_v60  ;;  %v1052_v39 = vpop.f32.mrf.mxu1 }
 0x11b   : > { %v1001_v40 = vpop.f32.mrf.mxu0 }
 0x11c   : > { %v949_v41 = vpack.c.bf16 %v746_v36, %v746_v36  ;;  %v732_v42 = vadd.f32 %v1051_v38, %v652_v37  ;;  %v1053_v43 = vpop.f32.mrf.mxu1 }
 0x11e   : > { %803 = vst.msk [vmem:[%s1304_s10 + $0x24] sm:$0xf] %vm793_vm0, %v949_v41  ;;  %v747_v44 = vmax.f32 %v732_v42, 0.0 }
 0x120   : > { %v950_v45 = vpack.c.bf16 %v747_v44, %v747_v44 }
 0x122   : > { %804 = vst.msk [vmem:[%s1304_s10 + $0x28] sm:$0xf] %vm793_vm0, %v950_v45 }
 0x123 PF: > { %s13_s12 = sadd.s32 1, %s1135_s12  }
 0x124   : > { %p10_p4 = scmp.ge.s32.totalorder %s13_s12, 4  }
 0x126   :  { %12 = sbr.rel (!%p10_p4) target bundleno = 1 (0x1), region = 62 }

// kernel: actor_critic_forward.6
= control target key start
LH: loop header
LB: loop body
LE: loop exit
PB: predicated region body
PF: predicated region fallthrough
CT: control target
= control target key end

     0   :  { %s1186_s12 = smov 0   ;;  %s1356_s0 = inlined_call_operand.vmem [shape: bf16[112,576], index: 0, kind: input, shape index: {}]   ;;  %s1357_s1 = inlined_call_operand.vmem [shape: bf16[576,64], index: 1, kind: input, shape index: {}]   ;;  %s1358_s2 = inlined_call_operand.vmem [shape: f32[1,64], index: 2, kind: input, shape index: {}]   ;;  %s1359_s3 = inlined_call_operand.vmem [shape: bf16[112,64], index: 3, kind: output, shape index: {}]  }
   0x1 LB: > { %s891_s13 = sadd.s32 4294967295, %s1164_s12   ;;  %p895_p0 = scmp.ge.s32.totalorder %s1164_s12, 1  ;;  %s1164_s12 = sphi %s1186_s12, %s13_s12  }
   0x2   : > { %p139_p1 = scmp.lt.s32.totalorder %s1164_s12, 3 }
   0x4   : > { %p140_p2 = pnand %p895_p0, %p139_p1 }
   0x5   : > { %s164_s17 = smul.u32 (!%p140_p2), 7, %s891_s13 }
   0x6   : > { %143 = sbr.rel (%p140_p2) target bundleno = 284 (0x11c), region = 32 }
   0x7   : > { %p165_p3 = scmp.lt.s32.totalorder (!%p140_p2), %s164_s17, 13 }
   0xb   : > { %v1096_v0 = vld [vmem:[%s1357_s1 + $0x78] sm:$0xff]   ;;  %v1100_v4 = vld [vmem:[%s1357_s1 + $0x70] sm:$0xff]   ;;  %v1104_v8 = vld [vmem:[%s1357_s1 + $0x68] sm:$0xff]   ;;  %s1361_s17 = smov (!%p165_p3, %s164_s17), 13  ;;  %vm586_vm0 = vcmask 523264   ;;  %vm827_vm1 = vcmask 519168  }
   0xc   : > { %v1097_v1 = vld [vmem:[%s1357_s1 + $0xf8] sm:$0xff]   ;;  %975 = vmatprep.subr.bf16.mxu0 %v1096_v0  ;;  %v1101_v5 = vld [vmem:[%s1357_s1 + $0xf0] sm:$0xff]   ;;  %v1105_v9 = vld [vmem:[%s1357_s1 + $0xe8] sm:$0xff]   ;;  %s1087_s16 = smul.u32 20, %s1361_s17  ;;  %s897_s18 = sshll.u32 %s1361_s17, 2 }
   0xd   : > { %v1098_v2 = vld [vmem:[%s1357_s1 + $0x38] sm:$0xff]   ;;  %1015 = vmatprep.subr.bf16.mxu1 %v1097_v1  ;;  %v1102_v6 = vld [vmem:[%s1357_s1 + $0x30] sm:$0xff]   ;;  %v1106_v10 = vld [vmem:[%s1357_s1 + $0x28] sm:$0xff]   ;;  %s1337_s21 = scalar_lea.vmem %s1359_s3, %s897_s18 }
   0xe   : > { %v1099_v3 = vld [vmem:[%s1357_s1 + $0xb8] sm:$0xff]   ;;  %976 = vmatpush3.bf16.msra.mxu0 %v1098_v2  ;;  %v1103_v7 = vld [vmem:[%s1357_s1 + $0xb0] sm:$0xff]   ;;  %v1107_v11 = vld [vmem:[%s1357_s1 + $0xa8] sm:$0xff]   ;;  %s1292_s27 = scalar_lea.vmem %s1356_s0, %s1087_s16 }
   0xf   : > { %1016 = vmatpush3.bf16.msra.mxu1 %v1099_v3  ;;  %977 = vmatprep.subr.bf16.mxu0 %v1100_v4  ;;  %v1108_v12 = vld [vmem:[%s1357_s1 + $0x60] sm:$0xff]   ;;  %v1112_v16 = vld [vmem:[%s1357_s1 + $0x58] sm:$0xff]   ;;  %v1116_v20 = vld [vmem:[%s1357_s1 + $0x50] sm:$0xff]  }
  0x10   : > { %1017 = vmatprep.subr.bf16.mxu1 %v1101_v5  ;;  %v1109_v13 = vld [vmem:[%s1357_s1 + $0xe0] sm:$0xff]   ;;  %v1113_v17 = vld [vmem:[%s1357_s1 + $0xd8] sm:$0xff]   ;;  %v1117_v21 = vld [vmem:[%s1357_s1 + $0xd0] sm:$0xff]  }
  0x11   : > { %v1110_v14 = vld [vmem:[%s1357_s1 + $0x20] sm:$0xff]   ;;  %v1114_v18 = vld [vmem:[%s1357_s1 + $0x18] sm:$0xff]   ;;  %v1118_v22 = vld [vmem:[%s1357_s1 + $0x10] sm:$0xff]  }
  0x12   : > { %978 = vmatpush3.bf16.msra.mxu0 %v1102_v6  ;;  %v1111_v15 = vld [vmem:[%s1357_s1 + $0xa0] sm:$0xff]   ;;  %v1115_v19 = vld [vmem:[%s1357_s1 + $0x98] sm:$0xff]   ;;  %v1119_v23 = vld [vmem:[%s1357_s1 + $0x90] sm:$0xff]  }
  0x13   : > { %1018 = vmatpush3.bf16.msra.mxu1 %v1103_v7  ;;  %979 = vmatprep.subr.bf16.mxu0 %v1104_v8  ;;  %v1120_v24 = vld [vmem:[%s1357_s1 + $0x48] sm:$0xff]   ;;  %v1124_v28 = vld [vmem:[%s1357_s1 + $0x40] sm:$0xff]   ;;  %v1134_v36 = vld [vmem:[%s1357_s1 + $0x118] sm:$0xff]  }
  0x14   : > { %1019 = vmatprep.subr.bf16.mxu1 %v1105_v9  ;;  %v1121_v25 = vld [vmem:[%s1357_s1 + $0xc8] sm:$0xff]   ;;  %v1125_v29 = vld [vmem:[%s1357_s1 + $0xc0] sm:$0xff]   ;;  %v1141_v39 = vld [vmem:[%s1357_s1 + $0x110] sm:$0xff]  }
  0x15   : > { %v1122_v26 = vld [vmem:[%s1357_s1 + $0x8] sm:$0xff]   ;;  %v1126_v30 = vld [vmem:[%s1357_s1] sm:$0xff]   ;;  %v1144_v43 = vld [vmem:[%s1292_s27 + $0x5c] ss:$20 sps:$4 sm:$0xff]  }
  0x16   : > { %980 = vmatpush3.bf16.msra.mxu0 %v1106_v10  ;;  %v1123_v27 = vld [vmem:[%s1357_s1 + $0x88] sm:$0xff]   ;;  %v1127_v31 = vld [vmem:[%s1357_s1 + $0x80] sm:$0xff]   ;;  %v196_v46 = vld [vmem:[%s1292_s27 + $0x78] sm:$0xff] }
  0x17   : > { %1020 = vmatpush3.bf16.msra.mxu1 %v1107_v11  ;;  %981 = vmatprep.subr.bf16.mxu0 %v1108_v12  ;;  %v1128_v32 = vld [vmem:[%s1292_s27] ss:$20 sps:$4 sm:$0xff]   ;;  %v1130_v33 = vld [vmem:[%s1292_s27 + $0x4] ss:$20 sps:$4 sm:$0xff]   ;;  %v1131_v34 = vld [vmem:[%s1292_s27 + $0x8] ss:$20 sps:$4 sm:$0xff]   ;;  %v915_v50 = vcombine.high %v196_v46, %v196_v46  ;;  %v914_v52 = vcombine.low %v196_v46, %v196_v46 }
  0x18   : > { %1021 = vmatprep.subr.bf16.mxu1 %v1109_v13  ;;  %v1133_v35 = vld [vmem:[%s1292_s27 + $0xc] ss:$20 sps:$4 sm:$0xff]   ;;  %631 = vmatprep.mubr.bf16.mxu0 %v1130_v33  ;;  %v1137_v38 = vld [vmem:[%s1292_s27 + $0x34] ss:$20 sps:$4 sm:$0xff]   ;;  %v1140_v41 = vld [vmem:[%s1292_s27 + $0x30] ss:$20 sps:$4 sm:$0xff]  }
  0x19   : > { %695 = vmatprep.mubr.bf16.mxu1 %v1133_v35  ;;  %v1135_v37 = vld [vmem:[%s1292_s27 + $0x2c] ss:$20 sps:$4 sm:$0xff]   ;;  %v1139_v40 = vld [vmem:[%s1292_s27 + $0x28] ss:$20 sps:$4 sm:$0xff]   ;;  %v1146_v48 = vld [vmem:[%s1292_s27 + $0x50] ss:$20 sps:$4 sm:$0xff]  }
  0x1a   : > { %982 = vmatpush3.bf16.msra.mxu0 %v1110_v14  ;;  %v1142_v42 = vld [vmem:[%s1292_s27 + $0x54] ss:$20 sps:$4 sm:$0xff]   ;;  %v1153_v45 = vld [vmem:[%s1357_s1 + $0x100] sm:$0xff]   ;;  %v1147_v49 = vld [vmem:[%s1292_s27 + $0x58] ss:$20 sps:$4 sm:$0xff]  }
  0x1b   : > { %1022 = vmatpush3.bf16.msra.mxu1 %v1111_v15  ;;  %983 = vmatprep.subr.bf16.mxu0 %v1112_v16  ;;  %v1148_v44 = vld [vmem:[%s1357_s1 + $0x108] sm:$0xff]   ;;  %v197_v47 = vld [vmem:[%s1292_s27 + $0x80] sm:$0xff] }
  0x1c   : > { %1023 = vmatprep.subr.bf16.mxu1 %v1113_v17  ;;  %v917_v51 = vcombine.high %v197_v47, %v197_v47  ;;  %v916_v53 = vcombine.low %v197_v47, %v197_v47  ;;  %v1154_v54 = vld [vmem:[%s1292_s27 + $0x10] ss:$20 sps:$4 sm:$0xff]   ;;  %v1155_v55 = vld [vmem:[%s1292_s27 + $0x60] ss:$20 sps:$4 sm:$0xff]   ;;  %v1156_v56 = vld [vmem:[%s1292_s27 + $0x38] ss:$20 sps:$4 sm:$0xff]  }
  0x1d   : > { %v1157_v57 = vld [vmem:[%s1292_s27 + $0x88] ss:$0 sps:$4 sm:$0xff]  }
  0x1e   : > { %984 = vmatpush3.bf16.msra.mxu0 %v1114_v18 }
  0x1f   : > { %1024 = vmatpush3.bf16.msra.mxu1 %v1115_v19  ;;  %985 = vmatprep.subr.bf16.mxu0 %v1116_v20 }
  0x20   : > { %1025 = vmatprep.subr.bf16.mxu1 %v1117_v21  ;;  %v898_v21 = vld [vmem:[%s1358_s2] ss:$0 sm:$0xff] }
  0x22   : > { %986 = vmatpush3.bf16.msra.mxu0 %v1118_v22 }
  0x23   : > { %1026 = vmatpush3.bf16.msra.mxu1 %v1119_v23  ;;  %987 = vmatprep.subr.bf16.mxu0 %v1120_v24 }
  0x24   : > { %1027 = vmatprep.subr.bf16.mxu1 %v1121_v25 }
  0x26   : > { %988 = vmatpush3.bf16.msra.mxu0 %v1122_v26 }
  0x27   : > { %1028 = vmatpush3.bf16.msra.mxu1 %v1123_v27  ;;  %989 = vmatprep.subr.bf16.mxu0 %v1124_v28 }
  0x28   : > { %1029 = vmatprep.subr.bf16.mxu1 %v1125_v29 }
  0x2a   : > { %990 = vmatpush3.bf16.msra.mxu0 %v1126_v30 }
  0x2b   : > { %1030 = vmatpush3.bf16.msra.mxu1 %v1127_v31  ;;  %1063 = vmatprep.subr.bf16.mxu0 %v1134_v36 }
  0x2c   : > { %1079 = vmatprep.subr.bf16.mxu1 %v1134_v36 }
  0x2d   : > { %632 = vmatmul.mubr.bf16.vlgmr.msra.gmra.mxu0 %v1128_v32 }
  0x2e   : > { %696 = vmatmul.mubr.bf16.vlgmr.msra.gmra.mxu1 %v1131_v34  ;;  %1064 = vmatpush3.bf16.msra.mxu0 %v1134_v36 }
  0x2f   : > { %1083 = vmatpush3.bf16.msra.mxu1 %v1134_v36  ;;  %639 = vmatprep.mubr.bf16.mxu0 %v1135_v37 }
  0x30   : > { %703 = vmatprep.mubr.bf16.mxu1 %v1137_v38  ;;  %1065 = vmatprep.subr.bf16.mxu0 %v1141_v39 }
  0x31   : > { %1080 = vmatprep.subr.bf16.mxu1 %v1141_v39 }
  0x32   : > { %1066 = vmatpush3.bf16.msra.mxu0 %v1141_v39 }
  0x33   : > { %1084 = vmatpush3.bf16.msra.mxu1 %v1141_v39  ;;  %1067 = vmatprep.subr.bf16.mxu0 %v1148_v44 }
  0x34   : > { %1081 = vmatprep.subr.bf16.mxu1 %v1148_v44 }
  0x35   : > { %640 = vmatmul.mubr.bf16.gmra.mxu0 %v1139_v40 }
  0x36   : > { %704 = vmatmul.mubr.bf16.gmra.mxu1 %v1140_v41  ;;  %647 = vmatprep.mubr.bf16.mxu0 %v1142_v42 }
  0x37   : > { %711 = vmatprep.mubr.bf16.mxu1 %v1144_v43  ;;  %1068 = vmatpush3.bf16.msra.mxu0 %v1148_v44 }
  0x38   : > { %1085 = vmatpush3.bf16.msra.mxu1 %v1148_v44  ;;  %1069 = vmatprep.subr.bf16.mxu0 %v1153_v45 }
  0x39   : > { %1082 = vmatprep.subr.bf16.mxu1 %v1153_v45 }
  0x3b   : > { %1070 = vmatpush3.bf16.msra.mxu0 %v1153_v45 }
  0x3c   : > { %1086 = vmatpush3.bf16.msra.mxu1 %v1153_v45 }
  0x3d   : > { %648 = vmatmul.mubr.bf16.gmra.mxu0 %v1146_v48 }
  0x3e   : > { %712 = vmatmul.mubr.bf16.gmra.mxu1 %v1147_v49  ;;  %655 = vmatprep.mubr.bf16.mxu0 %v915_v50 }
  0x3f   : > { %719 = vmatprep.mubr.bf16.mxu1 %v917_v51 }
  0x45   : > { %656 = vmatmul.mubr.bf16.gmra.mxu0 %v914_v52 }
  0x46   : > { %720 = vmatmul.mubr.bf16.gmra.mxu1 %v916_v53  ;;  %1071 = vmatprep.mubr.msk.bf16.mxu0 %vm586_vm0, %v1154_v54 }
  0x47   : > { %1075 = vmatprep.mubr.msk.bf16.mxu1 %vm586_vm0, %v1155_v55 }
  0x4d   : > { %1072 = vmatmul.mubr.msk.bf16.vlgmr.msra.gmra.mxu0 %vm586_vm0, %v1156_v56 }
  0x4e   : > { %1076 = vmatmul.mubr.msk.bf16.vlgmr.msra.gmra.mxu1 %vm586_vm0, %v1157_v57 }
  0xed   : > { %v991_v58 = vpop.f32.mrf.mxu0 }
  0xee   : > { %v1031_v59 = vpop.f32.mrf.mxu1 }
  0xef   : > { %v992_v60 = vpop.f32.mrf.mxu0 }
  0xf0   : > { %v1032_v61 = vpop.f32.mrf.mxu1  ;;  %v993_v19 = vadd.f32 %v992_v60, %v991_v58 }
  0xf1   : > { %v994_v62 = vpop.f32.mrf.mxu0  ;;  %v1033_v39 = vadd.f32 %v1032_v61, %v1031_v59 }
  0xf2   : > { %v1034_v63 = vpop.f32.mrf.mxu1  ;;  %v634_v29 = vadd.f32 %v993_v19, %v898_v21 }
  0xf3   : > { %v995_v0 = vpop.f32.mrf.mxu0 }
  0xf4   : > { %v1035_v1 = vpop.f32.mrf.mxu1  ;;  %v996_v31 = vadd.f32 %v995_v0, %v994_v62  ;;  %v698_v50 = vadd.f32 %v1033_v39, %v634_v29 }
  0xf5   : > { %v997_v2 = vpop.f32.mrf.mxu0  ;;  %v1036_v55 = vadd.f32 %v1035_v1, %v1034_v63 }
  0xf6   : > { %v1037_v3 = vpop.f32.mrf.mxu1  ;;  %v637_v46 = vadd.f32 %v996_v31, %v898_v21 }
  0xf7   : > { %v998_v4 = vpop.f32.mrf.mxu0 }
  0xf8   : > { %v1038_v5 = vpop.f32.mrf.mxu1  ;;  %v999_v17 = vadd.f32 %v998_v4, %v997_v2  ;;  %v701_v4 = vadd.f32 %v1036_v55, %v637_v46 }
  0xf9   : > { %v1000_v6 = vpop.f32.mrf.mxu0  ;;  %v1039_v32 = vadd.f32 %v1038_v5, %v1037_v3 }
  0xfa   : > { %v1040_v7 = vpop.f32.mrf.mxu1  ;;  %v642_v25 = vadd.f32 %v999_v17, %v898_v21 }
  0xfb   : > { %v1001_v8 = vpop.f32.mrf.mxu0 }
  0xfc   : > { %v1041_v9 = vpop.f32.mrf.mxu1  ;;  %v1002_v26 = vadd.f32 %v1001_v8, %v1000_v6  ;;  %v706_v42 = vadd.f32 %v1039_v32, %v642_v25 }
  0xfd   : > { %v1003_v10 = vpop.f32.mrf.mxu0  ;;  %v1042_v47 = vadd.f32 %v1041_v9, %v1040_v7 }
  0xfe   : > { %v1043_v11 = vpop.f32.mrf.mxu1  ;;  %v645_v40 = vadd.f32 %v1002_v26, %v898_v21 }
  0xff   : > { %v1004_v12 = vpop.f32.mrf.mxu0 }
 0x100   : > { %v1044_v13 = vpop.f32.mrf.mxu1  ;;  %v1005_v23 = vadd.f32 %v1004_v12, %v1003_v10  ;;  %v709_v59 = vadd.f32 %v1042_v47, %v645_v40 }
 0x101   : > { %v1006_v14 = vpop.f32.mrf.mxu0  ;;  %v1045_v44 = vadd.f32 %v1044_v13, %v1043_v11 }
 0x102   : > { %v1046_v15 = vpop.f32.mrf.mxu1  ;;  %v650_v36 = vadd.f32 %v1005_v23, %v898_v21 }
 0x103   : > { %v1007_v16 = vpop.f32.mrf.mxu0 }
 0x104   : > { %v1047_v18 = vpop.f32.mrf.mxu1  ;;  %v1008_v37 = vadd.f32 %v1007_v16, %v1006_v14  ;;  %v714_v54 = vadd.f32 %v1045_v44, %v650_v36 }
 0x105   : > { %v1009_v20 = vpop.f32.mrf.mxu0  ;;  %v1048_v60 = vadd.f32 %v1047_v18, %v1046_v15 }
 0x106   : > { %v1049_v22 = vpop.f32.mrf.mxu1  ;;  %v653_v51 = vadd.f32 %v1008_v37, %v898_v21 }
 0x107   : > { %v1010_v24 = vpop.f32.mrf.mxu0 }
 0x108   : > { %v1011_v27 = vadd.f32 %v1010_v24, %v1009_v20  ;;  %v1050_v28 = vpop.f32.mrf.mxu1  ;;  %v717_v8 = vadd.f32 %v1048_v60, %v653_v51 }
 0x109   : > { %v1012_v30 = vpop.f32.mrf.mxu0  ;;  %v1051_v34 = vadd.f32 %v1050_v28, %v1049_v22 }
 0x10a   : > { %v658_v33 = vadd.f32 %v1011_v27, %v898_v21  ;;  %v1052_v35 = vpop.f32.mrf.mxu1 }
 0x10b   : > { %v1013_v38 = vpop.f32.mrf.mxu0 }
 0x10c   : > { %v1053_v41 = vpop.f32.mrf.mxu1  ;;  %v722_v43 = vadd.f32 %v1051_v34, %v658_v33 }
 0x10d   : > { %v1073_v45 = vpop.f32.mrf.mxu0 }
 0x10e   : > { %v770_v48 = vadd.f32 %v1073_v45, %v706_v42  ;;  %v1077_v49 = vpop.f32.mrf.mxu1 }
 0x10f   : > { %v786_v52 = vadd.f32 %v1077_v49, %v722_v43  ;;  %v761_v53 = vpop.f32.mrf.mxu0 }
 0x110   : > { %v793_v56 = vmax.f32 %v770_v48, 0.0  ;;  %v762_v57 = vadd.f32 %v761_v53, %v698_v50  ;;  %v777_v58 = vpop.f32.mrf.mxu1 }
 0x111   : > { %v797_v61 = vmax.f32 %v786_v52, 0.0  ;;  %v778_v62 = vadd.f32 %v777_v58, %v714_v54  ;;  %v1074_v0 = vpop.f32.mrf.mxu0 }
 0x112   : > { %v970_v2 = vpack.c.bf16 %v793_v56, %v793_v56  ;;  %v791_v3 = vmax.f32 %v762_v57, 0.0  ;;  %v773_v63 = vadd.f32 %v1074_v0, %v709_v59  ;;  %v1078_v1 = vpop.f32.mrf.mxu1 }
 0x113   : > { %v974_v5 = vpack.c.bf16 %v797_v61, %v797_v61  ;;  %v795_v6 = vmax.f32 %v778_v62, 0.0  ;;  %v764_v7 = vpop.f32.mrf.mxu0 }
 0x114   : > { %830 = vst.msk [vmem:[%s1337_s21 + $0x8] sm:$0xf] %vm827_vm1, %v970_v2  ;;  %v968_v9 = vpack.c.bf16 %v791_v3, %v791_v3  ;;  %v794_v10 = vmax.f32 %v773_v63, 0.0  ;;  %v765_v11 = vadd.f32 %v764_v7, %v701_v4  ;;  %v780_v12 = vpop.f32.mrf.mxu1 }
 0x115   : > { %834 = vst.msk [vmem:[%s1337_s21 + $0x18] sm:$0xf] %vm827_vm1, %v974_v5  ;;  %v972_v13 = vpack.c.bf16 %v795_v6, %v795_v6  ;;  %v781_v14 = vadd.f32 %v780_v12, %v717_v8 }
 0x116   : > { %828 = vst.msk [vmem:[%s1337_s21] sm:$0xf] %vm827_vm1, %v968_v9  ;;  %v971_v15 = vpack.c.bf16 %v794_v10, %v794_v10  ;;  %v792_v16 = vmax.f32 %v765_v11, 0.0 }
 0x117   : > { %832 = vst.msk [vmem:[%s1337_s21 + $0x10] sm:$0xf] %vm827_vm1, %v972_v13  ;;  %v796_v17 = vmax.f32 %v781_v14, 0.0 }
 0x118   : > { %831 = vst.msk [vmem:[%s1337_s21 + $0xc] sm:$0xf] %vm827_vm1, %v971_v15  ;;  %v969_v18 = vpack.c.bf16 %v792_v16, %v792_v16 }
 0x119   : > { %v973_v19 = vpack.c.bf16 %v796_v17, %v796_v17 }
 0x11a   : > { %829 = vst.msk [vmem:[%s1337_s21 + $0x4] sm:$0xf] %vm827_vm1, %v969_v18 }
 0x11b   : > { %833 = vst.msk [vmem:[%s1337_s21 + $0x14] sm:$0xf] %vm827_vm1, %v973_v19 }
 0x11c PF: > { %s13_s12 = sadd.s32 1, %s1164_s12  }
 0x11d   : > { %p10_p4 = scmp.ge.s32.totalorder %s13_s12, 4  }
 0x11f   :  { %12 = sbr.rel (!%p10_p4) target bundleno = 1 (0x1), region = 62 }

// kernel: actor_critic_forward.7
= control target key start
LH: loop header
LB: loop body
LE: loop exit
PB: predicated region body
PF: predicated region fallthrough
CT: control target
= control target key end

     0   :  { %v811_v36 = vlaneseq  ;;  %v8444_v37 = vmov 1966171168   ;;  %vm4940_vm0 = vcmask 523264   ;;  %s11187_s1 = inlined_call_operand.vmem [shape: bf16[3136,512], index: 1, kind: input, shape index: {}]   ;;  %s11188_s0 = inlined_call_operand.vmem [shape: bf16[2,3136], index: 0, kind: input, shape index: {}]   ;;  %s11189_s2 = inlined_call_operand.vmem [shape: f32[1,512], index: 2, kind: input, shape index: {}]   ;;  %s11190_s3 = inlined_call_operand.vmem [shape: bf16[512,128], index: 3, kind: input, shape index: {}]   ;;  %s11191_s4 = inlined_call_operand.vmem [shape: f32[1,128], index: 4, kind: input, shape index: {}]   ;;  %s11192_s5 = inlined_call_operand.vmem [shape: f32[2,128], index: 5, kind: output, shape index: {}]  }
   0x1   :  { %v7232_v0 = vld [vmem:[%s11187_s1 + $0xe4] ss:$16 sps:$4 sm:$0xff]   ;;  %v7236_v2 = vld [vmem:[%s11187_s1 + $0xe0] ss:$16 sps:$4 sm:$0xff]   ;;  %v837_v38 = vunpack.c.l.s4 %v8444_v37 }
   0x2   :  { %v7234_v1 = vld [vmem:[%s11187_s1 + $0x2e4] ss:$16 sps:$4 sm:$0xff]   ;;  %4944 = vmatprep.subr.bf16.mxu0 %v7232_v0  ;;  %v7237_v3 = vld [vmem:[%s11187_s1 + $0x2e0] ss:$16 sps:$4 sm:$0xff]   ;;  %v8593_v42 = vshrl.u32 %v811_v36, 7 }
   0x3   :  { %4985 = vmatprep.subr.bf16.mxu1 %v7234_v1  ;;  %v7238_v4 = vld [vmem:[%s11187_s1 + $0xc4] ss:$16 sps:$4 sm:$0xff]   ;;  %4945 = vmatpush1.bf16.msra.mxu0 %v7236_v2  ;;  %v7242_v6 = vld [vmem:[%s11187_s1 + $0xc0] ss:$16 sps:$4 sm:$0xff]   ;;  %v838_v43 = vunpack.c.0.s8 %v837_v38 }
   0x4   :  { %4986 = vmatpush1.bf16.msra.mxu1 %v7237_v3  ;;  %v7240_v5 = vld [vmem:[%s11187_s1 + $0x2c4] ss:$16 sps:$4 sm:$0xff]   ;;  %4946 = vmatprep.subr.bf16.mxu0 %v7238_v4  ;;  %v7243_v7 = vld [vmem:[%s11187_s1 + $0x2c0] ss:$16 sps:$4 sm:$0xff]  }
   0x5   :  { %4987 = vmatprep.subr.bf16.mxu1 %v7240_v5  ;;  %v7244_v8 = vld [vmem:[%s11187_s1 + $0xa4] ss:$16 sps:$4 sm:$0xff]   ;;  %v7248_v10 = vld [vmem:[%s11187_s1 + $0xa0] ss:$16 sps:$4 sm:$0xff]   ;;  %v8611_v49 = vsub.s32 %v838_v43, %v8593_v42 }
   0x6   :  { %v7246_v9 = vld [vmem:[%s11187_s1 + $0x2a4] ss:$16 sps:$4 sm:$0xff]   ;;  %v7249_v11 = vld [vmem:[%s11187_s1 + $0x2a0] ss:$16 sps:$4 sm:$0xff]  }
   0x7   :  { %4947 = vmatpush1.bf16.msra.mxu0 %v7242_v6  ;;  %v7250_v12 = vld [vmem:[%s11187_s1 + $0x84] ss:$16 sps:$4 sm:$0xff]   ;;  %v7254_v14 = vld [vmem:[%s11187_s1 + $0x80] ss:$16 sps:$4 sm:$0xff]  }
   0x8   :  { %4988 = vmatpush1.bf16.msra.mxu1 %v7243_v7  ;;  %4948 = vmatprep.subr.bf16.mxu0 %v7244_v8  ;;  %v7252_v13 = vld [vmem:[%s11187_s1 + $0x284] ss:$16 sps:$4 sm:$0xff]   ;;  %v7255_v15 = vld [vmem:[%s11187_s1 + $0x280] ss:$16 sps:$4 sm:$0xff]  }
   0x9   :  { %4989 = vmatprep.subr.bf16.mxu1 %v7246_v9  ;;  %v7256_v16 = vld [vmem:[%s11187_s1 + $0x64] ss:$16 sps:$4 sm:$0xff]   ;;  %v7260_v18 = vld [vmem:[%s11187_s1 + $0x60] ss:$16 sps:$4 sm:$0xff]  }
   0xa   :  { %v7258_v17 = vld [vmem:[%s11187_s1 + $0x264] ss:$16 sps:$4 sm:$0xff]   ;;  %v7261_v19 = vld [vmem:[%s11187_s1 + $0x260] ss:$16 sps:$4 sm:$0xff]  }
   0xb   :  { %4949 = vmatpush1.bf16.msra.mxu0 %v7248_v10  ;;  %v7262_v20 = vld [vmem:[%s11187_s1 + $0x44] ss:$16 sps:$4 sm:$0xff]   ;;  %v7266_v22 = vld [vmem:[%s11187_s1 + $0x40] ss:$16 sps:$4 sm:$0xff]  }
   0xc   :  { %4990 = vmatpush1.bf16.msra.mxu1 %v7249_v11  ;;  %4950 = vmatprep.subr.bf16.mxu0 %v7250_v12  ;;  %v7264_v21 = vld [vmem:[%s11187_s1 + $0x244] ss:$16 sps:$4 sm:$0xff]   ;;  %v7267_v23 = vld [vmem:[%s11187_s1 + $0x240] ss:$16 sps:$4 sm:$0xff]  }
   0xd   :  { %4991 = vmatprep.subr.bf16.mxu1 %v7252_v13  ;;  %v7268_v24 = vld [vmem:[%s11187_s1 + $0x24] ss:$16 sps:$4 sm:$0xff]   ;;  %v7272_v26 = vld [vmem:[%s11187_s1 + $0x20] ss:$16 sps:$4 sm:$0xff]  }
   0xe   :  { %v7270_v25 = vld [vmem:[%s11187_s1 + $0x224] ss:$16 sps:$4 sm:$0xff]   ;;  %v7273_v27 = vld [vmem:[%s11187_s1 + $0x220] ss:$16 sps:$4 sm:$0xff]  }
   0xf   :  { %4951 = vmatpush1.bf16.msra.mxu0 %v7254_v14  ;;  %v7274_v28 = vld [vmem:[%s11187_s1 + $0x4] ss:$16 sps:$4 sm:$0xff]   ;;  %v7278_v30 = vld [vmem:[%s11187_s1] ss:$16 sps:$4 sm:$0xff]  }
  0x10   :  { %4992 = vmatpush1.bf16.msra.mxu1 %v7255_v15  ;;  %4952 = vmatprep.subr.bf16.mxu0 %v7256_v16  ;;  %v7276_v29 = vld [vmem:[%s11187_s1 + $0x204] ss:$16 sps:$4 sm:$0xff]   ;;  %v7279_v31 = vld [vmem:[%s11187_s1 + $0x200] ss:$16 sps:$4 sm:$0xff]  }
  0x11   :  { %4993 = vmatprep.subr.bf16.mxu1 %v7258_v17  ;;  %v7280_v32 = vld [vmem:[%s11187_s1 + $0x1e4] ss:$16 sps:$4 sm:$0xff]   ;;  %v7284_v34 = vld [vmem:[%s11187_s1 + $0x1e0] ss:$16 sps:$4 sm:$0xff]  }
  0x12   :  { %v7282_v33 = vld [vmem:[%s11187_s1 + $0x3e4] ss:$16 sps:$4 sm:$0xff]   ;;  %v7285_v35 = vld [vmem:[%s11187_s1 + $0x3e0] ss:$16 sps:$4 sm:$0xff]  }
  0x13   :  { %4953 = vmatpush1.bf16.msra.mxu0 %v7260_v18  ;;  %v7286_v39 = vld [vmem:[%s11187_s1 + $0x1c4] ss:$16 sps:$4 sm:$0xff]   ;;  %v7290_v41 = vld [vmem:[%s11187_s1 + $0x1c0] ss:$16 sps:$4 sm:$0xff]  }
  0x14   :  { %4994 = vmatpush1.bf16.msra.mxu1 %v7261_v19  ;;  %4954 = vmatprep.subr.bf16.mxu0 %v7262_v20  ;;  %v7288_v40 = vld [vmem:[%s11187_s1 + $0x3c4] ss:$16 sps:$4 sm:$0xff]   ;;  %v7291_v44 = vld [vmem:[%s11187_s1 + $0x3c0] ss:$16 sps:$4 sm:$0xff]  }
  0x15   :  { %4995 = vmatprep.subr.bf16.mxu1 %v7264_v21  ;;  %v7292_v45 = vld [vmem:[%s11187_s1 + $0x1a4] ss:$16 sps:$4 sm:$0xff]   ;;  %v7296_v47 = vld [vmem:[%s11187_s1 + $0x1a0] ss:$16 sps:$4 sm:$0xff]  }
  0x16   :  { %v7294_v46 = vld [vmem:[%s11187_s1 + $0x3a4] ss:$16 sps:$4 sm:$0xff]   ;;  %v7297_v48 = vld [vmem:[%s11187_s1 + $0x3a0] ss:$16 sps:$4 sm:$0xff]  }
  0x17   :  { %4955 = vmatpush1.bf16.msra.mxu0 %v7266_v22  ;;  %v7298_v50 = vld [vmem:[%s11187_s1 + $0x184] ss:$16 sps:$4 sm:$0xff]   ;;  %v7302_v53 = vld [vmem:[%s11187_s1 + $0x180] ss:$16 sps:$4 sm:$0xff]  }
  0x18   :  { %4996 = vmatpush1.bf16.msra.mxu1 %v7267_v23  ;;  %4956 = vmatprep.subr.bf16.mxu0 %v7268_v24  ;;  %v7300_v51 = vld [vmem:[%s11187_s1 + $0x384] ss:$16 sps:$4 sm:$0xff]   ;;  %v7303_v55 = vld [vmem:[%s11187_s1 + $0x380] ss:$16 sps:$4 sm:$0xff]  }
  0x19   :  { %4997 = vmatprep.subr.bf16.mxu1 %v7270_v25  ;;  %v21_v52 = vld [vmem:[%s11188_s0] sm:$0xff] }
  0x1a   :  { %v842_v54 = vrot.slane %v21_v52, %v8611_v49  ;;  %v7304_v56 = vld [vmem:[%s11187_s1 + $0x164] ss:$16 sps:$4 sm:$0xff]   ;;  %v7308_v59 = vld [vmem:[%s11187_s1 + $0x160] ss:$16 sps:$4 sm:$0xff]   ;;  %v835_v1 = vcombine.high %v21_v52, %v21_v52 }
  0x1b   :  { %4957 = vmatpush1.bf16.msra.mxu0 %v7272_v26  ;;  %v7306_v57 = vld [vmem:[%s11187_s1 + $0x364] ss:$16 sps:$4 sm:$0xff]   ;;  %v7309_v61 = vld [vmem:[%s11187_s1 + $0x360] ss:$16 sps:$4 sm:$0xff]  }
  0x1c   :  { %4998 = vmatpush1.bf16.msra.mxu1 %v7273_v27  ;;  %4958 = vmatprep.subr.bf16.mxu0 %v7274_v28  ;;  %v850_v58 = vcombine.high %v842_v54, %v842_v54  ;;  %v7310_v62 = vld [vmem:[%s11187_s1 + $0x144] ss:$16 sps:$4 sm:$0xff]   ;;  %v7314_v2 = vld [vmem:[%s11187_s1 + $0x140] ss:$16 sps:$4 sm:$0xff]   ;;  %v8669_v6 = vrot.slane %v835_v1, %v8611_v49  ;;  %v8689_v13 = vrot.slane %v842_v54, %v8611_v49 }
  0x1d   :  { %4999 = vmatprep.subr.bf16.mxu1 %v7276_v29  ;;  %v7312_v63 = vld [vmem:[%s11187_s1 + $0x344] ss:$16 sps:$4 sm:$0xff]   ;;  %v7315_v3 = vld [vmem:[%s11187_s1 + $0x340] ss:$16 sps:$4 sm:$0xff]  }
  0x1e   :  { %v8639_v60 = vrot.slane %v850_v58, %v8611_v49  ;;  %v7316_v4 = vld [vmem:[%s11187_s1 + $0x124] ss:$16 sps:$4 sm:$0xff]   ;;  %v7320_v7 = vld [vmem:[%s11187_s1 + $0x120] ss:$16 sps:$4 sm:$0xff]   ;;  %v851_v11 = vcombine.high %v8669_v6, %v8669_v6  ;;  %v8705_v18 = vcombine.high %v8689_v13, %v8689_v13 }
  0x1f   :  { %4959 = vmatpush1.bf16.msra.mxu0 %v7278_v30  ;;  %v7318_v5 = vld [vmem:[%s11187_s1 + $0x324] ss:$16 sps:$4 sm:$0xff]   ;;  %v7321_v8 = vld [vmem:[%s11187_s1 + $0x320] ss:$16 sps:$4 sm:$0xff]  }
  0x20   :  { %5000 = vmatpush1.bf16.msra.mxu1 %v7279_v31  ;;  %4960 = vmatprep.subr.bf16.mxu0 %v7280_v32  ;;  %v8652_v0 = vcombine.high %v8639_v60, %v8639_v60  ;;  %v7322_v9 = vld [vmem:[%s11187_s1 + $0x104] ss:$16 sps:$4 sm:$0xff]   ;;  %v7326_v12 = vld [vmem:[%s11187_s1 + $0x100] ss:$16 sps:$4 sm:$0xff]   ;;  %v8701_v17 = vrot.slane %v851_v11, %v8611_v49 }
  0x21   :  { %5001 = vmatprep.subr.bf16.mxu1 %v7282_v33  ;;  %4976 = vmatprep.mubr.bf16.mxu0 %v8639_v60  ;;  %v7324_v10 = vld [vmem:[%s11187_s1 + $0x304] ss:$16 sps:$4 sm:$0xff]   ;;  %v7327_v14 = vld [vmem:[%s11187_s1 + $0x300] ss:$16 sps:$4 sm:$0xff]  }
  0x22   :  { %5017 = vmatprep.mubr.bf16.mxu1 %v8652_v0  ;;  %v7330_v15 = vld [vmem:[%s11187_s1 + $0x4e4] ss:$16 sps:$4 sm:$0xff]   ;;  %v7328_v19 = vld [vmem:[%s11187_s1 + $0x4e0] ss:$16 sps:$4 sm:$0xff]   ;;  %v8721_v23 = vcombine.high %v8701_v17, %v8701_v17 }
  0x23   :  { %4961 = vmatpush2.bf16.msra.mxu0 %v7284_v34  ;;  %v7333_v16 = vld [vmem:[%s11187_s1 + $0x6e4] ss:$16 sps:$4 sm:$0xff]   ;;  %v7331_v20 = vld [vmem:[%s11187_s1 + $0x6e0] ss:$16 sps:$4 sm:$0xff]  }
  0x24   :  { %5002 = vmatpush2.bf16.msra.mxu1 %v7285_v35  ;;  %4962 = vmatprep.subr.bf16.mxu0 %v7286_v39  ;;  %v7336_v21 = vld [vmem:[%s11187_s1 + $0x4c4] ss:$16 sps:$4 sm:$0xff]   ;;  %v7334_v24 = vld [vmem:[%s11187_s1 + $0x4c0] ss:$16 sps:$4 sm:$0xff]  }
  0x25   :  { %5003 = vmatprep.subr.bf16.mxu1 %v7288_v40  ;;  %v7339_v22 = vld [vmem:[%s11187_s1 + $0x6c4] ss:$16 sps:$4 sm:$0xff]   ;;  %v7337_v25 = vld [vmem:[%s11187_s1 + $0x6c0] ss:$16 sps:$4 sm:$0xff]  }
  0x26   :  { %v7342_v26 = vld [vmem:[%s11187_s1 + $0x4a4] ss:$16 sps:$4 sm:$0xff]   ;;  %v7340_v28 = vld [vmem:[%s11187_s1 + $0x4a0] ss:$16 sps:$4 sm:$0xff]  }
  0x27   :  { %4963 = vmatpush2.bf16.msra.mxu0 %v7290_v41  ;;  %v7345_v27 = vld [vmem:[%s11187_s1 + $0x6a4] ss:$16 sps:$4 sm:$0xff]   ;;  %v7343_v29 = vld [vmem:[%s11187_s1 + $0x6a0] ss:$16 sps:$4 sm:$0xff]  }
  0x28   :  { %5004 = vmatpush2.bf16.msra.mxu1 %v7291_v44  ;;  %4964 = vmatprep.subr.bf16.mxu0 %v7292_v45  ;;  %v7348_v30 = vld [vmem:[%s11187_s1 + $0x484] ss:$16 sps:$4 sm:$0xff]   ;;  %v7346_v32 = vld [vmem:[%s11187_s1 + $0x480] ss:$16 sps:$4 sm:$0xff]  }
  0x29   :  { %5005 = vmatprep.subr.bf16.mxu1 %v7294_v46  ;;  %v7351_v31 = vld [vmem:[%s11187_s1 + $0x684] ss:$16 sps:$4 sm:$0xff]   ;;  %v7349_v33 = vld [vmem:[%s11187_s1 + $0x680] ss:$16 sps:$4 sm:$0xff]  }
  0x2a   :  { %v7354_v34 = vld [vmem:[%s11187_s1 + $0x464] ss:$16 sps:$4 sm:$0xff]   ;;  %v7352_v36 = vld [vmem:[%s11187_s1 + $0x460] ss:$16 sps:$4 sm:$0xff]  }
  0x2b   :  { %4965 = vmatpush2.bf16.msra.mxu0 %v7296_v47  ;;  %v7357_v35 = vld [vmem:[%s11187_s1 + $0x664] ss:$16 sps:$4 sm:$0xff]   ;;  %v7355_v37 = vld [vmem:[%s11187_s1 + $0x660] ss:$16 sps:$4 sm:$0xff]  }
  0x2c   :  { %5006 = vmatpush2.bf16.msra.mxu1 %v7297_v48  ;;  %4966 = vmatprep.subr.bf16.mxu0 %v7298_v50  ;;  %v7360_v38 = vld [vmem:[%s11187_s1 + $0x444] ss:$16 sps:$4 sm:$0xff]   ;;  %v7358_v40 = vld [vmem:[%s11187_s1 + $0x440] ss:$16 sps:$4 sm:$0xff]  }
  0x2d   :  { %5007 = vmatprep.subr.bf16.mxu1 %v7300_v51  ;;  %v7363_v39 = vld [vmem:[%s11187_s1 + $0x644] ss:$16 sps:$4 sm:$0xff]   ;;  %v7361_v41 = vld [vmem:[%s11187_s1 + $0x640] ss:$16 sps:$4 sm:$0xff]  }
  0x2e   :  { %v7366_v43 = vld [vmem:[%s11187_s1 + $0x424] ss:$16 sps:$4 sm:$0xff]   ;;  %v7364_v45 = vld [vmem:[%s11187_s1 + $0x420] ss:$16 sps:$4 sm:$0xff]  }
  0x2f   :  { %4967 = vmatpush2.bf16.msra.mxu0 %v7302_v53  ;;  %v7369_v44 = vld [vmem:[%s11187_s1 + $0x624] ss:$16 sps:$4 sm:$0xff]   ;;  %v7367_v46 = vld [vmem:[%s11187_s1 + $0x620] ss:$16 sps:$4 sm:$0xff]  }
  0x30   :  { %5008 = vmatpush2.bf16.msra.mxu1 %v7303_v55  ;;  %4968 = vmatprep.subr.bf16.mxu0 %v7304_v56  ;;  %v7372_v47 = vld [vmem:[%s11187_s1 + $0x404] ss:$16 sps:$4 sm:$0xff]   ;;  %v7370_v50 = vld [vmem:[%s11187_s1 + $0x400] ss:$16 sps:$4 sm:$0xff]  }
  0x31   :  { %5009 = vmatprep.subr.bf16.mxu1 %v7306_v57  ;;  %v7375_v48 = vld [vmem:[%s11187_s1 + $0x604] ss:$16 sps:$4 sm:$0xff]   ;;  %v7373_v51 = vld [vmem:[%s11187_s1 + $0x600] ss:$16 sps:$4 sm:$0xff]  }
  0x32   :  { %v7378_v52 = vld [vmem:[%s11187_s1 + $0x5e4] ss:$16 sps:$4 sm:$0xff]   ;;  %v7376_v54 = vld [vmem:[%s11187_s1 + $0x5e0] ss:$16 sps:$4 sm:$0xff]  }
  0x33   :  { %4969 = vmatpush2.bf16.msra.mxu0 %v7308_v59  ;;  %v7381_v53 = vld [vmem:[%s11187_s1 + $0x7e4] ss:$16 sps:$4 sm:$0xff]   ;;  %v7379_v55 = vld [vmem:[%s11187_s1 + $0x7e0] ss:$16 sps:$4 sm:$0xff]  }
  0x34   :  { %5010 = vmatpush2.bf16.msra.mxu1 %v7309_v61  ;;  %4970 = vmatprep.subr.bf16.mxu0 %v7310_v62  ;;  %v7384_v56 = vld [vmem:[%s11187_s1 + $0x5c4] ss:$16 sps:$4 sm:$0xff]   ;;  %v7382_v58 = vld [vmem:[%s11187_s1 + $0x5c0] ss:$16 sps:$4 sm:$0xff]  }
  0x35   :  { %5011 = vmatprep.subr.bf16.mxu1 %v7312_v63  ;;  %v7387_v57 = vld [vmem:[%s11187_s1 + $0x7c4] ss:$16 sps:$4 sm:$0xff]   ;;  %v7385_v59 = vld [vmem:[%s11187_s1 + $0x7c0] ss:$16 sps:$4 sm:$0xff]  }
  0x36   :  { %v7390_v61 = vld [vmem:[%s11187_s1 + $0x5a4] ss:$16 sps:$4 sm:$0xff]   ;;  %v7388_v63 = vld [vmem:[%s11187_s1 + $0x5a0] ss:$16 sps:$4 sm:$0xff]  }
  0x37   :  { %4971 = vmatpush2.bf16.msra.mxu0 %v7314_v2  ;;  %v7393_v62 = vld [vmem:[%s11187_s1 + $0x7a4] ss:$16 sps:$4 sm:$0xff]   ;;  %v7391_v1 = vld [vmem:[%s11187_s1 + $0x7a0] ss:$16 sps:$4 sm:$0xff]  }
  0x38   :  { %5012 = vmatpush2.bf16.msra.mxu1 %v7315_v3  ;;  %4972 = vmatprep.subr.bf16.mxu0 %v7316_v4  ;;  %v7396_v2 = vld [vmem:[%s11187_s1 + $0x584] ss:$16 sps:$4 sm:$0xff]   ;;  %v7394_v4 = vld [vmem:[%s11187_s1 + $0x580] ss:$16 sps:$4 sm:$0xff]  }
  0x39   :  { %5013 = vmatprep.subr.bf16.mxu1 %v7318_v5  ;;  %v7399_v3 = vld [vmem:[%s11187_s1 + $0x784] ss:$16 sps:$4 sm:$0xff]   ;;  %v7397_v5 = vld [vmem:[%s11187_s1 + $0x780] ss:$16 sps:$4 sm:$0xff]  }
  0x3a   :  { %v7408_v11 = vld [vmem:[%s11187_s1 + $0x544] ss:$16 sps:$4 sm:$0xff]  }
  0x3b   :  { %4973 = vmatpush2.bf16.msra.mxu0 %v7320_v7  ;;  %v7402_v7 = vld [vmem:[%s11187_s1 + $0x564] ss:$16 sps:$4 sm:$0xff]  }
  0x3c   :  { %5014 = vmatpush2.bf16.msra.mxu1 %v7321_v8  ;;  %4974 = vmatprep.subr.bf16.mxu0 %v7322_v9  ;;  %v7405_v8 = vld [vmem:[%s11187_s1 + $0x764] ss:$16 sps:$4 sm:$0xff]   ;;  %v7400_v9 = vld [vmem:[%s11187_s1 + $0x560] ss:$16 sps:$4 sm:$0xff]  }
  0x3d   :  { %5015 = vmatprep.subr.bf16.mxu1 %v7324_v10  ;;  %v7403_v10 = vld [vmem:[%s11187_s1 + $0x760] ss:$16 sps:$4 sm:$0xff]  }
  0x3f   :  { %4975 = vmatpush2.bf16.msra.mxu0 %v7326_v12  ;;  %v7411_v12 = vld [vmem:[%s11187_s1 + $0x744] ss:$16 sps:$4 sm:$0xff]  }
  0x40   :  { %5016 = vmatpush2.bf16.msra.mxu1 %v7327_v14  ;;  %5026 = vmatprep.subr.bf16.mxu0 %v7330_v15  ;;  %v7406_v14 = vld [vmem:[%s11187_s1 + $0x540] ss:$16 sps:$4 sm:$0xff]  }
  0x41   :  { %5067 = vmatprep.subr.bf16.mxu1 %v7333_v16  ;;  %v7409_v15 = vld [vmem:[%s11187_s1 + $0x740] ss:$16 sps:$4 sm:$0xff]   ;;  %v7414_v16 = vld [vmem:[%s11187_s1 + $0x524] ss:$16 sps:$4 sm:$0xff]  }
  0x42   :  { %4977 = vmatmul.mubr.bf16.vlgmr.msra.gmra.mxu0 %v8689_v13 }
  0x43   :  { %5018 = vmatmul.mubr.bf16.vlgmr.msra.gmra.mxu1 %v8705_v18  ;;  %5027 = vmatpush1.bf16.msra.mxu0 %v7328_v19  ;;  %v7417_v19 = vld [vmem:[%s11187_s1 + $0x724] ss:$16 sps:$4 sm:$0xff]  }
  0x44   :  { %5068 = vmatpush1.bf16.msra.mxu1 %v7331_v20  ;;  %5028 = vmatprep.subr.bf16.mxu0 %v7336_v21  ;;  %v7412_v20 = vld [vmem:[%s11187_s1 + $0x520] ss:$16 sps:$4 sm:$0xff]  }
  0x45   :  { %5069 = vmatprep.subr.bf16.mxu1 %v7339_v22  ;;  %5058 = vmatprep.mubr.bf16.mxu0 %v8701_v17  ;;  %v7415_v21 = vld [vmem:[%s11187_s1 + $0x720] ss:$16 sps:$4 sm:$0xff]   ;;  %v7420_v22 = vld [vmem:[%s11187_s1 + $0x504] ss:$16 sps:$4 sm:$0xff]  }
  0x46   :  { %5099 = vmatprep.mubr.bf16.mxu1 %v8721_v23 }
  0x47   :  { %5029 = vmatpush1.bf16.msra.mxu0 %v7334_v24  ;;  %v7423_v24 = vld [vmem:[%s11187_s1 + $0x704] ss:$16 sps:$4 sm:$0xff]  }
  0x48   :  { %5070 = vmatpush1.bf16.msra.mxu1 %v7337_v25  ;;  %5030 = vmatprep.subr.bf16.mxu0 %v7342_v26  ;;  %v7418_v25 = vld [vmem:[%s11187_s1 + $0x500] ss:$16 sps:$4 sm:$0xff]   ;;  %v8900_v26 = vrot.slane %v8669_v6, %v8611_v49 }
  0x49   :  { %5071 = vmatprep.subr.bf16.mxu1 %v7345_v27  ;;  %v7421_v27 = vld [vmem:[%s11187_s1 + $0x700] ss:$16 sps:$4 sm:$0xff]  }
  0x4a   :  { %v8913_v6 = vcombine.high %v8900_v26, %v8900_v26 }
  0x4b   :  { %5031 = vmatpush1.bf16.msra.mxu0 %v7340_v28  ;;  %v7427_v28 = vld [vmem:[%s11187_s1 + $0x8e4] ss:$16 sps:$4 sm:$0xff]  }
  0x4c   :  { %5072 = vmatpush1.bf16.msra.mxu1 %v7343_v29  ;;  %5032 = vmatprep.subr.bf16.mxu0 %v7348_v30  ;;  %v7430_v29 = vld [vmem:[%s11187_s1 + $0xae4] ss:$16 sps:$4 sm:$0xff]   ;;  %v7425_v30 = vld [vmem:[%s11187_s1 + $0x8e0] ss:$16 sps:$4 sm:$0xff]  }
  0x4d   :  { %5073 = vmatprep.subr.bf16.mxu1 %v7351_v31  ;;  %v7428_v31 = vld [vmem:[%s11187_s1 + $0xae0] ss:$16 sps:$4 sm:$0xff]  }
  0x4f   :  { %5033 = vmatpush1.bf16.msra.mxu0 %v7346_v32  ;;  %v8924_v32 = vld [vmem:[%s11188_s0 + $0x8] sm:$0xff] }
  0x50   :  { %5074 = vmatpush1.bf16.msra.mxu1 %v7349_v33  ;;  %5034 = vmatprep.subr.bf16.mxu0 %v7354_v34  ;;  %v7433_v33 = vld [vmem:[%s11187_s1 + $0x8c4] ss:$16 sps:$4 sm:$0xff]  }
  0x51   :  { %5075 = vmatprep.subr.bf16.mxu1 %v7357_v35  ;;  %v7436_v34 = vld [vmem:[%s11187_s1 + $0xac4] ss:$16 sps:$4 sm:$0xff]   ;;  %v8934_v35 = vrot.slane %v8924_v32, %v8611_v49 }
  0x53   :  { %5035 = vmatpush1.bf16.msra.mxu0 %v7352_v36  ;;  %v899_v36 = vcombine.high %v8934_v35, %v8934_v35 }
  0x54   :  { %5076 = vmatpush1.bf16.msra.mxu1 %v7355_v37  ;;  %5036 = vmatprep.subr.bf16.mxu0 %v7360_v38  ;;  %v7431_v37 = vld [vmem:[%s11187_s1 + $0x8c0] ss:$16 sps:$4 sm:$0xff]  }
  0x55   :  { %5077 = vmatprep.subr.bf16.mxu1 %v7363_v39  ;;  %v7434_v38 = vld [vmem:[%s11187_s1 + $0xac0] ss:$16 sps:$4 sm:$0xff]   ;;  %v7439_v39 = vld [vmem:[%s11187_s1 + $0x8a4] ss:$16 sps:$4 sm:$0xff]  }
  0x57   :  { %5037 = vmatpush1.bf16.msra.mxu0 %v7358_v40  ;;  %v7442_v40 = vld [vmem:[%s11187_s1 + $0xaa4] ss:$16 sps:$4 sm:$0xff]  }
  0x58   :  { %5078 = vmatpush1.bf16.msra.mxu1 %v7361_v41  ;;  %5038 = vmatprep.subr.bf16.mxu0 %v7366_v43  ;;  %v8953_v41 = vrot.slane %v899_v36, %v8611_v49  ;;  %v7503_v36 = vld [vmem:[%s11187_s1 + $0x940] ss:$16 sps:$4 sm:$0xff]  }
  0x59   :  { %5079 = vmatprep.subr.bf16.mxu1 %v7369_v44  ;;  %v7437_v44 = vld [vmem:[%s11187_s1 + $0x8a0] ss:$16 sps:$4 sm:$0xff]  }
  0x5a   :  { %v8958_v43 = vcombine.high %v8953_v41, %v8953_v41 }
  0x5b   :  { %5039 = vmatpush1.bf16.msra.mxu0 %v7364_v45  ;;  %v7440_v45 = vld [vmem:[%s11187_s1 + $0xaa0] ss:$16 sps:$4 sm:$0xff]  }
  0x5c   :  { %5080 = vmatpush1.bf16.msra.mxu1 %v7367_v46  ;;  %5040 = vmatprep.subr.bf16.mxu0 %v7372_v47  ;;  %v7445_v46 = vld [vmem:[%s11187_s1 + $0x884] ss:$16 sps:$4 sm:$0xff]  }
  0x5d   :  { %5081 = vmatprep.subr.bf16.mxu1 %v7375_v48  ;;  %v7448_v47 = vld [vmem:[%s11187_s1 + $0xa84] ss:$16 sps:$4 sm:$0xff]   ;;  %v7443_v48 = vld [vmem:[%s11187_s1 + $0x880] ss:$16 sps:$4 sm:$0xff]  }
  0x5f   :  { %5041 = vmatpush1.bf16.msra.mxu0 %v7370_v50  ;;  %v7446_v50 = vld [vmem:[%s11187_s1 + $0xa80] ss:$16 sps:$4 sm:$0xff]  }
  0x60   :  { %5082 = vmatpush1.bf16.msra.mxu1 %v7373_v51  ;;  %5042 = vmatprep.subr.bf16.mxu0 %v7378_v52  ;;  %v7451_v51 = vld [vmem:[%s11187_s1 + $0x864] ss:$16 sps:$4 sm:$0xff]  }
  0x61   :  { %5083 = vmatprep.subr.bf16.mxu1 %v7381_v53  ;;  %v7454_v52 = vld [vmem:[%s11187_s1 + $0xa64] ss:$16 sps:$4 sm:$0xff]   ;;  %v7449_v53 = vld [vmem:[%s11187_s1 + $0x860] ss:$16 sps:$4 sm:$0xff]  }
  0x63   :  { %5043 = vmatpush2.bf16.msra.mxu0 %v7376_v54  ;;  %v7452_v54 = vld [vmem:[%s11187_s1 + $0xa60] ss:$16 sps:$4 sm:$0xff]  }
  0x64   :  { %5084 = vmatpush2.bf16.msra.mxu1 %v7379_v55  ;;  %5044 = vmatprep.subr.bf16.mxu0 %v7384_v56  ;;  %v7457_v55 = vld [vmem:[%s11187_s1 + $0x844] ss:$16 sps:$4 sm:$0xff]  }
  0x65   :  { %5085 = vmatprep.subr.bf16.mxu1 %v7387_v57  ;;  %v7460_v56 = vld [vmem:[%s11187_s1 + $0xa44] ss:$16 sps:$4 sm:$0xff]   ;;  %v7455_v57 = vld [vmem:[%s11187_s1 + $0x840] ss:$16 sps:$4 sm:$0xff]  }
  0x67   :  { %5045 = vmatpush2.bf16.msra.mxu0 %v7382_v58  ;;  %v7458_v58 = vld [vmem:[%s11187_s1 + $0xa40] ss:$16 sps:$4 sm:$0xff]  }
  0x68   :  { %5086 = vmatpush2.bf16.msra.mxu1 %v7385_v59  ;;  %5046 = vmatprep.subr.bf16.mxu0 %v7390_v61  ;;  %v7463_v59 = vld [vmem:[%s11187_s1 + $0x824] ss:$16 sps:$4 sm:$0xff]  }
  0x69   :  { %5087 = vmatprep.subr.bf16.mxu1 %v7393_v62  ;;  %v7466_v61 = vld [vmem:[%s11187_s1 + $0xa24] ss:$16 sps:$4 sm:$0xff]   ;;  %v7461_v62 = vld [vmem:[%s11187_s1 + $0x820] ss:$16 sps:$4 sm:$0xff]  }
  0x6b   :  { %5047 = vmatpush2.bf16.msra.mxu0 %v7388_v63  ;;  %v7464_v63 = vld [vmem:[%s11187_s1 + $0xa20] ss:$16 sps:$4 sm:$0xff]  }
  0x6c   :  { %5088 = vmatpush2.bf16.msra.mxu1 %v7391_v1  ;;  %5048 = vmatprep.subr.bf16.mxu0 %v7396_v2  ;;  %v7469_v1 = vld [vmem:[%s11187_s1 + $0x804] ss:$16 sps:$4 sm:$0xff]  }
  0x6d   :  { %5089 = vmatprep.subr.bf16.mxu1 %v7399_v3  ;;  %v7472_v2 = vld [vmem:[%s11187_s1 + $0xa04] ss:$16 sps:$4 sm:$0xff]   ;;  %v7467_v3 = vld [vmem:[%s11187_s1 + $0x800] ss:$16 sps:$4 sm:$0xff]  }
  0x6f   :  { %5049 = vmatpush2.bf16.msra.mxu0 %v7394_v4  ;;  %v7470_v4 = vld [vmem:[%s11187_s1 + $0xa00] ss:$16 sps:$4 sm:$0xff]  }
  0x70   :  { %5090 = vmatpush2.bf16.msra.mxu1 %v7397_v5  ;;  %5050 = vmatprep.subr.bf16.mxu0 %v7402_v7  ;;  %v7475_v5 = vld [vmem:[%s11187_s1 + $0x9e4] ss:$16 sps:$4 sm:$0xff]  }
  0x71   :  { %5091 = vmatprep.subr.bf16.mxu1 %v7405_v8  ;;  %v7478_v7 = vld [vmem:[%s11187_s1 + $0xbe4] ss:$16 sps:$4 sm:$0xff]   ;;  %v7473_v8 = vld [vmem:[%s11187_s1 + $0x9e0] ss:$16 sps:$4 sm:$0xff]  }
  0x73   :  { %5051 = vmatpush2.bf16.msra.mxu0 %v7400_v9  ;;  %v7476_v9 = vld [vmem:[%s11187_s1 + $0xbe0] ss:$16 sps:$4 sm:$0xff]  }
  0x74   :  { %5092 = vmatpush2.bf16.msra.mxu1 %v7403_v10  ;;  %5052 = vmatprep.subr.bf16.mxu0 %v7408_v11  ;;  %v7481_v10 = vld [vmem:[%s11187_s1 + $0x9c4] ss:$16 sps:$4 sm:$0xff]  }
  0x75   :  { %5093 = vmatprep.subr.bf16.mxu1 %v7411_v12  ;;  %v7484_v11 = vld [vmem:[%s11187_s1 + $0xbc4] ss:$16 sps:$4 sm:$0xff]   ;;  %v7479_v12 = vld [vmem:[%s11187_s1 + $0x9c0] ss:$16 sps:$4 sm:$0xff]  }
  0x77   :  { %5053 = vmatpush2.bf16.msra.mxu0 %v7406_v14  ;;  %v7482_v14 = vld [vmem:[%s11187_s1 + $0xbc0] ss:$16 sps:$4 sm:$0xff]  }
  0x78   :  { %5094 = vmatpush2.bf16.msra.mxu1 %v7409_v15  ;;  %5054 = vmatprep.subr.bf16.mxu0 %v7414_v16  ;;  %v7487_v15 = vld [vmem:[%s11187_s1 + $0x9a4] ss:$16 sps:$4 sm:$0xff]  }
  0x79   :  { %5095 = vmatprep.subr.bf16.mxu1 %v7417_v19  ;;  %v7490_v16 = vld [vmem:[%s11187_s1 + $0xba4] ss:$16 sps:$4 sm:$0xff]   ;;  %v7485_v19 = vld [vmem:[%s11187_s1 + $0x9a0] ss:$16 sps:$4 sm:$0xff]  }
  0x7b   :  { %5055 = vmatpush2.bf16.msra.mxu0 %v7412_v20  ;;  %v7488_v20 = vld [vmem:[%s11187_s1 + $0xba0] ss:$16 sps:$4 sm:$0xff]  }
  0x7c   :  { %5096 = vmatpush2.bf16.msra.mxu1 %v7415_v21  ;;  %5056 = vmatprep.subr.bf16.mxu0 %v7420_v22  ;;  %v7493_v21 = vld [vmem:[%s11187_s1 + $0x984] ss:$16 sps:$4 sm:$0xff]  }
  0x7d   :  { %5097 = vmatprep.subr.bf16.mxu1 %v7423_v24  ;;  %v7496_v22 = vld [vmem:[%s11187_s1 + $0xb84] ss:$16 sps:$4 sm:$0xff]   ;;  %v7491_v24 = vld [vmem:[%s11187_s1 + $0x980] ss:$16 sps:$4 sm:$0xff]  }
  0x7f   :  { %5057 = vmatpush2.bf16.msra.mxu0 %v7418_v25  ;;  %v7494_v25 = vld [vmem:[%s11187_s1 + $0xb80] ss:$16 sps:$4 sm:$0xff]  }
  0x80   :  { %5098 = vmatpush2.bf16.msra.mxu1 %v7421_v27  ;;  %5108 = vmatprep.subr.bf16.mxu0 %v7427_v28  ;;  %v7499_v27 = vld [vmem:[%s11187_s1 + $0x964] ss:$16 sps:$4 sm:$0xff]  }
  0x81   :  { %5149 = vmatprep.subr.bf16.mxu1 %v7430_v29  ;;  %v7502_v28 = vld [vmem:[%s11187_s1 + $0xb64] ss:$16 sps:$4 sm:$0xff]   ;;  %v7497_v29 = vld [vmem:[%s11187_s1 + $0x960] ss:$16 sps:$4 sm:$0xff]  }
  0x82   :  { %5059 = vmatmul.mubr.bf16.vlgmr.msra.gmra.mxu0 %v8900_v26 }
  0x83   :  { %5100 = vmatmul.mubr.bf16.vlgmr.msra.gmra.mxu1 %v8913_v6  ;;  %5109 = vmatpush1.bf16.msra.mxu0 %v7425_v30  ;;  %v7500_v30 = vld [vmem:[%s11187_s1 + $0xb60] ss:$16 sps:$4 sm:$0xff]  }
  0x84   :  { %5150 = vmatpush1.bf16.msra.mxu1 %v7428_v31  ;;  %5110 = vmatprep.subr.bf16.mxu0 %v7433_v33  ;;  %v7505_v31 = vld [vmem:[%s11187_s1 + $0x944] ss:$16 sps:$4 sm:$0xff]  }
  0x85   :  { %5151 = vmatprep.subr.bf16.mxu1 %v7436_v34  ;;  %5140 = vmatprep.mubr.bf16.mxu0 %v8953_v41  ;;  %v7508_v33 = vld [vmem:[%s11187_s1 + $0xb44] ss:$16 sps:$4 sm:$0xff]   ;;  %v884_v34 = vcombine.high %v8924_v32, %v8924_v32 }
  0x86   :  { %5181 = vmatprep.mubr.bf16.mxu1 %v8958_v43  ;;  %v7514_v32 = vld [vmem:[%s11187_s1 + $0xb24] ss:$16 sps:$4 sm:$0xff]  }
  0x87   :  { %5111 = vmatpush1.bf16.msra.mxu0 %v7431_v37  ;;  %v7506_v37 = vld [vmem:[%s11187_s1 + $0xb40] ss:$16 sps:$4 sm:$0xff]  }
  0x88   :  { %5152 = vmatpush1.bf16.msra.mxu1 %v7434_v38  ;;  %5112 = vmatprep.subr.bf16.mxu0 %v7439_v39  ;;  %v7511_v38 = vld [vmem:[%s11187_s1 + $0x924] ss:$16 sps:$4 sm:$0xff]   ;;  %v9108_v39 = vrot.slane %v884_v34, %v8611_v49  ;;  %v7572_v34 = vld [vmem:[%s11187_s1 + $0xfe0] ss:$16 sps:$4 sm:$0xff]  }
  0x89   :  { %5153 = vmatprep.subr.bf16.mxu1 %v7442_v40  ;;  %v7509_v40 = vld [vmem:[%s11187_s1 + $0x920] ss:$16 sps:$4 sm:$0xff]  }
  0x8b   :  { %5113 = vmatpush1.bf16.msra.mxu0 %v7437_v44  ;;  %v7512_v44 = vld [vmem:[%s11187_s1 + $0xb20] ss:$16 sps:$4 sm:$0xff]  }
  0x8c   :  { %5154 = vmatpush1.bf16.msra.mxu1 %v7440_v45  ;;  %5114 = vmatprep.subr.bf16.mxu0 %v7445_v46  ;;  %v7517_v45 = vld [vmem:[%s11187_s1 + $0x904] ss:$16 sps:$4 sm:$0xff]  }
  0x8d   :  { %5155 = vmatprep.subr.bf16.mxu1 %v7448_v47  ;;  %v7520_v46 = vld [vmem:[%s11187_s1 + $0xb04] ss:$16 sps:$4 sm:$0xff]   ;;  %v900_v47 = vcombine.high %v9108_v39, %v9108_v39 }
  0x8f   :  { %5115 = vmatpush1.bf16.msra.mxu0 %v7443_v48  ;;  %v7515_v48 = vld [vmem:[%s11187_s1 + $0x900] ss:$16 sps:$4 sm:$0xff]  }
  0x90   :  { %5156 = vmatpush1.bf16.msra.mxu1 %v7446_v50  ;;  %5116 = vmatprep.subr.bf16.mxu0 %v7451_v51  ;;  %v9129_v50 = vrot.slane %v8934_v35, %v8611_v49  ;;  %v7518_v51 = vld [vmem:[%s11187_s1 + $0xb00] ss:$16 sps:$4 sm:$0xff]  }
  0x91   :  { %5157 = vmatprep.subr.bf16.mxu1 %v7454_v52  ;;  %v7523_v52 = vld [vmem:[%s11187_s1 + $0xce4] ss:$16 sps:$4 sm:$0xff]  }
  0x92   :  { %v9145_v35 = vcombine.high %v9129_v50, %v9129_v50 }
  0x93   :  { %5117 = vmatpush1.bf16.msra.mxu0 %v7449_v53  ;;  %v7526_v53 = vld [vmem:[%s11187_s1 + $0xee4] ss:$16 sps:$4 sm:$0xff]  }
  0x94   :  { %5158 = vmatpush1.bf16.msra.mxu1 %v7452_v54  ;;  %5118 = vmatprep.subr.bf16.mxu0 %v7457_v55  ;;  %v9141_v54 = vrot.slane %v900_v47, %v8611_v49  ;;  %v7521_v55 = vld [vmem:[%s11187_s1 + $0xce0] ss:$16 sps:$4 sm:$0xff]   ;;  %v7589_v47 = vld [vmem:[%s11187_s1 + $0xd84] ss:$16 sps:$4 sm:$0xff]  }
  0x95   :  { %5159 = vmatprep.subr.bf16.mxu1 %v7460_v56  ;;  %v7524_v56 = vld [vmem:[%s11187_s1 + $0xee0] ss:$16 sps:$4 sm:$0xff]  }
  0x97   :  { %5119 = vmatpush1.bf16.msra.mxu0 %v7455_v57  ;;  %v7529_v57 = vld [vmem:[%s11187_s1 + $0xcc4] ss:$16 sps:$4 sm:$0xff]  }
  0x98   :  { %5160 = vmatpush1.bf16.msra.mxu1 %v7458_v58  ;;  %5120 = vmatprep.subr.bf16.mxu0 %v7463_v59  ;;  %v7532_v58 = vld [vmem:[%s11187_s1 + $0xec4] ss:$16 sps:$4 sm:$0xff]   ;;  %v9161_v59 = vcombine.high %v9141_v54, %v9141_v54 }
  0x99   :  { %5161 = vmatprep.subr.bf16.mxu1 %v7466_v61  ;;  %v7527_v61 = vld [vmem:[%s11187_s1 + $0xcc0] ss:$16 sps:$4 sm:$0xff]  }
  0x9b   :  { %5121 = vmatpush1.bf16.msra.mxu0 %v7461_v62  ;;  %v7530_v62 = vld [vmem:[%s11187_s1 + $0xec0] ss:$16 sps:$4 sm:$0xff]  }
  0x9c   :  { %5162 = vmatpush1.bf16.msra.mxu1 %v7464_v63  ;;  %5122 = vmatprep.subr.bf16.mxu0 %v7469_v1  ;;  %v7535_v63 = vld [vmem:[%s11187_s1 + $0xca4] ss:$16 sps:$4 sm:$0xff]  }
  0x9d   :  { %5163 = vmatprep.subr.bf16.mxu1 %v7472_v2  ;;  %v7538_v1 = vld [vmem:[%s11187_s1 + $0xea4] ss:$16 sps:$4 sm:$0xff]   ;;  %v7533_v2 = vld [vmem:[%s11187_s1 + $0xca0] ss:$16 sps:$4 sm:$0xff]  }
  0x9f   :  { %5123 = vmatpush1.bf16.msra.mxu0 %v7467_v3  ;;  %v7536_v3 = vld [vmem:[%s11187_s1 + $0xea0] ss:$16 sps:$4 sm:$0xff]  }
  0xa0   :  { %5164 = vmatpush1.bf16.msra.mxu1 %v7470_v4  ;;  %5124 = vmatprep.subr.bf16.mxu0 %v7475_v5  ;;  %v7541_v4 = vld [vmem:[%s11187_s1 + $0xc84] ss:$16 sps:$4 sm:$0xff]  }
  0xa1   :  { %5165 = vmatprep.subr.bf16.mxu1 %v7478_v7  ;;  %v7544_v5 = vld [vmem:[%s11187_s1 + $0xe84] ss:$16 sps:$4 sm:$0xff]   ;;  %v7539_v7 = vld [vmem:[%s11187_s1 + $0xc80] ss:$16 sps:$4 sm:$0xff]  }
  0xa3   :  { %5125 = vmatpush2.bf16.msra.mxu0 %v7473_v8  ;;  %v7542_v8 = vld [vmem:[%s11187_s1 + $0xe80] ss:$16 sps:$4 sm:$0xff]  }
  0xa4   :  { %5166 = vmatpush2.bf16.msra.mxu1 %v7476_v9  ;;  %5126 = vmatprep.subr.bf16.mxu0 %v7481_v10  ;;  %v7547_v9 = vld [vmem:[%s11187_s1 + $0xc64] ss:$16 sps:$4 sm:$0xff]  }
  0xa5   :  { %5167 = vmatprep.subr.bf16.mxu1 %v7484_v11  ;;  %v7550_v10 = vld [vmem:[%s11187_s1 + $0xe64] ss:$16 sps:$4 sm:$0xff]   ;;  %v7545_v11 = vld [vmem:[%s11187_s1 + $0xc60] ss:$16 sps:$4 sm:$0xff]  }
  0xa7   :  { %5127 = vmatpush2.bf16.msra.mxu0 %v7479_v12  ;;  %v7548_v12 = vld [vmem:[%s11187_s1 + $0xe60] ss:$16 sps:$4 sm:$0xff]  }
  0xa8   :  { %5168 = vmatpush2.bf16.msra.mxu1 %v7482_v14  ;;  %5128 = vmatprep.subr.bf16.mxu0 %v7487_v15  ;;  %v7553_v14 = vld [vmem:[%s11187_s1 + $0xc44] ss:$16 sps:$4 sm:$0xff]  }
  0xa9   :  { %5169 = vmatprep.subr.bf16.mxu1 %v7490_v16  ;;  %v7556_v15 = vld [vmem:[%s11187_s1 + $0xe44] ss:$16 sps:$4 sm:$0xff]   ;;  %v7551_v16 = vld [vmem:[%s11187_s1 + $0xc40] ss:$16 sps:$4 sm:$0xff]  }
  0xab   :  { %5129 = vmatpush2.bf16.msra.mxu0 %v7485_v19  ;;  %v7554_v19 = vld [vmem:[%s11187_s1 + $0xe40] ss:$16 sps:$4 sm:$0xff]  }
  0xac   :  { %5170 = vmatpush2.bf16.msra.mxu1 %v7488_v20  ;;  %5130 = vmatprep.subr.bf16.mxu0 %v7493_v21  ;;  %v7559_v20 = vld [vmem:[%s11187_s1 + $0xc24] ss:$16 sps:$4 sm:$0xff]  }
  0xad   :  { %5171 = vmatprep.subr.bf16.mxu1 %v7496_v22  ;;  %v7562_v21 = vld [vmem:[%s11187_s1 + $0xe24] ss:$16 sps:$4 sm:$0xff]   ;;  %v7557_v22 = vld [vmem:[%s11187_s1 + $0xc20] ss:$16 sps:$4 sm:$0xff]  }
  0xaf   :  { %5131 = vmatpush2.bf16.msra.mxu0 %v7491_v24  ;;  %v7560_v24 = vld [vmem:[%s11187_s1 + $0xe20] ss:$16 sps:$4 sm:$0xff]  }
  0xb0   :  { %5172 = vmatpush2.bf16.msra.mxu1 %v7494_v25  ;;  %5132 = vmatprep.subr.bf16.mxu0 %v7499_v27  ;;  %v7565_v25 = vld [vmem:[%s11187_s1 + $0xc04] ss:$16 sps:$4 sm:$0xff]  }
  0xb1   :  { %5173 = vmatprep.subr.bf16.mxu1 %v7502_v28  ;;  %v7568_v27 = vld [vmem:[%s11187_s1 + $0xe04] ss:$16 sps:$4 sm:$0xff]   ;;  %v7563_v28 = vld [vmem:[%s11187_s1 + $0xc00] ss:$16 sps:$4 sm:$0xff]  }
  0xb3   :  { %5133 = vmatpush2.bf16.msra.mxu0 %v7497_v29  ;;  %v7566_v29 = vld [vmem:[%s11187_s1 + $0xe00] ss:$16 sps:$4 sm:$0xff]  }
  0xb4   :  { %5174 = vmatpush2.bf16.msra.mxu1 %v7500_v30  ;;  %5134 = vmatprep.subr.bf16.mxu0 %v7505_v31  ;;  %v7571_v30 = vld [vmem:[%s11187_s1 + $0xde4] ss:$16 sps:$4 sm:$0xff]  }
  0xb5   :  { %5175 = vmatprep.subr.bf16.mxu1 %v7508_v33  ;;  %v7574_v31 = vld [vmem:[%s11187_s1 + $0xfe4] ss:$16 sps:$4 sm:$0xff]   ;;  %v7569_v33 = vld [vmem:[%s11187_s1 + $0xde0] ss:$16 sps:$4 sm:$0xff]  }
  0xb7   :  { %5135 = vmatpush2.bf16.msra.mxu0 %v7503_v36  ;;  %v7577_v36 = vld [vmem:[%s11187_s1 + $0xdc4] ss:$16 sps:$4 sm:$0xff]  }
  0xb8   :  { %5176 = vmatpush2.bf16.msra.mxu1 %v7506_v37  ;;  %5136 = vmatprep.subr.bf16.mxu0 %v7511_v38  ;;  %v7580_v37 = vld [vmem:[%s11187_s1 + $0xfc4] ss:$16 sps:$4 sm:$0xff]   ;;  %v7575_v38 = vld [vmem:[%s11187_s1 + $0xdc0] ss:$16 sps:$4 sm:$0xff]  }
  0xb9   :  { %5177 = vmatprep.subr.bf16.mxu1 %v7514_v32  ;;  %v7578_v32 = vld [vmem:[%s11187_s1 + $0xfc0] ss:$16 sps:$4 sm:$0xff]  }
  0xbb   :  { %5137 = vmatpush2.bf16.msra.mxu0 %v7509_v40  ;;  %v7583_v40 = vld [vmem:[%s11187_s1 + $0xda4] ss:$16 sps:$4 sm:$0xff]  }
  0xbc   :  { %5178 = vmatpush2.bf16.msra.mxu1 %v7512_v44  ;;  %5138 = vmatprep.subr.bf16.mxu0 %v7517_v45  ;;  %v7586_v44 = vld [vmem:[%s11187_s1 + $0xfa4] ss:$16 sps:$4 sm:$0xff]   ;;  %v7581_v45 = vld [vmem:[%s11187_s1 + $0xda0] ss:$16 sps:$4 sm:$0xff]  }
  0xbd   :  { %5179 = vmatprep.subr.bf16.mxu1 %v7520_v46  ;;  %v7584_v46 = vld [vmem:[%s11187_s1 + $0xfa0] ss:$16 sps:$4 sm:$0xff]  }
  0xbf   :  { %5139 = vmatpush2.bf16.msra.mxu0 %v7515_v48  ;;  %v7592_v48 = vld [vmem:[%s11187_s1 + $0xf84] ss:$16 sps:$4 sm:$0xff]  }
  0xc0   :  { %5180 = vmatpush2.bf16.msra.mxu1 %v7518_v51  ;;  %5190 = vmatprep.subr.bf16.mxu0 %v7523_v52  ;;  %v7587_v51 = vld [vmem:[%s11187_s1 + $0xd80] ss:$16 sps:$4 sm:$0xff]  }
  0xc1   :  { %5231 = vmatprep.subr.bf16.mxu1 %v7526_v53  ;;  %v7590_v52 = vld [vmem:[%s11187_s1 + $0xf80] ss:$16 sps:$4 sm:$0xff]   ;;  %v7595_v53 = vld [vmem:[%s11187_s1 + $0xd64] ss:$16 sps:$4 sm:$0xff]  }
  0xc2   :  { %5141 = vmatmul.mubr.bf16.vlgmr.msra.gmra.mxu0 %v9129_v50 }
  0xc3   :  { %5182 = vmatmul.mubr.bf16.vlgmr.msra.gmra.mxu1 %v9145_v35  ;;  %5191 = vmatpush1.bf16.msra.mxu0 %v7521_v55  ;;  %v7598_v55 = vld [vmem:[%s11187_s1 + $0xf64] ss:$16 sps:$4 sm:$0xff]  }
  0xc4   :  { %5232 = vmatpush1.bf16.msra.mxu1 %v7524_v56  ;;  %5192 = vmatprep.subr.bf16.mxu0 %v7529_v57  ;;  %v7593_v56 = vld [vmem:[%s11187_s1 + $0xd60] ss:$16 sps:$4 sm:$0xff]  }
  0xc5   :  { %5233 = vmatprep.subr.bf16.mxu1 %v7532_v58  ;;  %5222 = vmatprep.mubr.bf16.mxu0 %v9141_v54  ;;  %v7596_v57 = vld [vmem:[%s11187_s1 + $0xf60] ss:$16 sps:$4 sm:$0xff]   ;;  %v7601_v58 = vld [vmem:[%s11187_s1 + $0xd44] ss:$16 sps:$4 sm:$0xff]  }
  0xc6   :  { %5263 = vmatprep.mubr.bf16.mxu1 %v9161_v59 }
  0xc7   :  { %5193 = vmatpush1.bf16.msra.mxu0 %v7527_v61  ;;  %v7604_v61 = vld [vmem:[%s11187_s1 + $0xf44] ss:$16 sps:$4 sm:$0xff]  }
  0xc8   :  { %5234 = vmatpush1.bf16.msra.mxu1 %v7530_v62  ;;  %5194 = vmatprep.subr.bf16.mxu0 %v7535_v63  ;;  %v7599_v62 = vld [vmem:[%s11187_s1 + $0xd40] ss:$16 sps:$4 sm:$0xff]  }
  0xc9   :  { %5235 = vmatprep.subr.bf16.mxu1 %v7538_v1  ;;  %v7602_v63 = vld [vmem:[%s11187_s1 + $0xf40] ss:$16 sps:$4 sm:$0xff]  }
  0xca   :  { %v9320_v1 = vld [vmem:[%s11188_s0 + $0x10] sm:$0xff] }
  0xcb   :  { %5195 = vmatpush1.bf16.msra.mxu0 %v7533_v2  ;;  %v7607_v2 = vld [vmem:[%s11187_s1 + $0xd24] ss:$16 sps:$4 sm:$0xff]  }
  0xcc   :  { %5236 = vmatpush1.bf16.msra.mxu1 %v7536_v3  ;;  %5196 = vmatprep.subr.bf16.mxu0 %v7541_v4  ;;  %v7610_v3 = vld [vmem:[%s11187_s1 + $0xf24] ss:$16 sps:$4 sm:$0xff]   ;;  %v9330_v4 = vrot.slane %v9320_v1, %v8611_v49 }
  0xcd   :  { %5237 = vmatprep.subr.bf16.mxu1 %v7544_v5  ;;  %v7605_v5 = vld [vmem:[%s11187_s1 + $0xd20] ss:$16 sps:$4 sm:$0xff]  }
  0xcf   :  { %5197 = vmatpush1.bf16.msra.mxu0 %v7539_v7  ;;  %v7608_v7 = vld [vmem:[%s11187_s1 + $0xf20] ss:$16 sps:$4 sm:$0xff]  }
  0xd0   :  { %5238 = vmatpush1.bf16.msra.mxu1 %v7542_v8  ;;  %5198 = vmatprep.subr.bf16.mxu0 %v7547_v9  ;;  %v7613_v8 = vld [vmem:[%s11187_s1 + $0xd04] ss:$16 sps:$4 sm:$0xff]  }
  0xd1   :  { %5239 = vmatprep.subr.bf16.mxu1 %v7550_v10  ;;  %v7616_v9 = vld [vmem:[%s11187_s1 + $0xf04] ss:$16 sps:$4 sm:$0xff]   ;;  %v7611_v10 = vld [vmem:[%s11187_s1 + $0xd00] ss:$16 sps:$4 sm:$0xff]  }
  0xd3   :  { %5199 = vmatpush1.bf16.msra.mxu0 %v7545_v11  ;;  %v948_v11 = vcombine.high %v9330_v4, %v9330_v4 }
  0xd4   :  { %5240 = vmatpush1.bf16.msra.mxu1 %v7548_v12  ;;  %5200 = vmatprep.subr.bf16.mxu0 %v7553_v14  ;;  %v7614_v12 = vld [vmem:[%s11187_s1 + $0xf00] ss:$16 sps:$4 sm:$0xff]  }
  0xd5   :  { %5241 = vmatprep.subr.bf16.mxu1 %v7556_v15  ;;  %v809_v14 = vld [vmem:[%s11189_s2] sm:$0xf]  ;;  %v9357_v15 = vrot.slane %v9108_v39, %v8611_v49 }
  0xd7   :  { %5201 = vmatpush1.bf16.msra.mxu0 %v7551_v16  ;;  %v813_v16 = vsub.s32 0, %v8593_v42  ;;  %v9372_v39 = vcombine.high %v9357_v15, %v9357_v15 }
  0xd8   :  { %5242 = vmatpush1.bf16.msra.mxu1 %v7554_v19  ;;  %5202 = vmatprep.subr.bf16.mxu0 %v7559_v20  ;;  %v7620_v19 = vld [vmem:[%s11187_s1 + $0x10e4] ss:$16 sps:$4 sm:$0xff]  }
  0xd9   :  { %5243 = vmatprep.subr.bf16.mxu1 %v7562_v21  ;;  %v7623_v20 = vld [vmem:[%s11187_s1 + $0x12e4] ss:$16 sps:$4 sm:$0xff]   ;;  %v817_v21 = vsub.s32 1, %v8593_v42 }
  0xdb   :  { %5203 = vmatpush1.bf16.msra.mxu0 %v7557_v22  ;;  %v9368_v22 = vrot.slane %v948_v11, %v8611_v49  ;;  %v7651_v11 = vld [vmem:[%s11187_s1 + $0x1240] ss:$16 sps:$4 sm:$0xff]  }
  0xdc   :  { %5244 = vmatpush1.bf16.msra.mxu1 %v7560_v24  ;;  %5204 = vmatprep.subr.bf16.mxu0 %v7565_v25  ;;  %v7618_v24 = vld [vmem:[%s11187_s1 + $0x10e0] ss:$16 sps:$4 sm:$0xff]  }
  0xdd   :  { %5245 = vmatprep.subr.bf16.mxu1 %v7568_v27  ;;  %v7621_v25 = vld [vmem:[%s11187_s1 + $0x12e0] ss:$16 sps:$4 sm:$0xff]   ;;  %v814_v27 = vrot.slane %v809_v14, %v813_v16 }
  0xde   :  { %v7654_v16 = vld [vmem:[%s11187_s1 + $0x1020] ss:$16 sps:$4 sm:$0xff]  }
  0xdf   :  { %5205 = vmatpush1.bf16.msra.mxu0 %v7563_v28  ;;  %v7626_v28 = vld [vmem:[%s11187_s1 + $0x10c4] ss:$16 sps:$4 sm:$0xff]  }
  0xe0   :  { %5246 = vmatpush1.bf16.msra.mxu1 %v7566_v29  ;;  %5206 = vmatprep.subr.bf16.mxu0 %v7571_v30  ;;  %v7629_v29 = vld [vmem:[%s11187_s1 + $0x12c4] ss:$16 sps:$4 sm:$0xff]   ;;  %v818_v30 = vrot.slane %v809_v14, %v817_v21 }
  0xe1   :  { %5247 = vmatprep.subr.bf16.mxu1 %v7574_v31  ;;  %v9388_v31 = vcombine.high %v9368_v22, %v9368_v22  ;;  %v7659_v14 = vld [vmem:[%s11187_s1 + $0x1224] ss:$16 sps:$4 sm:$0xff]  }
  0xe2   :  { %v7665_v21 = vld [vmem:[%s11187_s1 + $0x1204] ss:$16 sps:$4 sm:$0xff]  }
  0xe3   :  { %5207 = vmatpush2.bf16.msra.mxu0 %v7569_v33 }
  0xe4   :  { %5248 = vmatpush2.bf16.msra.mxu1 %v7572_v34  ;;  %5208 = vmatprep.subr.bf16.mxu0 %v7577_v36  ;;  %v7624_v36 = vld [vmem:[%s11187_s1 + $0x10c0] ss:$16 sps:$4 sm:$0xff]  }
  0xe5   :  { %5249 = vmatprep.subr.bf16.mxu1 %v7580_v37  ;;  %v7627_v37 = vld [vmem:[%s11187_s1 + $0x12c0] ss:$16 sps:$4 sm:$0xff]  }
  0xe7   :  { %5209 = vmatpush2.bf16.msra.mxu0 %v7575_v38 }
  0xe8   :  { %5250 = vmatpush2.bf16.msra.mxu1 %v7578_v32  ;;  %5210 = vmatprep.subr.bf16.mxu0 %v7583_v40 }
  0xe9   :  { %5251 = vmatprep.subr.bf16.mxu1 %v7586_v44  ;;  %v7632_v44 = vld [vmem:[%s11187_s1 + $0x10a4] ss:$16 sps:$4 sm:$0xff]  }
  0xeb   :  { %5211 = vmatpush2.bf16.msra.mxu0 %v7581_v45  ;;  %v7635_v45 = vld [vmem:[%s11187_s1 + $0x12a4] ss:$16 sps:$4 sm:$0xff]  }
  0xec   :  { %5252 = vmatpush2.bf16.msra.mxu1 %v7584_v46  ;;  %5212 = vmatprep.subr.bf16.mxu0 %v7589_v47 }
  0xed   :  { %5253 = vmatprep.subr.bf16.mxu1 %v7592_v48  ;;  %v7630_v48 = vld [vmem:[%s11187_s1 + $0x10a0] ss:$16 sps:$4 sm:$0xff]  }
  0xef   :  { %5213 = vmatpush2.bf16.msra.mxu0 %v7587_v51  ;;  %v7633_v51 = vld [vmem:[%s11187_s1 + $0x12a0] ss:$16 sps:$4 sm:$0xff]  }
  0xf0   :  { %5254 = vmatpush2.bf16.msra.mxu1 %v7590_v52  ;;  %5214 = vmatprep.subr.bf16.mxu0 %v7595_v53 }
  0xf1   :  { %5255 = vmatprep.subr.bf16.mxu1 %v7598_v55 }
  0xf3   :  { %5215 = vmatpush2.bf16.msra.mxu0 %v7593_v56 }
  0xf4   :  { %5256 = vmatpush2.bf16.msra.mxu1 %v7596_v57  ;;  %5216 = vmatprep.subr.bf16.mxu0 %v7601_v58  ;;  %v7638_v58 = vld [vmem:[%s11187_s1 + $0x1084] ss:$16 sps:$4 sm:$0xff]  }
  0xf5   :  { %5257 = vmatprep.subr.bf16.mxu1 %v7604_v61  ;;  %v7641_v61 = vld [vmem:[%s11187_s1 + $0x1284] ss:$16 sps:$4 sm:$0xff]  }
  0xf7   :  { %5217 = vmatpush2.bf16.msra.mxu0 %v7599_v62  ;;  %v7636_v62 = vld [vmem:[%s11187_s1 + $0x1080] ss:$16 sps:$4 sm:$0xff]  }
  0xf8   :  { %5258 = vmatpush2.bf16.msra.mxu1 %v7602_v63  ;;  %5218 = vmatprep.subr.bf16.mxu0 %v7607_v2  ;;  %v7639_v63 = vld [vmem:[%s11187_s1 + $0x1280] ss:$16 sps:$4 sm:$0xff]   ;;  %v7644_v2 = vld [vmem:[%s11187_s1 + $0x1064] ss:$16 sps:$4 sm:$0xff]  }
  0xf9   :  { %5259 = vmatprep.subr.bf16.mxu1 %v7610_v3  ;;  %v7647_v3 = vld [vmem:[%s11187_s1 + $0x1264] ss:$16 sps:$4 sm:$0xff]  }
  0xfb   :  { %5219 = vmatpush2.bf16.msra.mxu0 %v7605_v5  ;;  %v7642_v5 = vld [vmem:[%s11187_s1 + $0x1060] ss:$16 sps:$4 sm:$0xff]  }
  0xfc   :  { %5260 = vmatpush2.bf16.msra.mxu1 %v7608_v7  ;;  %5220 = vmatprep.subr.bf16.mxu0 %v7613_v8  ;;  %v7645_v7 = vld [vmem:[%s11187_s1 + $0x1260] ss:$16 sps:$4 sm:$0xff]   ;;  %v7650_v8 = vld [vmem:[%s11187_s1 + $0x1044] ss:$16 sps:$4 sm:$0xff]  }
  0xfd   :  { %5261 = vmatprep.subr.bf16.mxu1 %v7616_v9  ;;  %v7653_v9 = vld [vmem:[%s11187_s1 + $0x1244] ss:$16 sps:$4 sm:$0xff]  }
  0xff   :  { %5221 = vmatpush2.bf16.msra.mxu0 %v7611_v10  ;;  %v7648_v10 = vld [vmem:[%s11187_s1 + $0x1040] ss:$16 sps:$4 sm:$0xff]  }
 0x100   :  { %5262 = vmatpush2.bf16.msra.mxu1 %v7614_v12  ;;  %5272 = vmatprep.subr.bf16.mxu0 %v7620_v19  ;;  %v7656_v12 = vld [vmem:[%s11187_s1 + $0x1024] ss:$16 sps:$4 sm:$0xff]   ;;  %v7657_v19 = vld [vmem:[%s11187_s1 + $0x1220] ss:$16 sps:$4 sm:$0xff]  }
 0x101   :  { %5313 = vmatprep.subr.bf16.mxu1 %v7623_v20  ;;  %v7662_v20 = vld [vmem:[%s11187_s1 + $0x1004] ss:$16 sps:$4 sm:$0xff]  }
 0x102   :  { %v4978_v33 = vpop.f32.mrf.mxu0  ;;  %5223 = vmatmul.mubr.bf16.vlgmr.msra.gmra.mxu0 %v9357_v15 }
 0x103   :  { %v5019_v34 = vpop.f32.mrf.mxu1  ;;  %5264 = vmatmul.mubr.bf16.vlgmr.msra.gmra.mxu1 %v9372_v39  ;;  %v4979_v38 = vadd.f32 %v4978_v33, %v814_v27  ;;  %5273 = vmatpush1.bf16.msra.mxu0 %v7618_v24  ;;  %v7660_v24 = vld [vmem:[%s11187_s1 + $0x1000] ss:$16 sps:$4 sm:$0xff]   ;;  %v7668_v27 = vld [vmem:[%s11187_s1 + $0x11e4] ss:$16 sps:$4 sm:$0xff]  }
 0x104   :  { %5314 = vmatpush1.bf16.msra.mxu1 %v7621_v25  ;;  %v4980_v32 = vpop.f32.mrf.mxu0  ;;  %5274 = vmatprep.subr.bf16.mxu0 %v7626_v28  ;;  %v7663_v25 = vld [vmem:[%s11187_s1 + $0x1200] ss:$16 sps:$4 sm:$0xff]   ;;  %v7671_v28 = vld [vmem:[%s11187_s1 + $0x13e4] ss:$16 sps:$4 sm:$0xff]  }
 0x105   :  { %v5021_v40 = vpop.f32.mrf.mxu1  ;;  %5315 = vmatprep.subr.bf16.mxu1 %v7629_v29  ;;  %v9404_v46 = vadd.f32 %v5019_v34, %v4979_v38  ;;  %v4981_v47 = vadd.f32 %v4980_v32, %v818_v30  ;;  %5304 = vmatprep.mubr.bf16.mxu0 %v9368_v22  ;;  %v7666_v29 = vld [vmem:[%s11187_s1 + $0x11e0] ss:$16 sps:$4 sm:$0xff]   ;;  %v7674_v33 = vld [vmem:[%s11187_s1 + $0x11c4] ss:$16 sps:$4 sm:$0xff]  }
 0x106   :  { %5345 = vmatprep.mubr.bf16.mxu1 %v9388_v31  ;;  %v4982_v52 = vpop.f32.mrf.mxu0  ;;  %v7669_v30 = vld [vmem:[%s11187_s1 + $0x13e0] ss:$16 sps:$4 sm:$0xff]   ;;  %v7677_v34 = vld [vmem:[%s11187_s1 + $0x13c4] ss:$16 sps:$4 sm:$0xff]  }
 0x107   :  { %v5023_v53 = vpop.f32.mrf.mxu1  ;;  %v9414_v55 = vadd.f32 %v5021_v40, %v4981_v47  ;;  %5275 = vmatpush1.bf16.msra.mxu0 %v7624_v36  ;;  %v7672_v36 = vld [vmem:[%s11187_s1 + $0x11c0] ss:$16 sps:$4 sm:$0xff]   ;;  %v7680_v38 = vld [vmem:[%s11187_s1 + $0x11a4] ss:$16 sps:$4 sm:$0xff]  }
 0x108   :  { %5316 = vmatpush1.bf16.msra.mxu1 %v7627_v37  ;;  %v4983_v56 = vpop.f32.mrf.mxu0  ;;  %5276 = vmatprep.subr.bf16.mxu0 %v7632_v44  ;;  %v7675_v37 = vld [vmem:[%s11187_s1 + $0x13c0] ss:$16 sps:$4 sm:$0xff]   ;;  %v7683_v32 = vld [vmem:[%s11187_s1 + $0x13a4] ss:$16 sps:$4 sm:$0xff]  }
 0x109   :  { %v5024_v57 = vpop.f32.mrf.mxu1  ;;  %5317 = vmatprep.subr.bf16.mxu1 %v7635_v45  ;;  %v7678_v40 = vld [vmem:[%s11187_s1 + $0x11a0] ss:$16 sps:$4 sm:$0xff]   ;;  %v7686_v45 = vld [vmem:[%s11187_s1 + $0x1184] ss:$16 sps:$4 sm:$0xff]  }
 0x10a   :  { %v7681_v44 = vld [vmem:[%s11187_s1 + $0x13a0] ss:$16 sps:$4 sm:$0xff]   ;;  %v7689_v47 = vld [vmem:[%s11187_s1 + $0x1384] ss:$16 sps:$4 sm:$0xff]  }
 0x10b   :  { %5277 = vmatpush1.bf16.msra.mxu0 %v7630_v48  ;;  %v7684_v48 = vld [vmem:[%s11187_s1 + $0x1180] ss:$16 sps:$4 sm:$0xff]   ;;  %v7692_v52 = vld [vmem:[%s11187_s1 + $0x1164] ss:$16 sps:$4 sm:$0xff]  }
 0x10c   :  { %5318 = vmatpush1.bf16.msra.mxu1 %v7633_v51  ;;  %5278 = vmatprep.subr.bf16.mxu0 %v7638_v58  ;;  %v7687_v51 = vld [vmem:[%s11187_s1 + $0x1380] ss:$16 sps:$4 sm:$0xff]   ;;  %v7695_v53 = vld [vmem:[%s11187_s1 + $0x1364] ss:$16 sps:$4 sm:$0xff]  }
 0x10d   :  { %5319 = vmatprep.subr.bf16.mxu1 %v7641_v61  ;;  %v7690_v56 = vld [vmem:[%s11187_s1 + $0x1160] ss:$16 sps:$4 sm:$0xff]   ;;  %v7698_v58 = vld [vmem:[%s11187_s1 + $0x1144] ss:$16 sps:$4 sm:$0xff]  }
 0x10e   :  { %v7693_v57 = vld [vmem:[%s11187_s1 + $0x1360] ss:$16 sps:$4 sm:$0xff]   ;;  %v7701_v61 = vld [vmem:[%s11187_s1 + $0x1344] ss:$16 sps:$4 sm:$0xff]  }
 0x10f   :  { %5279 = vmatpush1.bf16.msra.mxu0 %v7636_v62  ;;  %v933_v62 = vcombine.high %v9320_v1, %v9320_v1  ;;  %v7707_v1 = vld [vmem:[%s11187_s1 + $0x1324] ss:$16 sps:$4 sm:$0xff]  }
 0x110   :  { %5320 = vmatpush1.bf16.msra.mxu1 %v7639_v63  ;;  %5280 = vmatprep.subr.bf16.mxu0 %v7644_v2  ;;  %v7696_v63 = vld [vmem:[%s11187_s1 + $0x1140] ss:$16 sps:$4 sm:$0xff]  }
 0x111   :  { %5321 = vmatprep.subr.bf16.mxu1 %v7647_v3  ;;  %v7699_v2 = vld [vmem:[%s11187_s1 + $0x1340] ss:$16 sps:$4 sm:$0xff]   ;;  %v7704_v3 = vld [vmem:[%s11187_s1 + $0x1124] ss:$16 sps:$4 sm:$0xff]  }
 0x113   :  { %5281 = vmatpush1.bf16.msra.mxu0 %v7642_v5  ;;  %v9557_v5 = vrot.slane %v933_v62, %v8611_v49  ;;  %v7735_v62 = vld [vmem:[%s11187_s1 + $0x1680] ss:$16 sps:$4 sm:$0xff]  }
 0x114   :  { %5322 = vmatpush1.bf16.msra.mxu1 %v7645_v7  ;;  %5282 = vmatprep.subr.bf16.mxu0 %v7650_v8  ;;  %v7702_v7 = vld [vmem:[%s11187_s1 + $0x1120] ss:$16 sps:$4 sm:$0xff]  }
 0x115   :  { %5323 = vmatprep.subr.bf16.mxu1 %v7653_v9  ;;  %v7705_v8 = vld [vmem:[%s11187_s1 + $0x1320] ss:$16 sps:$4 sm:$0xff]   ;;  %v7710_v9 = vld [vmem:[%s11187_s1 + $0x1104] ss:$16 sps:$4 sm:$0xff]  }
 0x117   :  { %5283 = vmatpush1.bf16.msra.mxu0 %v7648_v10  ;;  %v7713_v10 = vld [vmem:[%s11187_s1 + $0x1304] ss:$16 sps:$4 sm:$0xff]  }
 0x118   :  { %5324 = vmatpush1.bf16.msra.mxu1 %v7651_v11  ;;  %5284 = vmatprep.subr.bf16.mxu0 %v7656_v12  ;;  %v949_v11 = vcombine.high %v9557_v5, %v9557_v5  ;;  %v9575_v12 = vrot.slane %v9330_v4, %v8611_v49  ;;  %v7719_v4 = vld [vmem:[%s11187_s1 + $0x16e4] ss:$16 sps:$4 sm:$0xff]  }
 0x119   :  { %5325 = vmatprep.subr.bf16.mxu1 %v7659_v14  ;;  %v7708_v14 = vld [vmem:[%s11187_s1 + $0x1100] ss:$16 sps:$4 sm:$0xff]  }
 0x11b   :  { %5285 = vmatpush1.bf16.msra.mxu0 %v7654_v16  ;;  %v7711_v16 = vld [vmem:[%s11187_s1 + $0x1300] ss:$16 sps:$4 sm:$0xff]  }
 0x11c   :  { %5326 = vmatpush1.bf16.msra.mxu1 %v7657_v19  ;;  %5286 = vmatprep.subr.bf16.mxu0 %v7662_v20  ;;  %v7716_v19 = vld [vmem:[%s11187_s1 + $0x14e4] ss:$16 sps:$4 sm:$0xff]   ;;  %v7714_v20 = vld [vmem:[%s11187_s1 + $0x14e0] ss:$16 sps:$4 sm:$0xff]  }
 0x11d   :  { %5327 = vmatprep.subr.bf16.mxu1 %v7665_v21  ;;  %v7717_v21 = vld [vmem:[%s11187_s1 + $0x16e0] ss:$16 sps:$4 sm:$0xff]  }
 0x11f   :  { %5287 = vmatpush1.bf16.msra.mxu0 %v7660_v24  ;;  %v9596_v24 = vrot.slane %v949_v11, %v8611_v49  ;;  %v7752_v11 = vld [vmem:[%s11187_s1 + $0x1424] ss:$16 sps:$4 sm:$0xff]  }
 0x120   :  { %5328 = vmatpush1.bf16.msra.mxu1 %v7663_v25  ;;  %5288 = vmatprep.subr.bf16.mxu0 %v7668_v27  ;;  %v9600_v25 = vcombine.high %v9575_v12, %v9575_v12  ;;  %v7722_v27 = vld [vmem:[%s11187_s1 + $0x14c4] ss:$16 sps:$4 sm:$0xff]  }
 0x121   :  { %5329 = vmatprep.subr.bf16.mxu1 %v7671_v28  ;;  %v7725_v28 = vld [vmem:[%s11187_s1 + $0x16c4] ss:$16 sps:$4 sm:$0xff]  }
 0x123   :  { %5289 = vmatpush2.bf16.msra.mxu0 %v7666_v29  ;;  %v7720_v29 = vld [vmem:[%s11187_s1 + $0x14c0] ss:$16 sps:$4 sm:$0xff]  }
 0x124   :  { %5330 = vmatpush2.bf16.msra.mxu1 %v7669_v30  ;;  %5290 = vmatprep.subr.bf16.mxu0 %v7674_v33  ;;  %v7723_v30 = vld [vmem:[%s11187_s1 + $0x16c0] ss:$16 sps:$4 sm:$0xff]   ;;  %v9616_v33 = vcombine.high %v9596_v24, %v9596_v24 }
 0x125   :  { %5331 = vmatprep.subr.bf16.mxu1 %v7677_v34 }
 0x127   :  { %5291 = vmatpush2.bf16.msra.mxu0 %v7672_v36 }
 0x128   :  { %5332 = vmatpush2.bf16.msra.mxu1 %v7675_v37  ;;  %5292 = vmatprep.subr.bf16.mxu0 %v7680_v38 }
 0x129   :  { %5333 = vmatprep.subr.bf16.mxu1 %v7683_v32 }
 0x12b   :  { %5293 = vmatpush2.bf16.msra.mxu0 %v7678_v40  ;;  %v7728_v40 = vld [vmem:[%s11187_s1 + $0x14a4] ss:$16 sps:$4 sm:$0xff]  }
 0x12c   :  { %5334 = vmatpush2.bf16.msra.mxu1 %v7681_v44  ;;  %5294 = vmatprep.subr.bf16.mxu0 %v7686_v45  ;;  %v7731_v44 = vld [vmem:[%s11187_s1 + $0x16a4] ss:$16 sps:$4 sm:$0xff]  }
 0x12d   :  { %5335 = vmatprep.subr.bf16.mxu1 %v7689_v47 }
 0x12f   :  { %5295 = vmatpush2.bf16.msra.mxu0 %v7684_v48  ;;  %v7729_v48 = vld [vmem:[%s11187_s1 + $0x16a0] ss:$16 sps:$4 sm:$0xff]  }
 0x130   :  { %5336 = vmatpush2.bf16.msra.mxu1 %v7687_v51  ;;  %5296 = vmatprep.subr.bf16.mxu0 %v7692_v52 }
 0x131   :  { %5337 = vmatprep.subr.bf16.mxu1 %v7695_v53 }
 0x133   :  { %5297 = vmatpush2.bf16.msra.mxu0 %v7690_v56 }
 0x134   :  { %5338 = vmatpush2.bf16.msra.mxu1 %v7693_v57  ;;  %5298 = vmatprep.subr.bf16.mxu0 %v7698_v58  ;;  %v7734_v57 = vld [vmem:[%s11187_s1 + $0x1484] ss:$16 sps:$4 sm:$0xff]  }
 0x135   :  { %5339 = vmatprep.subr.bf16.mxu1 %v7701_v61  ;;  %v7737_v58 = vld [vmem:[%s11187_s1 + $0x1684] ss:$16 sps:$4 sm:$0xff]   ;;  %v7732_v61 = vld [vmem:[%s11187_s1 + $0x1480] ss:$16 sps:$4 sm:$0xff]  }
 0x137   :  { %5299 = vmatpush2.bf16.msra.mxu0 %v7696_v63  ;;  %v7740_v63 = vld [vmem:[%s11187_s1 + $0x1464] ss:$16 sps:$4 sm:$0xff]  }
 0x138   :  { %5340 = vmatpush2.bf16.msra.mxu1 %v7699_v2  ;;  %5300 = vmatprep.subr.bf16.mxu0 %v7704_v3  ;;  %v7743_v2 = vld [vmem:[%s11187_s1 + $0x1664] ss:$16 sps:$4 sm:$0xff]   ;;  %v7738_v3 = vld [vmem:[%s11187_s1 + $0x1460] ss:$16 sps:$4 sm:$0xff]  }
 0x139   :  { %5341 = vmatprep.subr.bf16.mxu1 %v7707_v1  ;;  %v7741_v1 = vld [vmem:[%s11187_s1 + $0x1660] ss:$16 sps:$4 sm:$0xff]  }
 0x13b   :  { %5301 = vmatpush2.bf16.msra.mxu0 %v7702_v7  ;;  %v7746_v7 = vld [vmem:[%s11187_s1 + $0x1444] ss:$16 sps:$4 sm:$0xff]  }
 0x13c   :  { %5342 = vmatpush2.bf16.msra.mxu1 %v7705_v8  ;;  %5302 = vmatprep.subr.bf16.mxu0 %v7710_v9  ;;  %v7749_v8 = vld [vmem:[%s11187_s1 + $0x1644] ss:$16 sps:$4 sm:$0xff]   ;;  %v7744_v9 = vld [vmem:[%s11187_s1 + $0x1440] ss:$16 sps:$4 sm:$0xff]  }
 0x13d   :  { %5343 = vmatprep.subr.bf16.mxu1 %v7713_v10  ;;  %v7747_v10 = vld [vmem:[%s11187_s1 + $0x1640] ss:$16 sps:$4 sm:$0xff]  }
 0x13f   :  { %5303 = vmatpush2.bf16.msra.mxu0 %v7708_v14  ;;  %v7755_v14 = vld [vmem:[%s11187_s1 + $0x1624] ss:$16 sps:$4 sm:$0xff]  }
 0x140   :  { %5344 = vmatpush2.bf16.msra.mxu1 %v7711_v16  ;;  %5354 = vmatprep.subr.bf16.mxu0 %v7716_v19  ;;  %v7750_v16 = vld [vmem:[%s11187_s1 + $0x1420] ss:$16 sps:$4 sm:$0xff]  }
 0x141   :  { %5395 = vmatprep.subr.bf16.mxu1 %v7719_v4  ;;  %v7753_v19 = vld [vmem:[%s11187_s1 + $0x1620] ss:$16 sps:$4 sm:$0xff]   ;;  %v7758_v4 = vld [vmem:[%s11187_s1 + $0x1404] ss:$16 sps:$4 sm:$0xff]  }
 0x142   :  { %v5060_v34 = vpop.f32.mrf.mxu0  ;;  %5305 = vmatmul.mubr.bf16.vlgmr.msra.gmra.mxu0 %v9575_v12 }
 0x143   :  { %v5101_v36 = vpop.f32.mrf.mxu1  ;;  %5346 = vmatmul.mubr.bf16.vlgmr.msra.gmra.mxu1 %v9600_v25  ;;  %v5061_v37 = vadd.f32 %v5060_v34, %v9404_v46  ;;  %5355 = vmatpush1.bf16.msra.mxu0 %v7714_v20  ;;  %v7726_v46 = vld [vmem:[%s11187_s1 + $0x14a0] ss:$16 sps:$4 sm:$0xff]   ;;  %v7761_v20 = vld [vmem:[%s11187_s1 + $0x1604] ss:$16 sps:$4 sm:$0xff]  }
 0x144   :  { %5396 = vmatpush1.bf16.msra.mxu1 %v7717_v21  ;;  %v5062_v38 = vpop.f32.mrf.mxu0  ;;  %5356 = vmatprep.subr.bf16.mxu0 %v7722_v27  ;;  %v7756_v21 = vld [vmem:[%s11187_s1 + $0x1400] ss:$16 sps:$4 sm:$0xff]  }
 0x145   :  { %v5103_v32 = vpop.f32.mrf.mxu1  ;;  %5397 = vmatprep.subr.bf16.mxu1 %v7725_v28  ;;  %v9627_v45 = vadd.f32 %v5101_v36, %v5061_v37  ;;  %v5063_v47 = vadd.f32 %v5062_v38, %v9414_v55  ;;  %5386 = vmatprep.mubr.bf16.mxu0 %v9596_v24  ;;  %v7759_v27 = vld [vmem:[%s11187_s1 + $0x1600] ss:$16 sps:$4 sm:$0xff]   ;;  %v7764_v28 = vld [vmem:[%s11187_s1 + $0x15e4] ss:$16 sps:$4 sm:$0xff]  }
 0x146   :  { %5427 = vmatprep.mubr.bf16.mxu1 %v9616_v33  ;;  %v5064_v51 = vpop.f32.mrf.mxu0  ;;  %v7765_v34 = vld [vmem:[%s11187_s1 + $0x17e0] ss:$16 sps:$4 sm:$0xff]   ;;  %v7770_v36 = vld [vmem:[%s11187_s1 + $0x15c4] ss:$16 sps:$4 sm:$0xff]  }
 0x147   :  { %v5105_v52 = vpop.f32.mrf.mxu1  ;;  %v9638_v53 = vadd.f32 %v5103_v32, %v5063_v47  ;;  %5357 = vmatpush1.bf16.msra.mxu0 %v7720_v29  ;;  %v7767_v29 = vld [vmem:[%s11187_s1 + $0x17e4] ss:$16 sps:$4 sm:$0xff]   ;;  %v7768_v38 = vld [vmem:[%s11187_s1 + $0x15c0] ss:$16 sps:$4 sm:$0xff]  }
 0x148   :  { %5398 = vmatpush1.bf16.msra.mxu1 %v7723_v30  ;;  %v5065_v56 = vpop.f32.mrf.mxu0  ;;  %5358 = vmatprep.subr.bf16.mxu0 %v7728_v40  ;;  %v7762_v30 = vld [vmem:[%s11187_s1 + $0x15e0] ss:$16 sps:$4 sm:$0xff]   ;;  %v7773_v37 = vld [vmem:[%s11187_s1 + $0x17c4] ss:$16 sps:$4 sm:$0xff]  }
 0x149   :  { %v5106_v55 = vpop.f32.mrf.mxu1  ;;  %5399 = vmatprep.subr.bf16.mxu1 %v7731_v44  ;;  %v7771_v32 = vld [vmem:[%s11187_s1 + $0x17c0] ss:$16 sps:$4 sm:$0xff]   ;;  %v7776_v40 = vld [vmem:[%s11187_s1 + $0x15a4] ss:$16 sps:$4 sm:$0xff]  }
 0x14a   :  { %v7779_v44 = vld [vmem:[%s11187_s1 + $0x17a4] ss:$16 sps:$4 sm:$0xff]   ;;  %v7774_v47 = vld [vmem:[%s11187_s1 + $0x15a0] ss:$16 sps:$4 sm:$0xff]  }
 0x14b   :  { %5359 = vmatpush1.bf16.msra.mxu0 %v7726_v46  ;;  %v7777_v46 = vld [vmem:[%s11187_s1 + $0x17a0] ss:$16 sps:$4 sm:$0xff]   ;;  %v7785_v51 = vld [vmem:[%s11187_s1 + $0x1784] ss:$16 sps:$4 sm:$0xff]  }
 0x14c   :  { %5400 = vmatpush1.bf16.msra.mxu1 %v7729_v48  ;;  %5360 = vmatprep.subr.bf16.mxu0 %v7734_v57  ;;  %v7782_v48 = vld [vmem:[%s11187_s1 + $0x1584] ss:$16 sps:$4 sm:$0xff]   ;;  %v7780_v52 = vld [vmem:[%s11187_s1 + $0x1580] ss:$16 sps:$4 sm:$0xff]  }
 0x14d   :  { %5401 = vmatprep.subr.bf16.mxu1 %v7737_v58  ;;  %v7783_v56 = vld [vmem:[%s11187_s1 + $0x1780] ss:$16 sps:$4 sm:$0xff]   ;;  %v7788_v55 = vld [vmem:[%s11187_s1 + $0x1564] ss:$16 sps:$4 sm:$0xff]  }
 0x14e   :  { %v7791_v57 = vld [vmem:[%s11187_s1 + $0x1764] ss:$16 sps:$4 sm:$0xff]   ;;  %v7786_v58 = vld [vmem:[%s11187_s1 + $0x1560] ss:$16 sps:$4 sm:$0xff]  }
 0x14f   :  { %5361 = vmatpush1.bf16.msra.mxu0 %v7732_v61  ;;  %v7789_v61 = vld [vmem:[%s11187_s1 + $0x1760] ss:$16 sps:$4 sm:$0xff]  }
 0x150   :  { %5402 = vmatpush1.bf16.msra.mxu1 %v7735_v62  ;;  %5362 = vmatprep.subr.bf16.mxu0 %v7740_v63  ;;  %v7794_v62 = vld [vmem:[%s11187_s1 + $0x1544] ss:$16 sps:$4 sm:$0xff]  }
 0x151   :  { %5403 = vmatprep.subr.bf16.mxu1 %v7743_v2  ;;  %v7797_v63 = vld [vmem:[%s11187_s1 + $0x1744] ss:$16 sps:$4 sm:$0xff]   ;;  %v7792_v2 = vld [vmem:[%s11187_s1 + $0x1540] ss:$16 sps:$4 sm:$0xff]  }
 0x153   :  { %5363 = vmatpush1.bf16.msra.mxu0 %v7738_v3  ;;  %v7795_v3 = vld [vmem:[%s11187_s1 + $0x1740] ss:$16 sps:$4 sm:$0xff]  }
 0x154   :  { %5404 = vmatpush1.bf16.msra.mxu1 %v7741_v1  ;;  %5364 = vmatprep.subr.bf16.mxu0 %v7746_v7  ;;  %v7800_v1 = vld [vmem:[%s11187_s1 + $0x1524] ss:$16 sps:$4 sm:$0xff]  }
 0x155   :  { %5405 = vmatprep.subr.bf16.mxu1 %v7749_v8  ;;  %v7803_v7 = vld [vmem:[%s11187_s1 + $0x1724] ss:$16 sps:$4 sm:$0xff]   ;;  %v7798_v8 = vld [vmem:[%s11187_s1 + $0x1520] ss:$16 sps:$4 sm:$0xff]  }
 0x157   :  { %5365 = vmatpush1.bf16.msra.mxu0 %v7744_v9  ;;  %v7801_v9 = vld [vmem:[%s11187_s1 + $0x1720] ss:$16 sps:$4 sm:$0xff]  }
 0x158   :  { %5406 = vmatpush1.bf16.msra.mxu1 %v7747_v10  ;;  %5366 = vmatprep.subr.bf16.mxu0 %v7752_v11  ;;  %v7806_v10 = vld [vmem:[%s11187_s1 + $0x1504] ss:$16 sps:$4 sm:$0xff]  }
 0x159   :  { %5407 = vmatprep.subr.bf16.mxu1 %v7755_v14  ;;  %v7809_v11 = vld [vmem:[%s11187_s1 + $0x1704] ss:$16 sps:$4 sm:$0xff]   ;;  %v9792_v14 = vrot.slane %v9557_v5, %v8611_v49  ;;  %v7816_v5 = vld [vmem:[%s11187_s1 + $0xec] ss:$16 sps:$4 sm:$0xff]  }
 0x15b   :  { %5367 = vmatpush1.bf16.msra.mxu0 %v7750_v16  ;;  %v7804_v16 = vld [vmem:[%s11187_s1 + $0x1500] ss:$16 sps:$4 sm:$0xff]  }
 0x15c   :  { %5408 = vmatpush1.bf16.msra.mxu1 %v7753_v19  ;;  %5368 = vmatprep.subr.bf16.mxu0 %v7758_v4  ;;  %v7807_v19 = vld [vmem:[%s11187_s1 + $0x1700] ss:$16 sps:$4 sm:$0xff]   ;;  %v7813_v4 = vld [vmem:[%s11187_s1 + $0x1864] ss:$16 sps:$4 sm:$0xff]  }
 0x15d   :  { %5409 = vmatprep.subr.bf16.mxu1 %v7761_v20  ;;  %v7811_v20 = vld [vmem:[%s11187_s1 + $0x1860] ss:$16 sps:$4 sm:$0xff]  }
 0x15f   :  { %5369 = vmatpush1.bf16.msra.mxu0 %v7756_v21  ;;  %v7814_v21 = vld [vmem:[%s11187_s1 + $0xe8] ss:$16 sps:$4 sm:$0xff]  }
 0x160   :  { %5410 = vmatpush1.bf16.msra.mxu1 %v7759_v27  ;;  %5370 = vmatprep.subr.bf16.mxu0 %v7764_v28  ;;  %v9814_v27 = vcombine.high %v9792_v14, %v9792_v14  ;;  %v7819_v28 = vld [vmem:[%s11187_s1 + $0x1844] ss:$16 sps:$4 sm:$0xff]  }
 0x161   :  { %5411 = vmatprep.subr.bf16.mxu1 %v7767_v29  ;;  %v7822_v29 = vld [vmem:[%s11187_s1 + $0xcc] ss:$16 sps:$4 sm:$0xff]  }
 0x163   :  { %5371 = vmatpush2.bf16.msra.mxu0 %v7762_v30  ;;  %v7817_v30 = vld [vmem:[%s11187_s1 + $0x1840] ss:$16 sps:$4 sm:$0xff]  }
 0x164   :  { %5412 = vmatpush2.bf16.msra.mxu1 %v7765_v34  ;;  %5372 = vmatprep.subr.bf16.mxu0 %v7770_v36  ;;  %v7820_v34 = vld [vmem:[%s11187_s1 + $0xc8] ss:$16 sps:$4 sm:$0xff]  }
 0x165   :  { %5413 = vmatprep.subr.bf16.mxu1 %v7773_v37 }
 0x167   :  { %5373 = vmatpush2.bf16.msra.mxu0 %v7768_v38 }
 0x168   :  { %5414 = vmatpush2.bf16.msra.mxu1 %v7771_v32  ;;  %5374 = vmatprep.subr.bf16.mxu0 %v7776_v40 }
 0x169   :  { %5415 = vmatprep.subr.bf16.mxu1 %v7779_v44  ;;  %v7825_v44 = vld [vmem:[%s11187_s1 + $0x1824] ss:$16 sps:$4 sm:$0xff]  }
 0x16b   :  { %5375 = vmatpush2.bf16.msra.mxu0 %v7774_v47  ;;  %v7828_v47 = vld [vmem:[%s11187_s1 + $0xac] ss:$16 sps:$4 sm:$0xff]  }
 0x16c   :  { %5416 = vmatpush2.bf16.msra.mxu1 %v7777_v46  ;;  %5376 = vmatprep.subr.bf16.mxu0 %v7782_v48 }
 0x16d   :  { %5417 = vmatprep.subr.bf16.mxu1 %v7785_v51  ;;  %v7826_v51 = vld [vmem:[%s11187_s1 + $0xa8] ss:$16 sps:$4 sm:$0xff]  }
 0x16f   :  { %5377 = vmatpush2.bf16.msra.mxu0 %v7780_v52  ;;  %v8445_v52 = vmov 0  }
 0x170   :  { %5418 = vmatpush2.bf16.msra.mxu1 %v7783_v56  ;;  %5378 = vmatprep.subr.bf16.mxu0 %v7788_v55 }
 0x171   :  { %5419 = vmatprep.subr.bf16.mxu1 %v7791_v57 }
 0x173   :  { %5379 = vmatpush2.bf16.msra.mxu0 %v7786_v58 }
 0x174   :  { %5420 = vmatpush2.bf16.msra.mxu1 %v7789_v61  ;;  %5380 = vmatprep.subr.bf16.mxu0 %v7794_v62  ;;  %v7831_v61 = vld [vmem:[%s11187_s1 + $0x1804] ss:$16 sps:$4 sm:$0xff]   ;;  %v7834_v62 = vld [vmem:[%s11187_s1 + $0x8c] ss:$16 sps:$4 sm:$0xff]  }
 0x175   :  { %5421 = vmatprep.subr.bf16.mxu1 %v7797_v63  ;;  %v7832_v63 = vld [vmem:[%s11187_s1 + $0x88] ss:$16 sps:$4 sm:$0xff]  }
 0x177   :  { %5381 = vmatpush2.bf16.msra.mxu0 %v7792_v2  ;;  %v6366_v2 = vld.sshfl [vmem:[%s11188_s0 + $0x18] sm:$0x1 pattern:$0x75316420] }
 0x178   :  { %5422 = vmatpush2.bf16.msra.mxu1 %v7795_v3  ;;  %5382 = vmatprep.subr.bf16.mxu0 %v7800_v1  ;;  %v7837_v3 = vld [vmem:[%s11187_s1 + $0x6c] ss:$16 sps:$4 sm:$0xff]  }
 0x179   :  { %5423 = vmatprep.subr.bf16.mxu1 %v7803_v7  ;;  %v7840_v1 = vld [vmem:[%s11187_s1 + $0x2ec] ss:$16 sps:$4 sm:$0xff]   ;;  %v7835_v7 = vld [vmem:[%s11187_s1 + $0x68] ss:$16 sps:$4 sm:$0xff]  }
 0x17b   :  { %5383 = vmatpush2.bf16.msra.mxu0 %v7798_v8  ;;  %v7838_v8 = vld [vmem:[%s11187_s1 + $0x2e8] ss:$16 sps:$4 sm:$0xff]  }
 0x17c   :  { %5424 = vmatpush2.bf16.msra.mxu1 %v7801_v9  ;;  %5384 = vmatprep.subr.bf16.mxu0 %v7806_v10  ;;  %v9878_v9 = vrot.slane %v6366_v2, %v8611_v49  ;;  %v7843_v10 = vld [vmem:[%s11187_s1 + $0x4c] ss:$16 sps:$4 sm:$0xff]   ;;  %v7841_v49 = vld [vmem:[%s11187_s1 + $0x48] ss:$16 sps:$4 sm:$0xff]  }
 0x17d   :  { %5425 = vmatprep.subr.bf16.mxu1 %v7809_v11  ;;  %v7846_v11 = vld [vmem:[%s11187_s1 + $0x2cc] ss:$16 sps:$4 sm:$0xff]  }
 0x17e   :  { %v7891_v2 = vld [vmem:[%s11187_s1 + $0x14c] ss:$16 sps:$4 sm:$0xff]  }
 0x17f   :  { %5385 = vmatpush2.bf16.msra.mxu0 %v7804_v16  ;;  %v7844_v16 = vld [vmem:[%s11187_s1 + $0x2c8] ss:$16 sps:$4 sm:$0xff]  }
 0x180   :  { %5426 = vmatpush2.bf16.msra.mxu1 %v7807_v19  ;;  %5444 = vmatprep.subr.bf16.mxu0 %v7813_v4  ;;  %v7849_v19 = vld [vmem:[%s11187_s1 + $0x2c] ss:$16 sps:$4 sm:$0xff]  }
 0x181   :  { %5477 = vmatprep.subr.bf16.mxu1 %v7816_v5  ;;  %v7852_v4 = vld [vmem:[%s11187_s1 + $0x2ac] ss:$16 sps:$4 sm:$0xff]   ;;  %v7847_v5 = vld [vmem:[%s11187_s1 + $0x28] ss:$16 sps:$4 sm:$0xff]  }
 0x182   :  { %v5142_v36 = vpop.f32.mrf.mxu0  ;;  %5387 = vmatmul.mubr.bf16.vlgmr.msra.gmra.mxu0 %v9792_v14 }
 0x183   :  { %v5183_v37 = vpop.f32.mrf.mxu1  ;;  %5428 = vmatmul.mubr.bf16.vlgmr.msra.gmra.mxu1 %v9814_v27  ;;  %v5143_v38 = vadd.f32 %v5142_v36, %v9627_v45  ;;  %5445 = vmatpush1.bf16.msra.mxu0 %v7811_v20  ;;  %v7823_v45 = vld [vmem:[%s11187_s1 + $0x1820] ss:$16 sps:$4 sm:$0xff]   ;;  %v7850_v20 = vld [vmem:[%s11187_s1 + $0x2a8] ss:$16 sps:$4 sm:$0xff]  }
 0x184   :  { %5478 = vmatpush1.bf16.msra.mxu1 %v7814_v21  ;;  %v5144_v32 = vpop.f32.mrf.mxu0  ;;  %5446 = vmatprep.subr.bf16.mxu0 %v7819_v28  ;;  %v7855_v21 = vld [vmem:[%s11187_s1 + $0xc] ss:$16 sps:$4 sm:$0xff]   ;;  %v7853_v28 = vld [vmem:[%s11187_s1 + $0x8] ss:$16 sps:$4 sm:$0xff]  }
 0x185   :  { %v5185_v40 = vpop.f32.mrf.mxu1  ;;  %5479 = vmatprep.subr.bf16.mxu1 %v7822_v29  ;;  %v9837_v46 = vadd.f32 %v5183_v37, %v5143_v38  ;;  %v5145_v48 = vadd.f32 %v5144_v32, %v9638_v53  ;;  %5468 = vmatprep.mubr.bf16.mxu0 %v8445_v52  ;;  %v7856_v29 = vld [vmem:[%s11187_s1 + $0x288] ss:$16 sps:$4 sm:$0xff]   ;;  %v7867_v38 = vld [vmem:[%s11187_s1 + $0x1cc] ss:$16 sps:$4 sm:$0xff]  }
 0x186   :  { %5509 = vmatprep.mubr.bf16.mxu1 %v8639_v60  ;;  %v5146_v56 = vpop.f32.mrf.mxu0  ;;  %v7829_v60 = vld [vmem:[%s11187_s1 + $0x1800] ss:$16 sps:$4 sm:$0xff]   ;;  %v7859_v36 = vld [vmem:[%s11187_s1 + $0x1e8] ss:$16 sps:$4 sm:$0xff]   ;;  %v7870_v32 = vld [vmem:[%s11187_s1 + $0x24c] ss:$16 sps:$4 sm:$0xff]  }
 0x187   :  { %v5187_v55 = vpop.f32.mrf.mxu1  ;;  %v9848_v57 = vadd.f32 %v5185_v40, %v5145_v48  ;;  %5447 = vmatpush1.bf16.msra.mxu0 %v7817_v30  ;;  %v7861_v30 = vld [vmem:[%s11187_s1 + $0x1ec] ss:$16 sps:$4 sm:$0xff]   ;;  %v7862_v37 = vld [vmem:[%s11187_s1 + $0x268] ss:$16 sps:$4 sm:$0xff]  }
 0x188   :  { %5480 = vmatpush1.bf16.msra.mxu1 %v7820_v34  ;;  %v5147_v53 = vpop.f32.mrf.mxu0  ;;  %5448 = vmatprep.subr.bf16.mxu0 %v7825_v44  ;;  %v7864_v34 = vld [vmem:[%s11187_s1 + $0x26c] ss:$16 sps:$4 sm:$0xff]   ;;  %v7865_v40 = vld [vmem:[%s11187_s1 + $0x1c8] ss:$16 sps:$4 sm:$0xff]  }
 0x189   :  { %v5188_v58 = vpop.f32.mrf.mxu1  ;;  %5481 = vmatprep.subr.bf16.mxu1 %v7828_v47  ;;  %v7868_v44 = vld [vmem:[%s11187_s1 + $0x248] ss:$16 sps:$4 sm:$0xff]   ;;  %v7873_v47 = vld [vmem:[%s11187_s1 + $0x1ac] ss:$16 sps:$4 sm:$0xff]  }
 0x18a   :  { %v7876_v48 = vld [vmem:[%s11187_s1 + $0x22c] ss:$16 sps:$4 sm:$0xff]   ;;  %v7877_v53 = vld [vmem:[%s11187_s1 + $0x188] ss:$16 sps:$4 sm:$0xff]  }
 0x18b   :  { %5449 = vmatpush1.bf16.msra.mxu0 %v7823_v45  ;;  %v7871_v45 = vld [vmem:[%s11187_s1 + $0x1a8] ss:$16 sps:$4 sm:$0xff]   ;;  %v7879_v56 = vld [vmem:[%s11187_s1 + $0x18c] ss:$16 sps:$4 sm:$0xff]  }
 0x18c   :  { %5482 = vmatpush1.bf16.msra.mxu1 %v7826_v51  ;;  %5450 = vmatprep.subr.bf16.mxu0 %v7831_v61  ;;  %v7874_v51 = vld [vmem:[%s11187_s1 + $0x228] ss:$16 sps:$4 sm:$0xff]   ;;  %v7882_v55 = vld [vmem:[%s11187_s1 + $0x20c] ss:$16 sps:$4 sm:$0xff]  }
 0x18d   :  { %5483 = vmatprep.subr.bf16.mxu1 %v7834_v62  ;;  %v7880_v58 = vld [vmem:[%s11187_s1 + $0x208] ss:$16 sps:$4 sm:$0xff]   ;;  %v7885_v61 = vld [vmem:[%s11187_s1 + $0x16c] ss:$16 sps:$4 sm:$0xff]  }
 0x18e   :  { %v7888_v62 = vld [vmem:[%s11187_s1 + $0x3ec] ss:$16 sps:$4 sm:$0xff]  }
 0x18f   :  { %5451 = vmatpush1.bf16.msra.mxu0 %v7829_v60  ;;  %v7883_v60 = vld [vmem:[%s11187_s1 + $0x168] ss:$16 sps:$4 sm:$0xff]  }
 0x190   :  { %5484 = vmatpush1.bf16.msra.mxu1 %v7832_v63  ;;  %5518 = vmatprep.subr.bf16.mxu0 %v7840_v1  ;;  %v7886_v63 = vld [vmem:[%s11187_s1 + $0x3e8] ss:$16 sps:$4 sm:$0xff]  }
 0x191   :  { %5485 = vmatprep.subr.bf16.mxu1 %v7837_v3  ;;  %v7894_v3 = vld [vmem:[%s11187_s1 + $0x3cc] ss:$16 sps:$4 sm:$0xff]   ;;  %v7889_v1 = vld [vmem:[%s11187_s1 + $0x148] ss:$16 sps:$4 sm:$0xff]  }
 0x192   :  { %7151 = vmatmul.mubr.msk.bf16.vlgmr.msra.gmra.mxu0 %vm4940_vm0, %v9878_v9 }
 0x193   :  { %5519 = vmatpush1.bf16.msra.mxu0 %v7838_v8  ;;  %5550 = vmatprep.mubr.bf16.mxu0 %v8652_v0  ;;  %v7858_v0 = vld [vmem:[%s11187_s1 + $0x28c] ss:$16 sps:$4 sm:$0xff]  }
 0x194   :  { %5486 = vmatpush1.bf16.msra.mxu1 %v7835_v7  ;;  %5520 = vmatprep.subr.bf16.mxu0 %v7846_v11  ;;  %v7892_v7 = vld [vmem:[%s11187_s1 + $0x3c8] ss:$16 sps:$4 sm:$0xff]   ;;  %v7897_v8 = vld [vmem:[%s11187_s1 + $0x12c] ss:$16 sps:$4 sm:$0xff]  }
 0x195   :  { %5487 = vmatprep.subr.bf16.mxu1 %v7843_v10  ;;  %v7900_v10 = vld [vmem:[%s11187_s1 + $0x3ac] ss:$16 sps:$4 sm:$0xff]   ;;  %v7895_v11 = vld [vmem:[%s11187_s1 + $0x128] ss:$16 sps:$4 sm:$0xff]  }
 0x197   :  { %5521 = vmatpush1.bf16.msra.mxu0 %v7844_v16  ;;  %v7903_v16 = vld [vmem:[%s11187_s1 + $0x10c] ss:$16 sps:$4 sm:$0xff]  }
 0x198   :  { %5488 = vmatpush1.bf16.msra.mxu1 %v7841_v49  ;;  %5522 = vmatprep.subr.bf16.mxu0 %v7852_v4  ;;  %v7898_v49 = vld [vmem:[%s11187_s1 + $0x3a8] ss:$16 sps:$4 sm:$0xff]  }
 0x199   :  { %5489 = vmatprep.subr.bf16.mxu1 %v7849_v19  ;;  %v7906_v19 = vld [vmem:[%s11187_s1 + $0x38c] ss:$16 sps:$4 sm:$0xff]   ;;  %v7901_v4 = vld [vmem:[%s11187_s1 + $0x108] ss:$16 sps:$4 sm:$0xff]  }
 0x19b   :  { %5523 = vmatpush1.bf16.msra.mxu0 %v7850_v20  ;;  %v7909_v20 = vld [vmem:[%s11187_s1 + $0x36c] ss:$16 sps:$4 sm:$0xff]  }
 0x19c   :  { %5490 = vmatpush1.bf16.msra.mxu1 %v7847_v5  ;;  %5524 = vmatprep.subr.bf16.mxu0 %v7858_v0  ;;  %v7904_v5 = vld [vmem:[%s11187_s1 + $0x388] ss:$16 sps:$4 sm:$0xff]  }
 0x19d   :  { %5491 = vmatprep.subr.bf16.mxu1 %v7855_v21  ;;  %v7912_v21 = vld [vmem:[%s11187_s1 + $0x4ec] ss:$16 sps:$4 sm:$0xff]   ;;  %v7907_v0 = vld [vmem:[%s11187_s1 + $0x368] ss:$16 sps:$4 sm:$0xff]  }
 0x19f   :  { %5525 = vmatpush1.bf16.msra.mxu0 %v7856_v29  ;;  %v7915_v29 = vld [vmem:[%s11187_s1 + $0x34c] ss:$16 sps:$4 sm:$0xff]  }
 0x1a0   :  { %5492 = vmatpush1.bf16.msra.mxu1 %v7853_v28  ;;  %5526 = vmatprep.subr.bf16.mxu0 %v7864_v34  ;;  %v7910_v28 = vld [vmem:[%s11187_s1 + $0x4e8] ss:$16 sps:$4 sm:$0xff]  }
 0x1a1   :  { %5493 = vmatprep.subr.bf16.mxu1 %v7861_v30  ;;  %v7918_v30 = vld [vmem:[%s11187_s1 + $0x4cc] ss:$16 sps:$4 sm:$0xff]   ;;  %v7913_v34 = vld [vmem:[%s11187_s1 + $0x348] ss:$16 sps:$4 sm:$0xff]  }
 0x1a3   :  { %5527 = vmatpush1.bf16.msra.mxu0 %v7862_v37 }
 0x1a4   :  { %5494 = vmatpush2.bf16.msra.mxu1 %v7859_v36  ;;  %5528 = vmatprep.subr.bf16.mxu0 %v7870_v32  ;;  %v7916_v36 = vld [vmem:[%s11187_s1 + $0x4c8] ss:$16 sps:$4 sm:$0xff]  }
 0x1a5   :  { %5495 = vmatprep.subr.bf16.mxu1 %v7867_v38 }
 0x1a7   :  { %5529 = vmatpush1.bf16.msra.mxu0 %v7868_v44 }
 0x1a8   :  { %5496 = vmatpush2.bf16.msra.mxu1 %v7865_v40  ;;  %5530 = vmatprep.subr.bf16.mxu0 %v7876_v48  ;;  %v7924_v48 = vld [vmem:[%s11187_s1 + $0x4ac] ss:$16 sps:$4 sm:$0xff]  }
 0x1a9   :  { %5497 = vmatprep.subr.bf16.mxu1 %v7873_v47  ;;  %v7921_v47 = vld [vmem:[%s11187_s1 + $0x32c] ss:$16 sps:$4 sm:$0xff]  }
 0x1ab   :  { %5531 = vmatpush1.bf16.msra.mxu0 %v7874_v51  ;;  %v7922_v51 = vld [vmem:[%s11187_s1 + $0x4a8] ss:$16 sps:$4 sm:$0xff]  }
 0x1ac   :  { %5498 = vmatpush2.bf16.msra.mxu1 %v7871_v45  ;;  %5532 = vmatprep.subr.bf16.mxu0 %v7882_v55 }
 0x1ad   :  { %5499 = vmatprep.subr.bf16.mxu1 %v7879_v56 }
 0x1af   :  { %5533 = vmatpush1.bf16.msra.mxu0 %v7880_v58 }
 0x1b0   :  { %5500 = vmatpush2.bf16.msra.mxu1 %v7877_v53  ;;  %5534 = vmatprep.subr.bf16.mxu0 %v7888_v62  ;;  %v7930_v62 = vld [vmem:[%s11187_s1 + $0x48c] ss:$16 sps:$4 sm:$0xff]  }
 0x1b1   :  { %5501 = vmatprep.subr.bf16.mxu1 %v7885_v61 }
 0x1b3   :  { %5535 = vmatpush2.bf16.msra.mxu0 %v7886_v63  ;;  %v7933_v63 = vld [vmem:[%s11187_s1 + $0x46c] ss:$16 sps:$4 sm:$0xff]  }
 0x1b4   :  { %5502 = vmatpush2.bf16.msra.mxu1 %v7883_v60  ;;  %5536 = vmatprep.subr.bf16.mxu0 %v7894_v3  ;;  %v7928_v60 = vld [vmem:[%s11187_s1 + $0x488] ss:$16 sps:$4 sm:$0xff]  }
 0x1b5   :  { %5503 = vmatprep.subr.bf16.mxu1 %v7891_v2  ;;  %v7936_v2 = vld [vmem:[%s11187_s1 + $0x6ec] ss:$16 sps:$4 sm:$0xff]   ;;  %v7931_v3 = vld [vmem:[%s11187_s1 + $0x468] ss:$16 sps:$4 sm:$0xff]  }
 0x1b7   :  { %5537 = vmatpush2.bf16.msra.mxu0 %v7892_v7  ;;  %v7939_v7 = vld [vmem:[%s11187_s1 + $0x44c] ss:$16 sps:$4 sm:$0xff]  }
 0x1b8   :  { %5504 = vmatpush2.bf16.msra.mxu1 %v7889_v1  ;;  %5538 = vmatprep.subr.bf16.mxu0 %v7900_v10  ;;  %v7934_v1 = vld [vmem:[%s11187_s1 + $0x6e8] ss:$16 sps:$4 sm:$0xff]  }
 0x1b9   :  { %5505 = vmatprep.subr.bf16.mxu1 %v7897_v8  ;;  %v7942_v8 = vld [vmem:[%s11187_s1 + $0x6cc] ss:$16 sps:$4 sm:$0xff]   ;;  %v7937_v10 = vld [vmem:[%s11187_s1 + $0x448] ss:$16 sps:$4 sm:$0xff]  }
 0x1bb   :  { %5539 = vmatpush2.bf16.msra.mxu0 %v7898_v49  ;;  %v7945_v49 = vld [vmem:[%s11187_s1 + $0x42c] ss:$16 sps:$4 sm:$0xff]  }
 0x1bc   :  { %5506 = vmatpush2.bf16.msra.mxu1 %v7895_v11  ;;  %5540 = vmatprep.subr.bf16.mxu0 %v7906_v19  ;;  %v7940_v11 = vld [vmem:[%s11187_s1 + $0x6c8] ss:$16 sps:$4 sm:$0xff]  }
 0x1bd   :  { %5507 = vmatprep.subr.bf16.mxu1 %v7903_v16  ;;  %v7943_v16 = vld [vmem:[%s11187_s1 + $0x428] ss:$16 sps:$4 sm:$0xff]  }
 0x1be   :  { %v7946_v19 = vld [vmem:[%s11187_s1 + $0x6a8] ss:$16 sps:$4 sm:$0xff]  }
 0x1bf   :  { %5541 = vmatpush2.bf16.msra.mxu0 %v7904_v5  ;;  %v7949_v5 = vld [vmem:[%s11187_s1 + $0x408] ss:$16 sps:$4 sm:$0xff]  }
 0x1c0   :  { %5508 = vmatpush2.bf16.msra.mxu1 %v7901_v4  ;;  %5542 = vmatprep.subr.bf16.mxu0 %v7909_v20  ;;  %v7951_v4 = vld [vmem:[%s11187_s1 + $0x40c] ss:$16 sps:$4 sm:$0xff]   ;;  %v7952_v20 = vld [vmem:[%s11187_s1 + $0x688] ss:$16 sps:$4 sm:$0xff]  }
 0x1c1   :  { %5559 = vmatprep.subr.bf16.mxu1 %v7912_v21  ;;  %v7957_v21 = vld [vmem:[%s11187_s1 + $0x5ec] ss:$16 sps:$4 sm:$0xff]  }
 0x1c2   :  { %v5224_v37 = vpop.f32.mrf.mxu0 }
 0x1c3   :  { %v5265_v38 = vpop.f32.mrf.mxu1  ;;  %5510 = vmatmul.mubr.bf16.vlgmr.msra.gmra.mxu1 %v8689_v13  ;;  %v5225_v32 = vadd.f32 %v5224_v37, %v9837_v46  ;;  %5543 = vmatpush2.bf16.msra.mxu0 %v7907_v0  ;;  %v7919_v46 = vld [vmem:[%s11187_s1 + $0x328] ss:$16 sps:$4 sm:$0xff]   ;;  %v7960_v0 = vld [vmem:[%s11187_s1 + $0x66c] ss:$16 sps:$4 sm:$0xff]  }
 0x1c4   :  { %5560 = vmatpush1.bf16.msra.mxu1 %v7910_v28  ;;  %v5226_v40 = vpop.f32.mrf.mxu0  ;;  %5544 = vmatprep.subr.bf16.mxu0 %v7915_v29  ;;  %v7955_v28 = vld [vmem:[%s11187_s1 + $0x5e8] ss:$16 sps:$4 sm:$0xff]  }
 0x1c5   :  { %v5267_v44 = vpop.f32.mrf.mxu1  ;;  %5561 = vmatprep.subr.bf16.mxu1 %v7918_v30  ;;  %v10047_v45 = vadd.f32 %v5265_v38, %v5225_v32  ;;  %v5227_v13 = vadd.f32 %v5226_v40, %v9848_v57  ;;  %5591 = vmatprep.mubr.bf16.mxu1 %v8701_v17  ;;  %v7927_v57 = vld [vmem:[%s11187_s1 + $0x30c] ss:$16 sps:$4 sm:$0xff]   ;;  %v7925_v17 = vld [vmem:[%s11187_s1 + $0x308] ss:$16 sps:$4 sm:$0xff]  }
 0x1c6   :  { %v5228_v56 = vpop.f32.mrf.mxu0  ;;  %v7958_v29 = vld [vmem:[%s11187_s1 + $0x668] ss:$16 sps:$4 sm:$0xff]   ;;  %v7963_v30 = vld [vmem:[%s11187_s1 + $0x5cc] ss:$16 sps:$4 sm:$0xff]  }
 0x1c7   :  { %v5269_v55 = vpop.f32.mrf.mxu1  ;;  %v10057_v53 = vadd.f32 %v5267_v44, %v5227_v13  ;;  %5545 = vmatpush2.bf16.msra.mxu0 %v7913_v34  ;;  %v7966_v34 = vld [vmem:[%s11187_s1 + $0x64c] ss:$16 sps:$4 sm:$0xff]   ;;  %v7964_v37 = vld [vmem:[%s11187_s1 + $0x648] ss:$16 sps:$4 sm:$0xff]  }
 0x1c8   :  { %5562 = vmatpush1.bf16.msra.mxu1 %v7916_v36  ;;  %v5229_v58 = vpop.f32.mrf.mxu0  ;;  %5546 = vmatprep.subr.bf16.mxu0 %v7921_v47  ;;  %v7961_v36 = vld [vmem:[%s11187_s1 + $0x5c8] ss:$16 sps:$4 sm:$0xff]   ;;  %v7969_v38 = vld [vmem:[%s11187_s1 + $0x5ac] ss:$16 sps:$4 sm:$0xff]  }
 0x1c9   :  { %v5270_v61 = vpop.f32.mrf.mxu1  ;;  %5563 = vmatprep.subr.bf16.mxu1 %v7924_v48  ;;  %v7972_v32 = vld [vmem:[%s11187_s1 + $0x62c] ss:$16 sps:$4 sm:$0xff]   ;;  %v7967_v40 = vld [vmem:[%s11187_s1 + $0x5a8] ss:$16 sps:$4 sm:$0xff]  }
 0x1ca   :  { %v7970_v44 = vld [vmem:[%s11187_s1 + $0x628] ss:$16 sps:$4 sm:$0xff]   ;;  %v7975_v47 = vld [vmem:[%s11187_s1 + $0x58c] ss:$16 sps:$4 sm:$0xff]  }
 0x1cb   :  { %5547 = vmatpush2.bf16.msra.mxu0 %v7919_v46  ;;  %v7978_v48 = vld [vmem:[%s11187_s1 + $0x60c] ss:$16 sps:$4 sm:$0xff]   ;;  %v7973_v13 = vld [vmem:[%s11187_s1 + $0x588] ss:$16 sps:$4 sm:$0xff]  }
 0x1cc   :  { %5564 = vmatpush1.bf16.msra.mxu1 %v7922_v51  ;;  %5548 = vmatprep.subr.bf16.mxu0 %v7927_v57  ;;  %v7976_v46 = vld [vmem:[%s11187_s1 + $0x608] ss:$16 sps:$4 sm:$0xff]   ;;  %v7981_v51 = vld [vmem:[%s11187_s1 + $0x56c] ss:$16 sps:$4 sm:$0xff]  }
 0x1cd   :  { %5565 = vmatprep.subr.bf16.mxu1 %v7930_v62  ;;  %v7984_v56 = vld [vmem:[%s11187_s1 + $0x7ec] ss:$16 sps:$4 sm:$0xff]   ;;  %v7979_v55 = vld [vmem:[%s11187_s1 + $0x568] ss:$16 sps:$4 sm:$0xff]  }
 0x1ce   :  { %v7982_v58 = vld [vmem:[%s11187_s1 + $0x7e8] ss:$16 sps:$4 sm:$0xff]   ;;  %v7987_v61 = vld [vmem:[%s11187_s1 + $0x54c] ss:$16 sps:$4 sm:$0xff]  }
 0x1cf   :  { %5549 = vmatpush2.bf16.msra.mxu0 %v7925_v17  ;;  %v7990_v57 = vld [vmem:[%s11187_s1 + $0x7cc] ss:$16 sps:$4 sm:$0xff]   ;;  %v7985_v62 = vld [vmem:[%s11187_s1 + $0x548] ss:$16 sps:$4 sm:$0xff]  }
 0x1d0   :  { %5566 = vmatpush1.bf16.msra.mxu1 %v7928_v60  ;;  %5600 = vmatprep.subr.bf16.mxu0 %v7936_v2  ;;  %v7988_v17 = vld [vmem:[%s11187_s1 + $0x7c8] ss:$16 sps:$4 sm:$0xff]   ;;  %v7993_v60 = vld [vmem:[%s11187_s1 + $0x52c] ss:$16 sps:$4 sm:$0xff]  }
 0x1d1   :  { %5567 = vmatprep.subr.bf16.mxu1 %v7933_v63  ;;  %v7996_v63 = vld [vmem:[%s11187_s1 + $0x7ac] ss:$16 sps:$4 sm:$0xff]   ;;  %v7991_v2 = vld [vmem:[%s11187_s1 + $0x528] ss:$16 sps:$4 sm:$0xff]  }
 0x1d2   :  { %5551 = vmatmul.mubr.bf16.vlgmr.msra.gmra.mxu0 %v8705_v18  ;;  %v7948_v18 = vld [vmem:[%s11187_s1 + $0x6ac] ss:$16 sps:$4 sm:$0xff]  }
 0x1d3   :  { %5601 = vmatpush1.bf16.msra.mxu0 %v7934_v1  ;;  %5632 = vmatprep.mubr.bf16.mxu0 %v8721_v23  ;;  %v7954_v23 = vld [vmem:[%s11187_s1 + $0x68c] ss:$16 sps:$4 sm:$0xff]  }
 0x1d4   :  { %5568 = vmatpush1.bf16.msra.mxu1 %v7931_v3  ;;  %5602 = vmatprep.subr.bf16.mxu0 %v7942_v8  ;;  %v7994_v3 = vld [vmem:[%s11187_s1 + $0x7a8] ss:$16 sps:$4 sm:$0xff]   ;;  %v7999_v1 = vld [vmem:[%s11187_s1 + $0x50c] ss:$16 sps:$4 sm:$0xff]  }
 0x1d5   :  { %5569 = vmatprep.subr.bf16.mxu1 %v7939_v7  ;;  %v8002_v7 = vld [vmem:[%s11187_s1 + $0x78c] ss:$16 sps:$4 sm:$0xff]   ;;  %v7997_v8 = vld [vmem:[%s11187_s1 + $0x508] ss:$16 sps:$4 sm:$0xff]  }
 0x1d7   :  { %5603 = vmatpush1.bf16.msra.mxu0 %v7940_v11  ;;  %v8005_v11 = vld [vmem:[%s11187_s1 + $0x76c] ss:$16 sps:$4 sm:$0xff]  }
 0x1d8   :  { %5570 = vmatpush1.bf16.msra.mxu1 %v7937_v10  ;;  %5604 = vmatprep.subr.bf16.mxu0 %v7948_v18  ;;  %v8000_v10 = vld [vmem:[%s11187_s1 + $0x788] ss:$16 sps:$4 sm:$0xff]  }
 0x1d9   :  { %5571 = vmatprep.subr.bf16.mxu1 %v7945_v49  ;;  %v8008_v49 = vld [vmem:[%s11187_s1 + $0x8ec] ss:$16 sps:$4 sm:$0xff]   ;;  %v8003_v18 = vld [vmem:[%s11187_s1 + $0x768] ss:$16 sps:$4 sm:$0xff]  }
 0x1db   :  { %5605 = vmatpush1.bf16.msra.mxu0 %v7946_v19  ;;  %v8011_v19 = vld [vmem:[%s11187_s1 + $0x74c] ss:$16 sps:$4 sm:$0xff]  }
 0x1dc   :  { %5572 = vmatpush1.bf16.msra.mxu1 %v7943_v16  ;;  %5606 = vmatprep.subr.bf16.mxu0 %v7954_v23  ;;  %v8006_v16 = vld [vmem:[%s11187_s1 + $0x8e8] ss:$16 sps:$4 sm:$0xff]  }
 0x1dd   :  { %5573 = vmatprep.subr.bf16.mxu1 %v7951_v4  ;;  %v8014_v4 = vld [vmem:[%s11187_s1 + $0x8cc] ss:$16 sps:$4 sm:$0xff]  }
 0x1df   :  { %5607 = vmatpush1.bf16.msra.mxu0 %v7952_v20 }
 0x1e0   :  { %5574 = vmatpush1.bf16.msra.mxu1 %v7949_v5  ;;  %5608 = vmatprep.subr.bf16.mxu0 %v7960_v0  ;;  %v8012_v0 = vld [vmem:[%s11187_s1 + $0x8c8] ss:$16 sps:$4 sm:$0xff]  }
 0x1e1   :  { %5575 = vmatprep.subr.bf16.mxu1 %v7957_v21  ;;  %v8009_v21 = vld [vmem:[%s11187_s1 + $0x748] ss:$16 sps:$4 sm:$0xff]  }
 0x1e3   :  { %5609 = vmatpush1.bf16.msra.mxu0 %v7958_v29 }
 0x1e4   :  { %5576 = vmatpush2.bf16.msra.mxu1 %v7955_v28  ;;  %5610 = vmatprep.subr.bf16.mxu0 %v7966_v34 }
 0x1e5   :  { %5577 = vmatprep.subr.bf16.mxu1 %v7963_v30 }
 0x1e7   :  { %5611 = vmatpush1.bf16.msra.mxu0 %v7964_v37 }
 0x1e8   :  { %5578 = vmatpush2.bf16.msra.mxu1 %v7961_v36  ;;  %5612 = vmatprep.subr.bf16.mxu0 %v7972_v32  ;;  %v8015_v32 = vld [vmem:[%s11187_s1 + $0x728] ss:$16 sps:$4 sm:$0xff]  }
 0x1e9   :  { %5579 = vmatprep.subr.bf16.mxu1 %v7969_v38 }
 0x1eb   :  { %5613 = vmatpush1.bf16.msra.mxu0 %v7970_v44 }
 0x1ec   :  { %5580 = vmatpush2.bf16.msra.mxu1 %v7967_v40  ;;  %5614 = vmatprep.subr.bf16.mxu0 %v7978_v48  ;;  %v8018_v40 = vld [vmem:[%s11187_s1 + $0x8a8] ss:$16 sps:$4 sm:$0xff]  }
 0x1ed   :  { %5581 = vmatprep.subr.bf16.mxu1 %v7975_v47  ;;  %v8021_v48 = vld [vmem:[%s11187_s1 + $0x708] ss:$16 sps:$4 sm:$0xff]  }
 0x1ef   :  { %5615 = vmatpush1.bf16.msra.mxu0 %v7976_v46  ;;  %v8029_v46 = vld [vmem:[%s11187_s1 + $0x86c] ss:$16 sps:$4 sm:$0xff]  }
 0x1f0   :  { %5582 = vmatpush2.bf16.msra.mxu1 %v7973_v13  ;;  %5616 = vmatprep.subr.bf16.mxu0 %v7984_v56  ;;  %v8024_v13 = vld [vmem:[%s11187_s1 + $0x888] ss:$16 sps:$4 sm:$0xff]  }
 0x1f1   :  { %5583 = vmatprep.subr.bf16.mxu1 %v7981_v51  ;;  %v8032_v51 = vld [vmem:[%s11187_s1 + $0xaec] ss:$16 sps:$4 sm:$0xff]   ;;  %v8027_v56 = vld [vmem:[%s11187_s1 + $0x868] ss:$16 sps:$4 sm:$0xff]  }
 0x1f3   :  { %5617 = vmatpush2.bf16.msra.mxu0 %v7982_v58  ;;  %v8035_v58 = vld [vmem:[%s11187_s1 + $0x84c] ss:$16 sps:$4 sm:$0xff]  }
 0x1f4   :  { %5584 = vmatpush2.bf16.msra.mxu1 %v7979_v55  ;;  %5618 = vmatprep.subr.bf16.mxu0 %v7990_v57  ;;  %v8030_v55 = vld [vmem:[%s11187_s1 + $0xae8] ss:$16 sps:$4 sm:$0xff]  }
 0x1f5   :  { %5585 = vmatprep.subr.bf16.mxu1 %v7987_v61  ;;  %v8038_v61 = vld [vmem:[%s11187_s1 + $0xacc] ss:$16 sps:$4 sm:$0xff]   ;;  %v8033_v57 = vld [vmem:[%s11187_s1 + $0x848] ss:$16 sps:$4 sm:$0xff]  }
 0x1f7   :  { %5619 = vmatpush2.bf16.msra.mxu0 %v7988_v17  ;;  %v8041_v17 = vld [vmem:[%s11187_s1 + $0x82c] ss:$16 sps:$4 sm:$0xff]  }
 0x1f8   :  { %5586 = vmatpush2.bf16.msra.mxu1 %v7985_v62  ;;  %5620 = vmatprep.subr.bf16.mxu0 %v7996_v63  ;;  %v8036_v62 = vld [vmem:[%s11187_s1 + $0xac8] ss:$16 sps:$4 sm:$0xff]  }
 0x1f9   :  { %5587 = vmatprep.subr.bf16.mxu1 %v7993_v60  ;;  %v8039_v60 = vld [vmem:[%s11187_s1 + $0x828] ss:$16 sps:$4 sm:$0xff]  }
 0x1fa   :  { %v8042_v63 = vld [vmem:[%s11187_s1 + $0xaa8] ss:$16 sps:$4 sm:$0xff]  }
 0x1fb   :  { %5621 = vmatpush2.bf16.msra.mxu0 %v7994_v3  ;;  %v8045_v3 = vld [vmem:[%s11187_s1 + $0x808] ss:$16 sps:$4 sm:$0xff]  }
 0x1fc   :  { %5588 = vmatpush2.bf16.msra.mxu1 %v7991_v2  ;;  %5622 = vmatprep.subr.bf16.mxu0 %v8002_v7  ;;  %v8047_v2 = vld [vmem:[%s11187_s1 + $0x80c] ss:$16 sps:$4 sm:$0xff]  }
 0x1fd   :  { %5589 = vmatprep.subr.bf16.mxu1 %v7999_v1  ;;  %v8048_v1 = vld [vmem:[%s11187_s1 + $0xa88] ss:$16 sps:$4 sm:$0xff]   ;;  %v8053_v7 = vld [vmem:[%s11187_s1 + $0x9ec] ss:$16 sps:$4 sm:$0xff]  }
 0x1ff   :  { %5623 = vmatpush2.bf16.msra.mxu0 %v8000_v10  ;;  %v8051_v10 = vld [vmem:[%s11187_s1 + $0x9e8] ss:$16 sps:$4 sm:$0xff]  }
 0x200   :  { %5590 = vmatpush2.bf16.msra.mxu1 %v7997_v8  ;;  %5624 = vmatprep.subr.bf16.mxu0 %v8005_v11  ;;  %v8056_v8 = vld [vmem:[%s11187_s1 + $0xa6c] ss:$16 sps:$4 sm:$0xff]   ;;  %v8054_v11 = vld [vmem:[%s11187_s1 + $0xa68] ss:$16 sps:$4 sm:$0xff]  }
 0x201   :  { %5641 = vmatprep.subr.bf16.mxu1 %v8008_v49  ;;  %v8059_v49 = vld [vmem:[%s11187_s1 + $0x9cc] ss:$16 sps:$4 sm:$0xff]  }
 0x202   :  { %v5306_v23 = vpop.f32.mrf.mxu0 }
 0x203   :  { %v5347_v5 = vpop.f32.mrf.mxu1  ;;  %5592 = vmatmul.mubr.bf16.vlgmr.msra.gmra.mxu1 %v8900_v26  ;;  %v5307_v20 = vadd.f32 %v5306_v23, %v10047_v45  ;;  %5625 = vmatpush2.bf16.msra.mxu0 %v8003_v18  ;;  %v8017_v26 = vld [vmem:[%s11187_s1 + $0x72c] ss:$16 sps:$4 sm:$0xff]  }
 0x204   :  { %5642 = vmatpush1.bf16.msra.mxu1 %v8006_v16  ;;  %v5308_v28 = vpop.f32.mrf.mxu0  ;;  %5626 = vmatprep.subr.bf16.mxu0 %v8011_v19  ;;  %v8020_v45 = vld [vmem:[%s11187_s1 + $0x8ac] ss:$16 sps:$4 sm:$0xff]   ;;  %v8057_v16 = vld [vmem:[%s11187_s1 + $0x9c8] ss:$16 sps:$4 sm:$0xff]  }
 0x205   :  { %v5349_v29 = vpop.f32.mrf.mxu1  ;;  %5643 = vmatprep.subr.bf16.mxu1 %v8014_v4  ;;  %v10249_v30 = vadd.f32 %v5347_v5, %v5307_v20  ;;  %v5309_v34 = vadd.f32 %v5308_v28, %v10057_v53  ;;  %5673 = vmatprep.mubr.bf16.mxu1 %v8953_v41  ;;  %v8023_v41 = vld [vmem:[%s11187_s1 + $0x70c] ss:$16 sps:$4 sm:$0xff]   ;;  %v8060_v19 = vld [vmem:[%s11187_s1 + $0xa48] ss:$16 sps:$4 sm:$0xff]  }
 0x206   :  { %v5310_v36 = vpop.f32.mrf.mxu0  ;;  %v8026_v53 = vld [vmem:[%s11187_s1 + $0x88c] ss:$16 sps:$4 sm:$0xff]   ;;  %v8063_v5 = vld [vmem:[%s11187_s1 + $0x9a8] ss:$16 sps:$4 sm:$0xff]  }
 0x207   :  { %v5351_v37 = vpop.f32.mrf.mxu1  ;;  %v10253_v38 = vadd.f32 %v5349_v29, %v5309_v34  ;;  %5627 = vmatpush2.bf16.msra.mxu0 %v8009_v21  ;;  %v8062_v18 = vld [vmem:[%s11187_s1 + $0xa4c] ss:$16 sps:$4 sm:$0xff]   ;;  %v8066_v20 = vld [vmem:[%s11187_s1 + $0xa28] ss:$16 sps:$4 sm:$0xff]  }
 0x208   :  { %5644 = vmatpush1.bf16.msra.mxu1 %v8012_v0  ;;  %v5311_v44 = vpop.f32.mrf.mxu0  ;;  %5628 = vmatprep.subr.bf16.mxu0 %v8017_v26  ;;  %v8065_v4 = vld [vmem:[%s11187_s1 + $0x9ac] ss:$16 sps:$4 sm:$0xff]   ;;  %v8069_v28 = vld [vmem:[%s11187_s1 + $0x988] ss:$16 sps:$4 sm:$0xff]  }
 0x209   :  { %v5352_v47 = vpop.f32.mrf.mxu1  ;;  %5645 = vmatprep.subr.bf16.mxu1 %v8020_v45  ;;  %v8068_v23 = vld [vmem:[%s11187_s1 + $0xa2c] ss:$16 sps:$4 sm:$0xff]   ;;  %v8072_v29 = vld [vmem:[%s11187_s1 + $0xa08] ss:$16 sps:$4 sm:$0xff]  }
 0x20a   :  { %v8071_v21 = vld [vmem:[%s11187_s1 + $0x98c] ss:$16 sps:$4 sm:$0xff]   ;;  %v8075_v34 = vld [vmem:[%s11187_s1 + $0x968] ss:$16 sps:$4 sm:$0xff]  }
 0x20b   :  { %5629 = vmatpush2.bf16.msra.mxu0 %v8015_v32  ;;  %v8074_v0 = vld [vmem:[%s11187_s1 + $0xa0c] ss:$16 sps:$4 sm:$0xff]   ;;  %v8078_v36 = vld [vmem:[%s11187_s1 + $0xbe8] ss:$16 sps:$4 sm:$0xff]  }
 0x20c   :  { %5646 = vmatpush1.bf16.msra.mxu1 %v8018_v40  ;;  %5630 = vmatprep.subr.bf16.mxu0 %v8023_v41  ;;  %v8077_v26 = vld [vmem:[%s11187_s1 + $0x96c] ss:$16 sps:$4 sm:$0xff]   ;;  %v8081_v40 = vld [vmem:[%s11187_s1 + $0x948] ss:$16 sps:$4 sm:$0xff]  }
 0x20d   :  { %5647 = vmatprep.subr.bf16.mxu1 %v8026_v53  ;;  %v8080_v45 = vld [vmem:[%s11187_s1 + $0xbec] ss:$16 sps:$4 sm:$0xff]   ;;  %v8084_v44 = vld [vmem:[%s11187_s1 + $0xbc8] ss:$16 sps:$4 sm:$0xff]  }
 0x20e   :  { %v8083_v37 = vld [vmem:[%s11187_s1 + $0x94c] ss:$16 sps:$4 sm:$0xff]   ;;  %v8087_v53 = vld [vmem:[%s11187_s1 + $0x928] ss:$16 sps:$4 sm:$0xff]  }
 0x20f   :  { %5631 = vmatpush2.bf16.msra.mxu0 %v8021_v48  ;;  %v8086_v32 = vld [vmem:[%s11187_s1 + $0xbcc] ss:$16 sps:$4 sm:$0xff]   ;;  %v8090_v48 = vld [vmem:[%s11187_s1 + $0xba8] ss:$16 sps:$4 sm:$0xff]  }
 0x210   :  { %5648 = vmatpush1.bf16.msra.mxu1 %v8024_v13  ;;  %5682 = vmatprep.subr.bf16.mxu0 %v8032_v51  ;;  %v8089_v47 = vld [vmem:[%s11187_s1 + $0x92c] ss:$16 sps:$4 sm:$0xff]   ;;  %v8093_v51 = vld [vmem:[%s11187_s1 + $0x908] ss:$16 sps:$4 sm:$0xff]  }
 0x211   :  { %5649 = vmatprep.subr.bf16.mxu1 %v8029_v46  ;;  %v8092_v41 = vld [vmem:[%s11187_s1 + $0xbac] ss:$16 sps:$4 sm:$0xff]  }
 0x212   :  { %5633 = vmatmul.mubr.bf16.vlgmr.msra.gmra.mxu0 %v8913_v6  ;;  %v8044_v6 = vld [vmem:[%s11187_s1 + $0xaac] ss:$16 sps:$4 sm:$0xff]  }
 0x213   :  { %5683 = vmatpush1.bf16.msra.mxu0 %v8030_v55  ;;  %5714 = vmatprep.mubr.bf16.mxu0 %v8958_v43  ;;  %v8050_v43 = vld [vmem:[%s11187_s1 + $0xa8c] ss:$16 sps:$4 sm:$0xff]  }
 0x214   :  { %5650 = vmatpush1.bf16.msra.mxu1 %v8027_v56  ;;  %5684 = vmatprep.subr.bf16.mxu0 %v8038_v61  ;;  %v8095_v13 = vld [vmem:[%s11187_s1 + $0x90c] ss:$16 sps:$4 sm:$0xff]   ;;  %v8096_v56 = vld [vmem:[%s11187_s1 + $0xb88] ss:$16 sps:$4 sm:$0xff]  }
 0x215   :  { %5651 = vmatprep.subr.bf16.mxu1 %v8035_v58  ;;  %v8098_v46 = vld [vmem:[%s11187_s1 + $0xb8c] ss:$16 sps:$4 sm:$0xff]   ;;  %v8099_v61 = vld [vmem:[%s11187_s1 + $0xb68] ss:$16 sps:$4 sm:$0xff]  }
 0x216   :  { %v8101_v55 = vld [vmem:[%s11187_s1 + $0xb6c] ss:$16 sps:$4 sm:$0xff]  }
 0x217   :  { %5685 = vmatpush1.bf16.msra.mxu0 %v8036_v62  ;;  %v8104_v58 = vld [vmem:[%s11187_s1 + $0xcec] ss:$16 sps:$4 sm:$0xff]  }
 0x218   :  { %5652 = vmatpush1.bf16.msra.mxu1 %v8033_v57  ;;  %5686 = vmatprep.subr.bf16.mxu0 %v8044_v6  ;;  %v8102_v57 = vld [vmem:[%s11187_s1 + $0xce8] ss:$16 sps:$4 sm:$0xff]   ;;  %v8107_v62 = vld [vmem:[%s11187_s1 + $0xb4c] ss:$16 sps:$4 sm:$0xff]  }
 0x219   :  { %5653 = vmatprep.subr.bf16.mxu1 %v8041_v17  ;;  %v8110_v17 = vld [vmem:[%s11187_s1 + $0xccc] ss:$16 sps:$4 sm:$0xff]  }
 0x21b   :  { %5687 = vmatpush1.bf16.msra.mxu0 %v8042_v63 }
 0x21c   :  { %5654 = vmatpush1.bf16.msra.mxu1 %v8039_v60  ;;  %5688 = vmatprep.subr.bf16.mxu0 %v8050_v43  ;;  %v8108_v43 = vld [vmem:[%s11187_s1 + $0xcc8] ss:$16 sps:$4 sm:$0xff]  }
 0x21d   :  { %5655 = vmatprep.subr.bf16.mxu1 %v8047_v2  ;;  %v8105_v2 = vld [vmem:[%s11187_s1 + $0xb48] ss:$16 sps:$4 sm:$0xff]  }
 0x21f   :  { %5689 = vmatpush1.bf16.msra.mxu0 %v8048_v1 }
 0x220   :  { %5656 = vmatpush1.bf16.msra.mxu1 %v8045_v3  ;;  %5690 = vmatprep.subr.bf16.mxu0 %v8056_v8 }
 0x221   :  { %5657 = vmatprep.subr.bf16.mxu1 %v8053_v7 }
 0x223   :  { %5691 = vmatpush1.bf16.msra.mxu0 %v8054_v11 }
 0x224   :  { %5658 = vmatpush2.bf16.msra.mxu1 %v8051_v10  ;;  %5692 = vmatprep.subr.bf16.mxu0 %v8062_v18  ;;  %v8111_v18 = vld [vmem:[%s11187_s1 + $0xb28] ss:$16 sps:$4 sm:$0xff]  }
 0x225   :  { %5659 = vmatprep.subr.bf16.mxu1 %v8059_v49 }
 0x227   :  { %5693 = vmatpush1.bf16.msra.mxu0 %v8060_v19 }
 0x228   :  { %5660 = vmatpush2.bf16.msra.mxu1 %v8057_v16  ;;  %5694 = vmatprep.subr.bf16.mxu0 %v8068_v23  ;;  %v8114_v16 = vld [vmem:[%s11187_s1 + $0xca8] ss:$16 sps:$4 sm:$0xff]  }
 0x229   :  { %5661 = vmatprep.subr.bf16.mxu1 %v8065_v4  ;;  %v8117_v23 = vld [vmem:[%s11187_s1 + $0xb08] ss:$16 sps:$4 sm:$0xff]  }
 0x22b   :  { %5695 = vmatpush1.bf16.msra.mxu0 %v8066_v20  ;;  %v8125_v20 = vld [vmem:[%s11187_s1 + $0xc6c] ss:$16 sps:$4 sm:$0xff]  }
 0x22c   :  { %5662 = vmatpush2.bf16.msra.mxu1 %v8063_v5  ;;  %5696 = vmatprep.subr.bf16.mxu0 %v8074_v0  ;;  %v8120_v5 = vld [vmem:[%s11187_s1 + $0xc88] ss:$16 sps:$4 sm:$0xff]  }
 0x22d   :  { %5663 = vmatprep.subr.bf16.mxu1 %v8071_v21  ;;  %v8128_v21 = vld [vmem:[%s11187_s1 + $0xeec] ss:$16 sps:$4 sm:$0xff]   ;;  %v8123_v0 = vld [vmem:[%s11187_s1 + $0xc68] ss:$16 sps:$4 sm:$0xff]  }
 0x22f   :  { %5697 = vmatpush1.bf16.msra.mxu0 %v8072_v29  ;;  %v8131_v29 = vld [vmem:[%s11187_s1 + $0xc4c] ss:$16 sps:$4 sm:$0xff]  }
 0x230   :  { %5664 = vmatpush2.bf16.msra.mxu1 %v8069_v28  ;;  %5698 = vmatprep.subr.bf16.mxu0 %v8080_v45  ;;  %v8126_v28 = vld [vmem:[%s11187_s1 + $0xee8] ss:$16 sps:$4 sm:$0xff]  }
 0x231   :  { %5665 = vmatprep.subr.bf16.mxu1 %v8077_v26  ;;  %v8134_v26 = vld [vmem:[%s11187_s1 + $0xecc] ss:$16 sps:$4 sm:$0xff]  }
 0x233   :  { %5699 = vmatpush2.bf16.msra.mxu0 %v8078_v36  ;;  %v8129_v36 = vld [vmem:[%s11187_s1 + $0xc48] ss:$16 sps:$4 sm:$0xff]  }
 0x234   :  { %5666 = vmatpush2.bf16.msra.mxu1 %v8075_v34  ;;  %5700 = vmatprep.subr.bf16.mxu0 %v8086_v32 }
 0x235   :  { %5667 = vmatprep.subr.bf16.mxu1 %v8083_v37  ;;  %v8132_v37 = vld [vmem:[%s11187_s1 + $0xec8] ss:$16 sps:$4 sm:$0xff]  }
 0x237   :  { %5701 = vmatpush2.bf16.msra.mxu0 %v8084_v44 }
 0x238   :  { %5668 = vmatpush2.bf16.msra.mxu1 %v8081_v40  ;;  %5702 = vmatprep.subr.bf16.mxu0 %v8092_v41  ;;  %v8137_v40 = vld [vmem:[%s11187_s1 + $0xc2c] ss:$16 sps:$4 sm:$0xff]   ;;  %v8135_v41 = vld [vmem:[%s11187_s1 + $0xc28] ss:$16 sps:$4 sm:$0xff]  }
 0x239   :  { %5669 = vmatprep.subr.bf16.mxu1 %v8089_v47 }
 0x23b   :  { %5703 = vmatpush2.bf16.msra.mxu0 %v8090_v48 }
 0x23c   :  { %5670 = vmatpush2.bf16.msra.mxu1 %v8087_v53  ;;  %5704 = vmatprep.subr.bf16.mxu0 %v8098_v46  ;;  %v8138_v53 = vld [vmem:[%s11187_s1 + $0xea8] ss:$16 sps:$4 sm:$0xff]  }
 0x23d   :  { %5671 = vmatprep.subr.bf16.mxu1 %v8095_v13  ;;  %v8143_v13 = vld [vmem:[%s11187_s1 + $0xc0c] ss:$16 sps:$4 sm:$0xff]   ;;  %v8141_v46 = vld [vmem:[%s11187_s1 + $0xc08] ss:$16 sps:$4 sm:$0xff]  }
 0x23f   :  { %5705 = vmatpush2.bf16.msra.mxu0 %v8096_v56  ;;  %v8149_v56 = vld [vmem:[%s11187_s1 + $0xdec] ss:$16 sps:$4 sm:$0xff]  }
 0x240   :  { %5672 = vmatpush2.bf16.msra.mxu1 %v8093_v51  ;;  %5706 = vmatprep.subr.bf16.mxu0 %v8101_v55  ;;  %v8144_v51 = vld [vmem:[%s11187_s1 + $0xe88] ss:$16 sps:$4 sm:$0xff]   ;;  %v8152_v55 = vld [vmem:[%s11187_s1 + $0xe6c] ss:$16 sps:$4 sm:$0xff]  }
 0x241   :  { %5723 = vmatprep.subr.bf16.mxu1 %v8104_v58  ;;  %v8147_v58 = vld [vmem:[%s11187_s1 + $0xde8] ss:$16 sps:$4 sm:$0xff]  }
 0x242   :  { %v5388_v6 = vpop.f32.mrf.mxu0 }
 0x243   :  { %v5429_v60 = vpop.f32.mrf.mxu1  ;;  %5674 = vmatmul.mubr.bf16.vlgmr.msra.gmra.mxu1 %v9129_v50  ;;  %v5389_v63 = vadd.f32 %v5388_v6, %v10249_v30  ;;  %5707 = vmatpush2.bf16.msra.mxu0 %v8099_v61  ;;  %v8113_v50 = vld [vmem:[%s11187_s1 + $0xb2c] ss:$16 sps:$4 sm:$0xff]   ;;  %v8150_v61 = vld [vmem:[%s11187_s1 + $0xe68] ss:$16 sps:$4 sm:$0xff]  }
 0x244   :  { %5724 = vmatpush1.bf16.msra.mxu1 %v8102_v57  ;;  %v5390_v3 = vpop.f32.mrf.mxu0  ;;  %5708 = vmatprep.subr.bf16.mxu0 %v8107_v62  ;;  %v8116_v30 = vld [vmem:[%s11187_s1 + $0xcac] ss:$16 sps:$4 sm:$0xff]   ;;  %v8156_v6 = vld [vmem:[%s11187_s1 + $0xe48] ss:$16 sps:$4 sm:$0xff]  }
 0x245   :  { %v5431_v1 = vpop.f32.mrf.mxu1  ;;  %5725 = vmatprep.subr.bf16.mxu1 %v8110_v17  ;;  %v5430_v7 = vadd.f32 %v5429_v60, %v5389_v63  ;;  %v5391_v8 = vadd.f32 %v5390_v3, %v10253_v38  ;;  %5755 = vmatprep.mubr.bf16.mxu1 %v9141_v54  ;;  %v8119_v54 = vld [vmem:[%s11187_s1 + $0xb0c] ss:$16 sps:$4 sm:$0xff]   ;;  %v8153_v17 = vld [vmem:[%s11187_s1 + $0xdc8] ss:$16 sps:$4 sm:$0xff]  }
 0x246   :  { %v5392_v10 = vpop.f32.mrf.mxu0  ;;  %v8122_v38 = vld [vmem:[%s11187_s1 + $0xc8c] ss:$16 sps:$4 sm:$0xff]  }
 0x247   :  { %v5433_v11 = vpop.f32.mrf.mxu1  ;;  %v5432_v49 = vadd.f32 %v5431_v1, %v5391_v8  ;;  %5709 = vmatpush2.bf16.msra.mxu0 %v8105_v2  ;;  %v8155_v57 = vld [vmem:[%s11187_s1 + $0xdcc] ss:$16 sps:$4 sm:$0xff]   ;;  %v8159_v2 = vld [vmem:[%s11187_s1 + $0xda8] ss:$16 sps:$4 sm:$0xff]  }
 0x248   :  { %5726 = vmatpush1.bf16.msra.mxu1 %v8108_v43  ;;  %v5393_v19 = vpop.f32.mrf.mxu0  ;;  %5710 = vmatprep.subr.bf16.mxu0 %v8113_v50  ;;  %v8158_v62 = vld [vmem:[%s11187_s1 + $0xe4c] ss:$16 sps:$4 sm:$0xff]   ;;  %v8162_v43 = vld [vmem:[%s11187_s1 + $0xe28] ss:$16 sps:$4 sm:$0xff]  }
 0x249   :  { %v5434_v4 = vpop.f32.mrf.mxu1  ;;  %5727 = vmatprep.subr.bf16.mxu1 %v8116_v30  ;;  %v8161_v60 = vld [vmem:[%s11187_s1 + $0xdac] ss:$16 sps:$4 sm:$0xff]   ;;  %v8165_v50 = vld [vmem:[%s11187_s1 + $0xd88] ss:$16 sps:$4 sm:$0xff]  }
 0x24a   :  { %v8164_v63 = vld [vmem:[%s11187_s1 + $0xe2c] ss:$16 sps:$4 sm:$0xff]   ;;  %v8168_v30 = vld [vmem:[%s11187_s1 + $0xe08] ss:$16 sps:$4 sm:$0xff]  }
 0x24b   :  { %5711 = vmatpush2.bf16.msra.mxu0 %v8111_v18  ;;  %v8167_v3 = vld [vmem:[%s11187_s1 + $0xd8c] ss:$16 sps:$4 sm:$0xff]   ;;  %v8171_v10 = vld [vmem:[%s11187_s1 + $0xd68] ss:$16 sps:$4 sm:$0xff]  }
 0x24c   :  { %5728 = vmatpush1.bf16.msra.mxu1 %v8114_v16  ;;  %5712 = vmatprep.subr.bf16.mxu0 %v8119_v54  ;;  %v8170_v1 = vld [vmem:[%s11187_s1 + $0xe0c] ss:$16 sps:$4 sm:$0xff]   ;;  %v8174_v11 = vld [vmem:[%s11187_s1 + $0xfe8] ss:$16 sps:$4 sm:$0xff]  }
 0x24d   :  { %5729 = vmatprep.subr.bf16.mxu1 %v8122_v38  ;;  %v8176_v8 = vld [vmem:[%s11187_s1 + $0xfec] ss:$16 sps:$4 sm:$0xff]   ;;  %v8177_v16 = vld [vmem:[%s11187_s1 + $0xd48] ss:$16 sps:$4 sm:$0xff]  }
 0x24e   :  { %v8182_v18 = vld [vmem:[%s11187_s1 + $0xfcc] ss:$16 sps:$4 sm:$0xff]   ;;  %v8180_v19 = vld [vmem:[%s11187_s1 + $0xfc8] ss:$16 sps:$4 sm:$0xff]  }
 0x24f   :  { %5713 = vmatpush2.bf16.msra.mxu0 %v8117_v23  ;;  %v8185_v4 = vld [vmem:[%s11187_s1 + $0xd2c] ss:$16 sps:$4 sm:$0xff]   ;;  %v8183_v38 = vld [vmem:[%s11187_s1 + $0xd28] ss:$16 sps:$4 sm:$0xff]  }
 0x250   :  { %5730 = vmatpush1.bf16.msra.mxu1 %v8120_v5  ;;  %5764 = vmatprep.subr.bf16.mxu0 %v8128_v21  ;;  %v8188_v54 = vld [vmem:[%s11187_s1 + $0xfac] ss:$16 sps:$4 sm:$0xff]   ;;  %v8186_v23 = vld [vmem:[%s11187_s1 + $0xfa8] ss:$16 sps:$4 sm:$0xff]  }
 0x251   :  { %5731 = vmatprep.subr.bf16.mxu1 %v8125_v20  ;;  %v8191_v5 = vld [vmem:[%s11187_s1 + $0xd0c] ss:$16 sps:$4 sm:$0xff]   ;;  %v8189_v21 = vld [vmem:[%s11187_s1 + $0xd08] ss:$16 sps:$4 sm:$0xff]  }
 0x252   :  { %v5470_v45 = vpop.f32.mrf.mxu0  ;;  %5715 = vmatmul.mubr.bf16.vlgmr.msra.gmra.mxu0 %v9145_v35  ;;  %v8140_v35 = vld [vmem:[%s11187_s1 + $0xeac] ss:$16 sps:$4 sm:$0xff]  }
 0x253   :  { %v10490_v34 = vadd.f32 %v5470_v45, %v5430_v7  ;;  %5765 = vmatpush1.bf16.msra.mxu0 %v8126_v28  ;;  %5796 = vmatprep.mubr.bf16.mxu0 %v9161_v59  ;;  %v8146_v59 = vld [vmem:[%s11187_s1 + $0xe8c] ss:$16 sps:$4 sm:$0xff]   ;;  %v8198_v45 = vld [vmem:[%s11187_s1 + $0x10e8] ss:$16 sps:$4 sm:$0xff]  }
 0x254   :  { %5732 = vmatpush1.bf16.msra.mxu1 %v8123_v0  ;;  %v5472_v32 = vpop.f32.mrf.mxu0  ;;  %5766 = vmatprep.subr.bf16.mxu0 %v8134_v26  ;;  %v8173_v7 = vld [vmem:[%s11187_s1 + $0xd6c] ss:$16 sps:$4 sm:$0xff]   ;;  %v8192_v0 = vld [vmem:[%s11187_s1 + $0xf88] ss:$16 sps:$4 sm:$0xff]  }
 0x255   :  { %5733 = vmatprep.subr.bf16.mxu1 %v8131_v29  ;;  %v10504_v44 = vadd.f32 %v5472_v32, %v5432_v49  ;;  %v8179_v49 = vld [vmem:[%s11187_s1 + $0xd4c] ss:$16 sps:$4 sm:$0xff]   ;;  %v8195_v26 = vld [vmem:[%s11187_s1 + $0xf68] ss:$16 sps:$4 sm:$0xff]  }
 0x256   :  { %v5474_v47 = vpop.f32.mrf.mxu0  ;;  %v8194_v20 = vld [vmem:[%s11187_s1 + $0xf8c] ss:$16 sps:$4 sm:$0xff]  }
 0x257   :  { %5767 = vmatpush1.bf16.msra.mxu0 %v8132_v37  ;;  %v8197_v28 = vld [vmem:[%s11187_s1 + $0xf6c] ss:$16 sps:$4 sm:$0xff]  }
 0x258   :  { %5734 = vmatpush1.bf16.msra.mxu1 %v8129_v36  ;;  %v5475_v48 = vpop.f32.mrf.mxu0  ;;  %5768 = vmatprep.subr.bf16.mxu0 %v8140_v35  ;;  %v8200_v29 = vld [vmem:[%s11187_s1 + $0x10ec] ss:$16 sps:$4 sm:$0xff]   ;;  %v8204_v35 = vld [vmem:[%s11187_s1 + $0x10c8] ss:$16 sps:$4 sm:$0xff]  }
 0x259   :  { %5735 = vmatprep.subr.bf16.mxu1 %v8137_v40  ;;  %v8203_v36 = vld [vmem:[%s11187_s1 + $0xf4c] ss:$16 sps:$4 sm:$0xff]   ;;  %v8201_v40 = vld [vmem:[%s11187_s1 + $0xf48] ss:$16 sps:$4 sm:$0xff]  }
 0x25a   :  { %v8206_v37 = vld [vmem:[%s11187_s1 + $0x10cc] ss:$16 sps:$4 sm:$0xff]   ;;  %v8207_v48 = vld [vmem:[%s11187_s1 + $0xf28] ss:$16 sps:$4 sm:$0xff]  }
 0x25b   :  { %5769 = vmatpush1.bf16.msra.mxu0 %v8138_v53 }
 0x25c   :  { %5736 = vmatpush1.bf16.msra.mxu1 %v8135_v41  ;;  %5770 = vmatprep.subr.bf16.mxu0 %v8146_v59  ;;  %v8209_v41 = vld [vmem:[%s11187_s1 + $0xf2c] ss:$16 sps:$4 sm:$0xff]  }
 0x25d   :  { %5737 = vmatprep.subr.bf16.mxu1 %v8143_v13  ;;  %v8210_v13 = vld [vmem:[%s11187_s1 + $0x10a8] ss:$16 sps:$4 sm:$0xff]  }
 0x25f   :  { %5771 = vmatpush1.bf16.msra.mxu0 %v8144_v51  ;;  %v821_v51 = vsub.s32 2, %v8593_v42 }
 0x260   :  { %5738 = vmatpush1.bf16.msra.mxu1 %v8141_v46  ;;  %5772 = vmatprep.subr.bf16.mxu0 %v8152_v55  ;;  %v8215_v46 = vld [vmem:[%s11187_s1 + $0xf0c] ss:$16 sps:$4 sm:$0xff]   ;;  %v8213_v55 = vld [vmem:[%s11187_s1 + $0xf08] ss:$16 sps:$4 sm:$0xff]  }
 0x261   :  { %5739 = vmatprep.subr.bf16.mxu1 %v8149_v56  ;;  %v825_v56 = vsub.s32 3, %v8593_v42  ;;  %v8224_v42 = vld [vmem:[%s11187_s1 + $0x12ec] ss:$16 sps:$4 sm:$0xff]  }
 0x263   :  { %5773 = vmatpush1.bf16.msra.mxu0 %v8150_v61  ;;  %v8221_v61 = vld [vmem:[%s11187_s1 + $0x106c] ss:$16 sps:$4 sm:$0xff]  }
 0x264   :  { %5740 = vmatpush2.bf16.msra.mxu1 %v8147_v58  ;;  %5774 = vmatprep.subr.bf16.mxu0 %v8158_v62  ;;  %v8216_v58 = vld [vmem:[%s11187_s1 + $0x1088] ss:$16 sps:$4 sm:$0xff]  }
 0x265   :  { %5741 = vmatprep.subr.bf16.mxu1 %v8155_v57  ;;  %v8443_v57 = vld [vmem:[%s11189_s2] sm:$0xf] }
 0x266   :  { %v822_v62 = vrot.slane %v8443_v57, %v821_v51  ;;  %v8276_v51 = vld [vmem:[%s11187_s1 + $0x13c8] ss:$16 sps:$4 sm:$0xff]  }
 0x267   :  { %5775 = vmatpush1.bf16.msra.mxu0 %v8156_v6  ;;  %v8219_v6 = vld [vmem:[%s11187_s1 + $0x1068] ss:$16 sps:$4 sm:$0xff]  }
 0x268   :  { %5742 = vmatpush2.bf16.msra.mxu1 %v8153_v17  ;;  %5776 = vmatprep.subr.bf16.mxu0 %v8164_v63  ;;  %v826_v17 = vrot.slane %v8443_v57, %v825_v56  ;;  %v8227_v63 = vld [vmem:[%s11187_s1 + $0x104c] ss:$16 sps:$4 sm:$0xff]  }
 0x269   :  { %5743 = vmatprep.subr.bf16.mxu1 %v8161_v60  ;;  %v8222_v60 = vld [vmem:[%s11187_s1 + $0x12e8] ss:$16 sps:$4 sm:$0xff]   ;;  %v8281_v56 = vld [vmem:[%s11187_s1 + $0x112c] ss:$16 sps:$4 sm:$0xff]  }
 0x26a   :  { %v8290_v57 = vld [vmem:[%s11187_s1 + $0x138c] ss:$16 sps:$4 sm:$0xff]  }
 0x26b   :  { %5777 = vmatpush1.bf16.msra.mxu0 %v8162_v43 }
 0x26c   :  { %5744 = vmatpush2.bf16.msra.mxu1 %v8159_v2  ;;  %5778 = vmatprep.subr.bf16.mxu0 %v8170_v1  ;;  %v8230_v2 = vld [vmem:[%s11187_s1 + $0x12cc] ss:$16 sps:$4 sm:$0xff]   ;;  %v8228_v1 = vld [vmem:[%s11187_s1 + $0x12c8] ss:$16 sps:$4 sm:$0xff]  }
 0x26d   :  { %5745 = vmatprep.subr.bf16.mxu1 %v8167_v3  ;;  %v8225_v3 = vld [vmem:[%s11187_s1 + $0x1048] ss:$16 sps:$4 sm:$0xff]  }
 0x26f   :  { %5779 = vmatpush1.bf16.msra.mxu0 %v8168_v30  ;;  %v8233_v30 = vld [vmem:[%s11187_s1 + $0x102c] ss:$16 sps:$4 sm:$0xff]  }
 0x270   :  { %5746 = vmatpush2.bf16.msra.mxu1 %v8165_v50  ;;  %5780 = vmatprep.subr.bf16.mxu0 %v8176_v8 }
 0x271   :  { %5747 = vmatprep.subr.bf16.mxu1 %v8173_v7 }
 0x273   :  { %5781 = vmatpush2.bf16.msra.mxu0 %v8174_v11  ;;  %v8236_v11 = vld [vmem:[%s11187_s1 + $0x12ac] ss:$16 sps:$4 sm:$0xff]  }
 0x274   :  { %5748 = vmatpush2.bf16.msra.mxu1 %v8171_v10  ;;  %5782 = vmatprep.subr.bf16.mxu0 %v8182_v18  ;;  %v8234_v18 = vld [vmem:[%s11187_s1 + $0x12a8] ss:$16 sps:$4 sm:$0xff]  }
 0x275   :  { %5749 = vmatprep.subr.bf16.mxu1 %v8179_v49 }
 0x277   :  { %5783 = vmatpush2.bf16.msra.mxu0 %v8180_v19 }
 0x278   :  { %5750 = vmatpush2.bf16.msra.mxu1 %v8177_v16  ;;  %5784 = vmatprep.subr.bf16.mxu0 %v8188_v54  ;;  %v8242_v54 = vld [vmem:[%s11187_s1 + $0x128c] ss:$16 sps:$4 sm:$0xff]  }
 0x279   :  { %5751 = vmatprep.subr.bf16.mxu1 %v8185_v4  ;;  %v8239_v4 = vld [vmem:[%s11187_s1 + $0x100c] ss:$16 sps:$4 sm:$0xff]  }
 0x27b   :  { %5785 = vmatpush2.bf16.msra.mxu0 %v8186_v23  ;;  %v8245_v23 = vld [vmem:[%s11187_s1 + $0x11ec] ss:$16 sps:$4 sm:$0xff]  }
 0x27c   :  { %5752 = vmatpush2.bf16.msra.mxu1 %v8183_v38  ;;  %5786 = vmatprep.subr.bf16.mxu0 %v8194_v20  ;;  %v8237_v38 = vld [vmem:[%s11187_s1 + $0x1008] ss:$16 sps:$4 sm:$0xff]  }
 0x27d   :  { %5753 = vmatprep.subr.bf16.mxu1 %v8191_v5  ;;  %v8248_v5 = vld [vmem:[%s11187_s1 + $0x126c] ss:$16 sps:$4 sm:$0xff]   ;;  %v8243_v20 = vld [vmem:[%s11187_s1 + $0x11e8] ss:$16 sps:$4 sm:$0xff]  }
 0x27f   :  { %5787 = vmatpush2.bf16.msra.mxu0 %v8192_v0  ;;  %v8251_v0 = vld [vmem:[%s11187_s1 + $0x11cc] ss:$16 sps:$4 sm:$0xff]  }
 0x280   :  { %5754 = vmatpush2.bf16.msra.mxu1 %v8189_v21  ;;  %5788 = vmatprep.subr.bf16.mxu0 %v8197_v28  ;;  %v8246_v21 = vld [vmem:[%s11187_s1 + $0x1268] ss:$16 sps:$4 sm:$0xff]   ;;  %v8254_v28 = vld [vmem:[%s11187_s1 + $0x124c] ss:$16 sps:$4 sm:$0xff]  }
 0x281   :  { %5805 = vmatprep.subr.bf16.mxu1 %v8200_v29  ;;  %v8249_v29 = vld [vmem:[%s11187_s1 + $0x11c8] ss:$16 sps:$4 sm:$0xff]  }
 0x283   :  { %v5511_v32 = vpop.f32.mrf.mxu1  ;;  %5756 = vmatmul.mubr.bf16.vlgmr.msra.gmra.mxu1 %v9357_v15  ;;  %5789 = vmatpush2.bf16.msra.mxu0 %v8195_v26  ;;  %v8212_v15 = vld [vmem:[%s11187_s1 + $0x10ac] ss:$16 sps:$4 sm:$0xff]   ;;  %v8252_v26 = vld [vmem:[%s11187_s1 + $0x1248] ss:$16 sps:$4 sm:$0xff]  }
 0x284   :  { %5806 = vmatpush1.bf16.msra.mxu1 %v8198_v45  ;;  %5790 = vmatprep.subr.bf16.mxu0 %v8203_v36  ;;  %v5512_v43 = vadd.f32 %v5511_v32, %v822_v62  ;;  %v8257_v45 = vld [vmem:[%s11187_s1 + $0x11ac] ss:$16 sps:$4 sm:$0xff]   ;;  %v8258_v32 = vld [vmem:[%s11187_s1 + $0x1228] ss:$16 sps:$4 sm:$0xff]  }
 0x285   :  { %v5513_v47 = vpop.f32.mrf.mxu1  ;;  %5807 = vmatprep.subr.bf16.mxu1 %v8206_v37  ;;  %5837 = vmatprep.mubr.bf16.mxu1 %v9368_v22  ;;  %v8218_v22 = vld [vmem:[%s11187_s1 + $0x108c] ss:$16 sps:$4 sm:$0xff]   ;;  %v8255_v37 = vld [vmem:[%s11187_s1 + $0x11a8] ss:$16 sps:$4 sm:$0xff]  }
 0x286   :  { %v5514_v7 = vadd.f32 %v5513_v47, %v826_v17  ;;  %v8260_v36 = vld [vmem:[%s11187_s1 + $0x122c] ss:$16 sps:$4 sm:$0xff]   ;;  %v8261_v47 = vld [vmem:[%s11187_s1 + $0x1188] ss:$16 sps:$4 sm:$0xff]  }
 0x287   :  { %v5515_v53 = vpop.f32.mrf.mxu1  ;;  %5791 = vmatpush2.bf16.msra.mxu0 %v8201_v40  ;;  %v8263_v40 = vld [vmem:[%s11187_s1 + $0x118c] ss:$16 sps:$4 sm:$0xff]   ;;  %v8285_v62 = vld [vmem:[%s11187_s1 + $0x1108] ss:$16 sps:$4 sm:$0xff]  }
 0x288   :  { %5808 = vmatpush1.bf16.msra.mxu1 %v8204_v35  ;;  %5792 = vmatprep.subr.bf16.mxu0 %v8209_v41  ;;  %v8266_v35 = vld [vmem:[%s11187_s1 + $0x120c] ss:$16 sps:$4 sm:$0xff]   ;;  %v8264_v41 = vld [vmem:[%s11187_s1 + $0x1208] ss:$16 sps:$4 sm:$0xff]  }
 0x289   :  { %v5516_v59 = vpop.f32.mrf.mxu1  ;;  %5809 = vmatprep.subr.bf16.mxu1 %v8212_v15  ;;  %v8269_v15 = vld [vmem:[%s11187_s1 + $0x116c] ss:$16 sps:$4 sm:$0xff]   ;;  %v8288_v17 = vld [vmem:[%s11187_s1 + $0x1388] ss:$16 sps:$4 sm:$0xff]  }
 0x28a   :  { %v8272_v53 = vld [vmem:[%s11187_s1 + $0x13ec] ss:$16 sps:$4 sm:$0xff]  }
 0x28b   :  { %5793 = vmatpush2.bf16.msra.mxu0 %v8207_v48  ;;  %v8267_v48 = vld [vmem:[%s11187_s1 + $0x1168] ss:$16 sps:$4 sm:$0xff]   ;;  %v8275_v59 = vld [vmem:[%s11187_s1 + $0x114c] ss:$16 sps:$4 sm:$0xff]  }
 0x28c   :  { %5810 = vmatpush1.bf16.msra.mxu1 %v8210_v13  ;;  %5794 = vmatprep.subr.bf16.mxu0 %v8215_v46  ;;  %v8270_v13 = vld [vmem:[%s11187_s1 + $0x13e8] ss:$16 sps:$4 sm:$0xff]   ;;  %v8278_v46 = vld [vmem:[%s11187_s1 + $0x13cc] ss:$16 sps:$4 sm:$0xff]  }
 0x28d   :  { %5811 = vmatprep.subr.bf16.mxu1 %v8218_v22  ;;  %v8273_v22 = vld [vmem:[%s11187_s1 + $0x1148] ss:$16 sps:$4 sm:$0xff]  }
 0x28f   :  { %5795 = vmatpush2.bf16.msra.mxu0 %v8213_v55  ;;  %v8284_v55 = vld [vmem:[%s11187_s1 + $0x13ac] ss:$16 sps:$4 sm:$0xff]  }
 0x290   :  { %5812 = vmatpush1.bf16.msra.mxu1 %v8216_v58  ;;  %5846 = vmatprep.subr.bf16.mxu0 %v8224_v42  ;;  %v8279_v58 = vld [vmem:[%s11187_s1 + $0x1128] ss:$16 sps:$4 sm:$0xff]   ;;  %v8287_v42 = vld [vmem:[%s11187_s1 + $0x110c] ss:$16 sps:$4 sm:$0xff]  }
 0x291   :  { %5813 = vmatprep.subr.bf16.mxu1 %v8221_v61  ;;  %v8282_v61 = vld [vmem:[%s11187_s1 + $0x13a8] ss:$16 sps:$4 sm:$0xff]  }
 0x292   :  { %v5552_v50 = vpop.f32.mrf.mxu0  ;;  %5797 = vmatmul.mubr.bf16.vlgmr.msra.gmra.mxu0 %v9372_v39  ;;  %v8231_v39 = vld [vmem:[%s11187_s1 + $0x1028] ss:$16 sps:$4 sm:$0xff]  }
 0x293   :  { %v10704_v8 = vadd.f32 %v5552_v50, %v5512_v43  ;;  %5847 = vmatpush1.bf16.msra.mxu0 %v8222_v60  ;;  %5878 = vmatprep.mubr.bf16.mxu0 %v9388_v31  ;;  %v8240_v31 = vld [vmem:[%s11187_s1 + $0x1288] ss:$16 sps:$4 sm:$0xff]   ;;  %v8296_v60 = vld [vmem:[%s11187_s1 + $0x14ec] ss:$16 sps:$4 sm:$0xff]  }
 0x294   :  { %5814 = vmatpush1.bf16.msra.mxu1 %v8219_v6  ;;  %v5554_v10 = vpop.f32.mrf.mxu0  ;;  %5848 = vmatprep.subr.bf16.mxu0 %v8230_v2  ;;  %v8293_v6 = vld [vmem:[%s11187_s1 + $0x136c] ss:$16 sps:$4 sm:$0xff]   ;;  %v8294_v2 = vld [vmem:[%s11187_s1 + $0x14e8] ss:$16 sps:$4 sm:$0xff]  }
 0x295   :  { %5815 = vmatprep.subr.bf16.mxu1 %v8227_v63  ;;  %v10709_v49 = vadd.f32 %v5554_v10, %v5514_v7  ;;  %v8291_v63 = vld [vmem:[%s11187_s1 + $0x1368] ss:$16 sps:$4 sm:$0xff]   ;;  %v8299_v43 = vld [vmem:[%s11187_s1 + $0x134c] ss:$16 sps:$4 sm:$0xff]  }
 0x296   :  { %v5556_v16 = vpop.f32.mrf.mxu0  ;;  %v8300_v7 = vld [vmem:[%s11187_s1 + $0x14c8] ss:$16 sps:$4 sm:$0xff]  }
 0x297   :  { %5849 = vmatpush1.bf16.msra.mxu0 %v8228_v1  ;;  %v8306_v16 = vld [vmem:[%s11187_s1 + $0x14a8] ss:$16 sps:$4 sm:$0xff]  }
 0x298   :  { %5816 = vmatpush1.bf16.msra.mxu1 %v8225_v3  ;;  %v5557_v19 = vpop.f32.mrf.mxu0  ;;  %5850 = vmatprep.subr.bf16.mxu0 %v8236_v11  ;;  %v8302_v3 = vld [vmem:[%s11187_s1 + $0x14cc] ss:$16 sps:$4 sm:$0xff]  }
 0x299   :  { %5817 = vmatprep.subr.bf16.mxu1 %v8233_v30  ;;  %v8297_v30 = vld [vmem:[%s11187_s1 + $0x1348] ss:$16 sps:$4 sm:$0xff]   ;;  %v8305_v11 = vld [vmem:[%s11187_s1 + $0x132c] ss:$16 sps:$4 sm:$0xff]  }
 0x29b   :  { %5851 = vmatpush1.bf16.msra.mxu0 %v8234_v18  ;;  %v8303_v18 = vld [vmem:[%s11187_s1 + $0x1328] ss:$16 sps:$4 sm:$0xff]  }
 0x29c   :  { %5818 = vmatpush1.bf16.msra.mxu1 %v8231_v39  ;;  %5852 = vmatprep.subr.bf16.mxu0 %v8242_v54  ;;  %v8312_v54 = vld [vmem:[%s11187_s1 + $0x1488] ss:$16 sps:$4 sm:$0xff]  }
 0x29d   :  { %5819 = vmatprep.subr.bf16.mxu1 %v8239_v4  ;;  %v8309_v4 = vld [vmem:[%s11187_s1 + $0x1308] ss:$16 sps:$4 sm:$0xff]  }
 0x29f   :  { %5853 = vmatpush1.bf16.msra.mxu0 %v8240_v31  ;;  %v8320_v31 = vld [vmem:[%s11187_s1 + $0x16ec] ss:$16 sps:$4 sm:$0xff]  }
 0x2a0   :  { %5820 = vmatpush1.bf16.msra.mxu1 %v8237_v38  ;;  %5854 = vmatprep.subr.bf16.mxu0 %v8248_v5  ;;  %v8317_v38 = vld [vmem:[%s11187_s1 + $0x146c] ss:$16 sps:$4 sm:$0xff]   ;;  %v8318_v5 = vld [vmem:[%s11187_s1 + $0x16e8] ss:$16 sps:$4 sm:$0xff]  }
 0x2a1   :  { %5821 = vmatprep.subr.bf16.mxu1 %v8245_v23  ;;  %v8315_v23 = vld [vmem:[%s11187_s1 + $0x1468] ss:$16 sps:$4 sm:$0xff]  }
 0x2a3   :  { %5855 = vmatpush1.bf16.msra.mxu0 %v8246_v21  ;;  %v8326_v21 = vld [vmem:[%s11187_s1 + $0x16cc] ss:$16 sps:$4 sm:$0xff]  }
 0x2a4   :  { %5822 = vmatpush2.bf16.msra.mxu1 %v8243_v20  ;;  %5856 = vmatprep.subr.bf16.mxu0 %v8254_v28  ;;  %v8323_v20 = vld [vmem:[%s11187_s1 + $0x144c] ss:$16 sps:$4 sm:$0xff]  }
 0x2a5   :  { %5823 = vmatprep.subr.bf16.mxu1 %v8251_v0 }
 0x2a7   :  { %5857 = vmatpush1.bf16.msra.mxu0 %v8252_v26  ;;  %v8324_v26 = vld [vmem:[%s11187_s1 + $0x16c8] ss:$16 sps:$4 sm:$0xff]  }
 0x2a8   :  { %5824 = vmatpush2.bf16.msra.mxu1 %v8249_v29  ;;  %5858 = vmatprep.subr.bf16.mxu0 %v8260_v36  ;;  %v8321_v29 = vld [vmem:[%s11187_s1 + $0x1448] ss:$16 sps:$4 sm:$0xff]   ;;  %v8329_v36 = vld [vmem:[%s11187_s1 + $0x142c] ss:$16 sps:$4 sm:$0xff]  }
 0x2a9   :  { %5825 = vmatprep.subr.bf16.mxu1 %v8257_v45 }
 0x2ab   :  { %5859 = vmatpush1.bf16.msra.mxu0 %v8258_v32 }
 0x2ac   :  { %5826 = vmatpush2.bf16.msra.mxu1 %v8255_v37  ;;  %5860 = vmatprep.subr.bf16.mxu0 %v8266_v35  ;;  %v8330_v35 = vld [vmem:[%s11187_s1 + $0x16a8] ss:$16 sps:$4 sm:$0xff]  }
 0x2ad   :  { %5827 = vmatprep.subr.bf16.mxu1 %v8263_v40  ;;  %v8327_v40 = vld [vmem:[%s11187_s1 + $0x1428] ss:$16 sps:$4 sm:$0xff]  }
 0x2af   :  { %5861 = vmatpush1.bf16.msra.mxu0 %v8264_v41  ;;  %v8335_v41 = vld [vmem:[%s11187_s1 + $0x140c] ss:$16 sps:$4 sm:$0xff]  }
 0x2b0   :  { %5828 = vmatpush2.bf16.msra.mxu1 %v8261_v47  ;;  %5862 = vmatprep.subr.bf16.mxu0 %v8272_v53  ;;  %v8336_v53 = vld [vmem:[%s11187_s1 + $0x1688] ss:$16 sps:$4 sm:$0xff]  }
 0x2b1   :  { %5829 = vmatprep.subr.bf16.mxu1 %v8269_v15  ;;  %v8333_v15 = vld [vmem:[%s11187_s1 + $0x1408] ss:$16 sps:$4 sm:$0xff]  }
 0x2b3   :  { %5863 = vmatpush2.bf16.msra.mxu0 %v8270_v13  ;;  %v8344_v13 = vld [vmem:[%s11187_s1 + $0x166c] ss:$16 sps:$4 sm:$0xff]  }
 0x2b4   :  { %5830 = vmatpush2.bf16.msra.mxu1 %v8267_v48  ;;  %5864 = vmatprep.subr.bf16.mxu0 %v8278_v46  ;;  %v8341_v48 = vld [vmem:[%s11187_s1 + $0x15ec] ss:$16 sps:$4 sm:$0xff]   ;;  %v8342_v46 = vld [vmem:[%s11187_s1 + $0x1668] ss:$16 sps:$4 sm:$0xff]  }
 0x2b5   :  { %5831 = vmatprep.subr.bf16.mxu1 %v8275_v59  ;;  %v8339_v59 = vld [vmem:[%s11187_s1 + $0x15e8] ss:$16 sps:$4 sm:$0xff]  }
 0x2b7   :  { %5865 = vmatpush2.bf16.msra.mxu0 %v8276_v51  ;;  %v8350_v51 = vld [vmem:[%s11187_s1 + $0x164c] ss:$16 sps:$4 sm:$0xff]  }
 0x2b8   :  { %5832 = vmatpush2.bf16.msra.mxu1 %v8273_v22  ;;  %5866 = vmatprep.subr.bf16.mxu0 %v8284_v55  ;;  %v8347_v22 = vld [vmem:[%s11187_s1 + $0x15cc] ss:$16 sps:$4 sm:$0xff]   ;;  %v8348_v55 = vld [vmem:[%s11187_s1 + $0x1648] ss:$16 sps:$4 sm:$0xff]  }
 0x2b9   :  { %5833 = vmatprep.subr.bf16.mxu1 %v8281_v56  ;;  %v8345_v56 = vld [vmem:[%s11187_s1 + $0x15c8] ss:$16 sps:$4 sm:$0xff]  }
 0x2bb   :  { %5867 = vmatpush2.bf16.msra.mxu0 %v8282_v61  ;;  %v8356_v61 = vld [vmem:[%s11187_s1 + $0x162c] ss:$16 sps:$4 sm:$0xff]  }
 0x2bc   :  { %5834 = vmatpush2.bf16.msra.mxu1 %v8279_v58  ;;  %5868 = vmatprep.subr.bf16.mxu0 %v8290_v57  ;;  %v8353_v58 = vld [vmem:[%s11187_s1 + $0x15ac] ss:$16 sps:$4 sm:$0xff]   ;;  %v8354_v57 = vld [vmem:[%s11187_s1 + $0x1628] ss:$16 sps:$4 sm:$0xff]  }
 0x2bd   :  { %5835 = vmatprep.subr.bf16.mxu1 %v8287_v42  ;;  %v8351_v42 = vld [vmem:[%s11187_s1 + $0x15a8] ss:$16 sps:$4 sm:$0xff]  }
 0x2bf   :  { %5869 = vmatpush2.bf16.msra.mxu0 %v8288_v17  ;;  %v8362_v17 = vld [vmem:[%s11187_s1 + $0x160c] ss:$16 sps:$4 sm:$0xff]  }
 0x2c0   :  { %5836 = vmatpush2.bf16.msra.mxu1 %v8285_v62  ;;  %5870 = vmatprep.subr.bf16.mxu0 %v8293_v6  ;;  %v8359_v62 = vld [vmem:[%s11187_s1 + $0x158c] ss:$16 sps:$4 sm:$0xff]   ;;  %v8357_v6 = vld [vmem:[%s11187_s1 + $0x1588] ss:$16 sps:$4 sm:$0xff]  }
 0x2c1   :  { %5887 = vmatprep.subr.bf16.mxu1 %v8296_v60  ;;  %v8360_v60 = vld [vmem:[%s11187_s1 + $0x1608] ss:$16 sps:$4 sm:$0xff]  }
 0x2c3   :  { %v5593_v1 = vpop.f32.mrf.mxu1  ;;  %5838 = vmatmul.mubr.bf16.vlgmr.msra.gmra.mxu1 %v9575_v12  ;;  %5871 = vmatpush2.bf16.msra.mxu0 %v8291_v63  ;;  %v8308_v12 = vld [vmem:[%s11187_s1 + $0x14ac] ss:$16 sps:$4 sm:$0xff]  }
 0x2c4   :  { %v5594_v50 = vadd.f32 %v5593_v1, %v10704_v8  ;;  %5888 = vmatpush1.bf16.msra.mxu1 %v8294_v2  ;;  %5872 = vmatprep.subr.bf16.mxu0 %v8299_v43  ;;  %v8365_v63 = vld [vmem:[%s11187_s1 + $0x156c] ss:$16 sps:$4 sm:$0xff]   ;;  %v8363_v43 = vld [vmem:[%s11187_s1 + $0x1568] ss:$16 sps:$4 sm:$0xff]  }
 0x2c5   :  { %v5595_v10 = vpop.f32.mrf.mxu1  ;;  %5889 = vmatprep.subr.bf16.mxu1 %v8302_v3  ;;  %5919 = vmatprep.mubr.bf16.mxu1 %v9596_v24  ;;  %v8314_v24 = vld [vmem:[%s11187_s1 + $0x148c] ss:$16 sps:$4 sm:$0xff]   ;;  %v8366_v3 = vld [vmem:[%s11187_s1 + $0x17e8] ss:$16 sps:$4 sm:$0xff]  }
 0x2c6   :  { %v5596_v8 = vadd.f32 %v5595_v10, %v10709_v49  ;;  %v8311_v49 = vld [vmem:[%s11187_s1 + $0x130c] ss:$16 sps:$4 sm:$0xff]  }
 0x2c7   :  { %v5597_v39 = vpop.f32.mrf.mxu1  ;;  %5873 = vmatpush2.bf16.msra.mxu0 %v8297_v30  ;;  %v8368_v2 = vld [vmem:[%s11187_s1 + $0x17ec] ss:$16 sps:$4 sm:$0xff]   ;;  %v8369_v30 = vld [vmem:[%s11187_s1 + $0x1548] ss:$16 sps:$4 sm:$0xff]  }
 0x2c8   :  { %5890 = vmatpush1.bf16.msra.mxu1 %v8300_v7  ;;  %5874 = vmatprep.subr.bf16.mxu0 %v8305_v11  ;;  %v8371_v1 = vld [vmem:[%s11187_s1 + $0x154c] ss:$16 sps:$4 sm:$0xff]   ;;  %v8372_v7 = vld [vmem:[%s11187_s1 + $0x17c8] ss:$16 sps:$4 sm:$0xff]  }
 0x2c9   :  { %v5598_v19 = vpop.f32.mrf.mxu1  ;;  %5891 = vmatprep.subr.bf16.mxu1 %v8308_v12  ;;  %v8377_v10 = vld [vmem:[%s11187_s1 + $0x152c] ss:$16 sps:$4 sm:$0xff]   ;;  %v8375_v12 = vld [vmem:[%s11187_s1 + $0x1528] ss:$16 sps:$4 sm:$0xff]  }
 0x2ca   :  { %v8380_v11 = vld [vmem:[%s11187_s1 + $0x17ac] ss:$16 sps:$4 sm:$0xff]   ;;  %v8384_v19 = vld [vmem:[%s11187_s1 + $0x1788] ss:$16 sps:$4 sm:$0xff]  }
 0x2cb   :  { %5875 = vmatpush2.bf16.msra.mxu0 %v8303_v18  ;;  %v8383_v39 = vld [vmem:[%s11187_s1 + $0x150c] ss:$16 sps:$4 sm:$0xff]  }
 0x2cc   :  { %5892 = vmatpush1.bf16.msra.mxu1 %v8306_v16  ;;  %5876 = vmatprep.subr.bf16.mxu0 %v8311_v49  ;;  %v8386_v18 = vld [vmem:[%s11187_s1 + $0x178c] ss:$16 sps:$4 sm:$0xff]   ;;  %v8381_v16 = vld [vmem:[%s11187_s1 + $0x1508] ss:$16 sps:$4 sm:$0xff]  }
 0x2cd   :  { %5893 = vmatprep.subr.bf16.mxu1 %v8314_v24  ;;  %v8389_v49 = vld [vmem:[%s11187_s1 + $0x176c] ss:$16 sps:$4 sm:$0xff]  }
 0x2ce   :  { %v8392_v24 = vld [vmem:[%s11187_s1 + $0x186c] ss:$16 sps:$4 sm:$0xff]  }
 0x2cf   :  { %5877 = vmatpush2.bf16.msra.mxu0 %v8309_v4  ;;  %v8387_v4 = vld [vmem:[%s11187_s1 + $0x1768] ss:$16 sps:$4 sm:$0xff]  }
 0x2d0   :  { %5894 = vmatpush1.bf16.msra.mxu1 %v8312_v54  ;;  %5928 = vmatprep.subr.bf16.mxu0 %v8320_v31  ;;  %v8390_v54 = vld [vmem:[%s11187_s1 + $0x1868] ss:$16 sps:$4 sm:$0xff]   ;;  %v8398_v31 = vld [vmem:[%s11187_s1 + $0x184c] ss:$16 sps:$4 sm:$0xff]  }
 0x2d1   :  { %5895 = vmatprep.subr.bf16.mxu1 %v8317_v38  ;;  %v8395_v38 = vld [vmem:[%s11187_s1 + $0x174c] ss:$16 sps:$4 sm:$0xff]  }
 0x2d2   :  { %v5634_v0 = vpop.f32.mrf.mxu0  ;;  %5879 = vmatmul.mubr.bf16.vlgmr.msra.gmra.mxu0 %v9600_v25  ;;  %v8332_v25 = vld [vmem:[%s11187_s1 + $0x16ac] ss:$16 sps:$4 sm:$0xff]  }
 0x2d3   :  { %v10897_v28 = vadd.f32 %v5634_v0, %v5594_v50  ;;  %5929 = vmatpush1.bf16.msra.mxu0 %v8318_v5  ;;  %5960 = vmatprep.mubr.bf16.mxu0 %v9616_v33  ;;  %v8338_v33 = vld [vmem:[%s11187_s1 + $0x168c] ss:$16 sps:$4 sm:$0xff]  }
 0x2d4   :  { %5896 = vmatpush1.bf16.msra.mxu1 %v8315_v23  ;;  %v5636_v45 = vpop.f32.mrf.mxu0  ;;  %5930 = vmatprep.subr.bf16.mxu0 %v8326_v21  ;;  %v8374_v50 = vld [vmem:[%s11187_s1 + $0x17cc] ss:$16 sps:$4 sm:$0xff]   ;;  %v8396_v21 = vld [vmem:[%s11187_s1 + $0x1848] ss:$16 sps:$4 sm:$0xff]  }
 0x2d5   :  { %5897 = vmatprep.subr.bf16.mxu1 %v8323_v20  ;;  %v10911_v37 = vadd.f32 %v5636_v45, %v5596_v8  ;;  %v8378_v8 = vld [vmem:[%s11187_s1 + $0x17a8] ss:$16 sps:$4 sm:$0xff]  }
 0x2d6   :  { %v5638_v32 = vpop.f32.mrf.mxu0  ;;  %v8393_v20 = vld [vmem:[%s11187_s1 + $0x1748] ss:$16 sps:$4 sm:$0xff]  }
 0x2d7   :  { %5931 = vmatpush1.bf16.msra.mxu0 %v8324_v26  ;;  %v8399_v45 = vld [vmem:[%s11187_s1 + $0x1728] ss:$16 sps:$4 sm:$0xff]  }
 0x2d8   :  { %5898 = vmatpush1.bf16.msra.mxu1 %v8321_v29  ;;  %v5639_v47 = vpop.f32.mrf.mxu0  ;;  %5932 = vmatprep.subr.bf16.mxu0 %v8332_v25  ;;  %v8401_v29 = vld [vmem:[%s11187_s1 + $0x172c] ss:$16 sps:$4 sm:$0xff]   ;;  %v8405_v32 = vld [vmem:[%s11187_s1 + $0x1708] ss:$16 sps:$4 sm:$0xff]  }
 0x2d9   :  { %5899 = vmatprep.subr.bf16.mxu1 %v8329_v36  ;;  %v8402_v36 = vld [vmem:[%s11187_s1 + $0x1828] ss:$16 sps:$4 sm:$0xff]   ;;  %v6011_v47 = vmax.f32 %v10504_v44, 0.0  ;;  %v8414_v44 = vld [vmem:[%s11190_s3 + $0x30] sm:$0xff]  }
 0x2db   :  { %5933 = vmatpush1.bf16.msra.mxu0 %v8330_v35  ;;  %v8411_v35 = vld [vmem:[%s11190_s3 + $0x78] sm:$0xff]  }
 0x2dc   :  { %5900 = vmatpush1.bf16.msra.mxu1 %v8327_v40  ;;  %5934 = vmatprep.subr.bf16.mxu0 %v8338_v33  ;;  %v8408_v40 = vld [vmem:[%s11187_s1 + $0x1808] ss:$16 sps:$4 sm:$0xff]   ;;  %v8413_v33 = vld [vmem:[%s11190_s3 + $0x70] sm:$0xff]  }
 0x2dd   :  { %5901 = vmatprep.subr.bf16.mxu1 %v8335_v41  ;;  %v8412_v41 = vld [vmem:[%s11190_s3 + $0x38] sm:$0xff]  }
 0x2df   :  { %5935 = vmatpush1.bf16.msra.mxu0 %v8336_v53 }
 0x2e0   :  { %5902 = vmatpush1.bf16.msra.mxu1 %v8333_v15  ;;  %5936 = vmatprep.subr.bf16.mxu0 %v8344_v13  ;;  %v6015_v15 = vpack.c.bf16 %v6011_v47, %v6011_v47 }
 0x2e1   :  { %5903 = vmatprep.subr.bf16.mxu1 %v8341_v48 }
 0x2e3   :  { %5937 = vmatpush1.bf16.msra.mxu0 %v8342_v46 }
 0x2e4   :  { %5904 = vmatpush2.bf16.msra.mxu1 %v8339_v59  ;;  %5938 = vmatprep.subr.bf16.mxu0 %v8350_v51  ;;  %v8415_v59 = vld [vmem:[%s11190_s3 + $0x68] sm:$0xff]   ;;  %v8417_v51 = vld [vmem:[%s11190_s3 + $0x60] sm:$0xff]  }
 0x2e5   :  { %5905 = vmatprep.subr.bf16.mxu1 %v8347_v22 }
 0x2e7   :  { %5939 = vmatpush1.bf16.msra.mxu0 %v8348_v55  ;;  %v8428_v55 = vld [vmem:[%s11190_s3 + $0xb8] sm:$0xff]  }
 0x2e8   :  { %5906 = vmatpush2.bf16.msra.mxu1 %v8345_v56  ;;  %5940 = vmatprep.subr.bf16.mxu0 %v8356_v61  ;;  %v8427_v56 = vld [vmem:[%s11190_s3 + $0xf8] sm:$0xff]  }
 0x2e9   :  { %5907 = vmatprep.subr.bf16.mxu1 %v8353_v58  ;;  %v8418_v58 = vld [vmem:[%s11190_s3 + $0x20] sm:$0xff]   ;;  %v8419_v61 = vld [vmem:[%s11190_s3 + $0x58] sm:$0xff]  }
 0x2eb   :  { %5941 = vmatpush1.bf16.msra.mxu0 %v8354_v57  ;;  %v8421_v57 = vld [vmem:[%s11190_s3 + $0x50] sm:$0xff]  }
 0x2ec   :  { %5908 = vmatpush2.bf16.msra.mxu1 %v8351_v42  ;;  %5942 = vmatprep.subr.bf16.mxu0 %v8362_v17  ;;  %v8420_v42 = vld [vmem:[%s11190_s3 + $0x18] sm:$0xff]   ;;  %v8423_v17 = vld [vmem:[%s11190_s3 + $0x48] sm:$0xff]  }
 0x2ed   :  { %5909 = vmatprep.subr.bf16.mxu1 %v8359_v62  ;;  %v8422_v62 = vld [vmem:[%s11190_s3 + $0x10] sm:$0xff]  }
 0x2ef   :  { %5943 = vmatpush1.bf16.msra.mxu0 %v8360_v60  ;;  %v8425_v60 = vld [vmem:[%s11190_s3 + $0x40] sm:$0xff]  }
 0x2f0   :  { %5910 = vmatpush2.bf16.msra.mxu1 %v8357_v6  ;;  %5944 = vmatprep.subr.bf16.mxu0 %v8368_v2  ;;  %v8424_v6 = vld [vmem:[%s11190_s3 + $0x8] sm:$0xff]   ;;  %v6010_v2 = vmax.f32 %v10490_v34, 0.0 }
 0x2f1   :  { %5911 = vmatprep.subr.bf16.mxu1 %v8365_v63  ;;  %v8426_v63 = vld [vmem:[%s11190_s3] sm:$0xff]   ;;  %v8431_v34 = vld [vmem:[%s11190_s3 + $0xe8] sm:$0xff]  }
 0x2f3   :  { %5945 = vmatpush2.bf16.msra.mxu0 %v8366_v3  ;;  %v8429_v3 = vld [vmem:[%s11190_s3 + $0xf0] sm:$0xff]  }
 0x2f4   :  { %5912 = vmatpush2.bf16.msra.mxu1 %v8363_v43  ;;  %5946 = vmatprep.subr.bf16.mxu0 %v8374_v50  ;;  %v6014_v43 = vpack.c.bf16 %v6010_v2, %v6010_v2 }
 0x2f5   :  { %5913 = vmatprep.subr.bf16.mxu1 %v8371_v1  ;;  %v8430_v1 = vld [vmem:[%s11190_s3 + $0xb0] sm:$0xff]  }
 0x2f7   :  { %5947 = vmatpush2.bf16.msra.mxu0 %v8372_v7 }
 0x2f8   :  { %5914 = vmatpush2.bf16.msra.mxu1 %v8369_v30  ;;  %5948 = vmatprep.subr.bf16.mxu0 %v8380_v11  ;;  %v8432_v11 = vld [vmem:[%s11190_s3 + $0xa8] sm:$0xff]  }
 0x2f9   :  { %5915 = vmatprep.subr.bf16.mxu1 %v8377_v10 }
 0x2fb   :  { %5949 = vmatpush2.bf16.msra.mxu0 %v8378_v8 }
 0x2fc   :  { %5916 = vmatpush2.bf16.msra.mxu1 %v8375_v12  ;;  %5950 = vmatprep.subr.bf16.mxu0 %v8386_v18  ;;  %v8434_v18 = vld [vmem:[%s11190_s3 + $0xa0] sm:$0xff]  }
 0x2fd   :  { %5917 = vmatprep.subr.bf16.mxu1 %v8383_v39  ;;  %v8433_v39 = vld [vmem:[%s11190_s3 + $0xe0] sm:$0xff]  }
 0x2ff   :  { %5951 = vmatpush2.bf16.msra.mxu0 %v8384_v19  ;;  %v8436_v19 = vld [vmem:[%s11190_s3 + $0x98] sm:$0xff]  }
 0x300   :  { %5918 = vmatpush2.bf16.msra.mxu1 %v8381_v16  ;;  %5952 = vmatprep.subr.bf16.mxu0 %v8389_v49  ;;  %v8435_v16 = vld [vmem:[%s11190_s3 + $0xd8] sm:$0xff]   ;;  %v8437_v49 = vld [vmem:[%s11190_s3 + $0xd0] sm:$0xff]  }
 0x301   :  { %5977 = vmatprep.subr.bf16.mxu1 %v8392_v24  ;;  %v8438_v24 = vld [vmem:[%s11190_s3 + $0x90] sm:$0xff]  }
 0x303   :  { %v5675_v23 = vpop.f32.mrf.mxu1  ;;  %5920 = vmatmul.mubr.bf16.vlgmr.msra.gmra.mxu1 %v9792_v14  ;;  %5953 = vmatpush2.bf16.msra.mxu0 %v8387_v4  ;;  %v8404_v14 = vld [vmem:[%s11187_s1 + $0x182c] ss:$16 sps:$4 sm:$0xff]  }
 0x304   :  { %v5676_v5 = vadd.f32 %v5675_v23, %v10897_v28  ;;  %5978 = vmatpush1.bf16.msra.mxu1 %v8390_v54  ;;  %5954 = vmatprep.subr.bf16.mxu0 %v8395_v38 }
 0x305   :  { %v5677_v0 = vpop.f32.mrf.mxu1  ;;  %5979 = vmatprep.subr.bf16.mxu1 %v8398_v31  ;;  %6001 = vmatprep.mubr.bf16.mxu1 %v8445_v52  ;;  %v8410_v52 = vld [vmem:[%s11187_s1 + $0x180c] ss:$16 sps:$4 sm:$0xff]  }
 0x306   :  { %v5678_v28 = vadd.f32 %v5677_v0, %v10911_v37  ;;  %v8407_v37 = vld [vmem:[%s11187_s1 + $0x170c] ss:$16 sps:$4 sm:$0xff]   ;;  %v8441_v0 = vld [vmem:[%s11190_s3 + $0xc0] sm:$0xff]  }
 0x307   :  { %v5679_v26 = vpop.f32.mrf.mxu1  ;;  %5955 = vmatpush2.bf16.msra.mxu0 %v8393_v20  ;;  %v8439_v31 = vld [vmem:[%s11190_s3 + $0xc8] sm:$0xff]  }
 0x308   :  { %5980 = vmatpush1.bf16.msra.mxu1 %v8396_v21  ;;  %5956 = vmatprep.subr.bf16.mxu0 %v8401_v29  ;;  %v8442_v29 = vld [vmem:[%s11190_s3 + $0x80] sm:$0xff]  }
 0x309   :  { %v5680_v25 = vpop.f32.mrf.mxu1  ;;  %5981 = vmatprep.subr.bf16.mxu1 %v8404_v14 }
 0x30b   :  { %5957 = vmatpush2.bf16.msra.mxu0 %v8399_v45 }
 0x30c   :  { %5982 = vmatpush1.bf16.msra.mxu1 %v8402_v36  ;;  %5958 = vmatprep.subr.bf16.mxu0 %v8407_v37 }
 0x30d   :  { %5983 = vmatprep.subr.bf16.mxu1 %v8410_v52 }
 0x30f   :  { %5959 = vmatpush2.bf16.msra.mxu0 %v8405_v32 }
 0x310   :  { %5984 = vmatpush1.bf16.msra.mxu1 %v8408_v40  ;;  %7186 = vmatprep.subr.bf16.mxu0 %v8411_v35 }
 0x311   :  { %7208 = vmatprep.subr.bf16.mxu1 %v8427_v56 }
 0x312   :  { %v5716_v53 = vpop.f32.mrf.mxu0  ;;  %5961 = vmatmul.mubr.bf16.vlgmr.msra.gmra.mxu0 %v9814_v27  ;;  %v8416_v27 = vld [vmem:[%s11190_s3 + $0x28] sm:$0xff]  }
 0x313   :  { %7152 = vmatmul.mubr.msk.bf16.vlgmr.msra.gmra.mxu1 %vm4940_vm0, %v9878_v9  ;;  %v5717_v48 = vadd.f32 %v5716_v53, %v5676_v5  ;;  %7187 = vmatpush3.bf16.msra.mxu0 %v8412_v41  ;;  %v8440_v5 = vld [vmem:[%s11190_s3 + $0x88] sm:$0xff]  }
 0x314   :  { %6313 = vmatprep.mubr.bf16.mxu0 %v6015_v15  ;;  %v5718_v13 = vpop.f32.mrf.mxu0  ;;  %7188 = vmatprep.subr.bf16.mxu0 %v8413_v33 }
 0x315   :  { %v5719_v46 = vadd.f32 %v5718_v13, %v5678_v28  ;;  %7209 = vmatpush3.bf16.msra.mxu1 %v8428_v55 }
 0x316   :  { %v5720_v22 = vpop.f32.mrf.mxu0  ;;  %7210 = vmatprep.subr.bf16.mxu1 %v8429_v3 }
 0x317   :  { %7189 = vmatpush3.bf16.msra.mxu0 %v8414_v44 }
 0x318   :  { %v5721_v9 = vpop.f32.mrf.mxu0  ;;  %7190 = vmatprep.subr.bf16.mxu0 %v8415_v59 }
 0x319   :  { %7211 = vmatpush3.bf16.msra.mxu1 %v8430_v1  ;;  %v7153_v1 = vld [vmem:[%s11191_s4] ss:$0 sm:$0xff] }
 0x31a   :  { %7212 = vmatprep.subr.bf16.mxu1 %v8431_v34 }
 0x31b   :  { %7191 = vmatpush3.bf16.msra.mxu0 %v8416_v27 }
 0x31c   :  { %7192 = vmatprep.subr.bf16.mxu0 %v8417_v51 }
 0x31d   :  { %7213 = vmatpush3.bf16.msra.mxu1 %v8432_v11 }
 0x31e   :  { %7214 = vmatprep.subr.bf16.mxu1 %v8433_v39 }
 0x31f   :  { %7193 = vmatpush3.bf16.msra.mxu0 %v8418_v58 }
 0x320   :  { %7194 = vmatprep.subr.bf16.mxu0 %v8419_v61 }
 0x321   :  { %7215 = vmatpush3.bf16.msra.mxu1 %v8434_v18 }
 0x322   :  { %7216 = vmatprep.subr.bf16.mxu1 %v8435_v16 }
 0x323   :  { %7195 = vmatpush3.bf16.msra.mxu0 %v8420_v42 }
 0x324   :  { %7196 = vmatprep.subr.bf16.mxu0 %v8421_v57 }
 0x325   :  { %7217 = vmatpush3.bf16.msra.mxu1 %v8436_v19 }
 0x326   :  { %7218 = vmatprep.subr.bf16.mxu1 %v8437_v49 }
 0x327   :  { %7197 = vmatpush3.bf16.msra.mxu0 %v8422_v62 }
 0x328   :  { %7198 = vmatprep.subr.bf16.mxu0 %v8423_v17 }
 0x329   :  { %7219 = vmatpush3.bf16.msra.mxu1 %v8438_v24 }
 0x32a   :  { %7220 = vmatprep.subr.bf16.mxu1 %v8439_v31 }
 0x32b   :  { %7199 = vmatpush3.bf16.msra.mxu0 %v8424_v6 }
 0x32c   :  { %7200 = vmatprep.subr.bf16.mxu0 %v8425_v60 }
 0x32d   :  { %7221 = vmatpush3.bf16.msra.mxu1 %v8440_v5 }
 0x32e   :  { %7222 = vmatprep.subr.bf16.mxu1 %v8441_v0 }
 0x32f   :  { %7201 = vmatpush3.bf16.msra.mxu0 %v8426_v63 }
 0x331   :  { %7223 = vmatpush3.bf16.msra.mxu1 %v8442_v29 }
 0x332   :  { %6314 = vmatmul.mubr.bf16.vlgmr.msra.gmra.mxu0 %v6014_v43 }
 0x343   :  { %v5757_v50 = vpop.f32.mrf.mxu1 }
 0x344   :  { %v5758_v30 = vadd.f32 %v5757_v50, %v5717_v48 }
 0x345   :  { %v5759_v7 = vpop.f32.mrf.mxu1 }
 0x346   :  { %v5760_v10 = vadd.f32 %v5759_v7, %v5719_v46 }
 0x347   :  { %v5761_v12 = vpop.f32.mrf.mxu1 }
 0x349   :  { %v5762_v8 = vpop.f32.mrf.mxu1 }
 0x352   :  { %v5798_v4 = vpop.f32.mrf.mxu0 }
 0x353   :  { %v5799_v54 = vadd.f32 %v5798_v4, %v5758_v30 }
 0x354   :  { %v5800_v38 = vpop.f32.mrf.mxu0 }
 0x355   :  { %v5801_v23 = vadd.f32 %v5800_v38, %v5760_v10 }
 0x356   :  { %v5802_v20 = vpop.f32.mrf.mxu0 }
 0x358   :  { %v5803_v21 = vpop.f32.mrf.mxu0 }
 0x383   :  { %v5839_v14 = vpop.f32.mrf.mxu1 }
 0x384   :  { %v5840_v28 = vadd.f32 %v5839_v14, %v5799_v54 }
 0x385   :  { %v5841_v26 = vpop.f32.mrf.mxu1 }
 0x386   :  { %v5842_v45 = vadd.f32 %v5841_v26, %v5801_v23 }
 0x387   :  { %v5843_v36 = vpop.f32.mrf.mxu1 }
 0x389   :  { %v5844_v25 = vpop.f32.mrf.mxu1 }
 0x392   :  { %v5880_v37 = vpop.f32.mrf.mxu0 }
 0x393   :  { %v5881_v15 = vadd.f32 %v5880_v37, %v5840_v28 }
 0x394   :  { %v5882_v52 = vpop.f32.mrf.mxu0 }
 0x395   :  { %v5883_v53 = vadd.f32 %v5882_v52, %v5842_v45 }
 0x396   :  { %v5884_v32 = vpop.f32.mrf.mxu0 }
 0x398   :  { %v5885_v40 = vpop.f32.mrf.mxu0 }
 0x3c3   :  { %v5921_v35 = vpop.f32.mrf.mxu1 }
 0x3c4   :  { %v5922_v48 = vadd.f32 %v5921_v35, %v5881_v15 }
 0x3c5   :  { %v5923_v47 = vpop.f32.mrf.mxu1 }
 0x3c6   :  { %v5924_v59 = vadd.f32 %v5923_v47, %v5883_v53 }
 0x3c7   :  { %v5925_v41 = vpop.f32.mrf.mxu1 }
 0x3c9   :  { %v5926_v33 = vpop.f32.mrf.mxu1 }
 0x3d2   :  { %v5962_v44 = vpop.f32.mrf.mxu0 }
 0x3d3   :  { %v6003_v13 = vpop.f32.mrf.mxu1  ;;  %v5963_v46 = vadd.f32 %v5962_v44, %v5922_v48 }
 0x3d4   :  { %v5964_v22 = vpop.f32.mrf.mxu0 }
 0x3d5   :  { %v6005_v27 = vpop.f32.mrf.mxu1  ;;  %v6004_v9 = vadd.f32 %v6003_v13, %v5963_v46  ;;  %v5965_v51 = vadd.f32 %v5964_v22, %v5924_v59 }
 0x3d6   :  { %v5966_v56 = vpop.f32.mrf.mxu0 }
 0x3d7   :  { %v6007_v55 = vpop.f32.mrf.mxu1  ;;  %v6006_v58 = vadd.f32 %v6005_v27, %v5965_v51  ;;  %v6012_v61 = vmax.f32 %v6004_v9, 0.0 }
 0x3d8   :  { %v5967_v42 = vpop.f32.mrf.mxu0 }
 0x3d9   :  { %v6008_v57 = vpop.f32.mrf.mxu1  ;;  %v6013_v62 = vmax.f32 %v6006_v58, 0.0  ;;  %v6016_v6 = vpack.c.bf16 %v6012_v61, %v6012_v61 }
 0x3db   :  { %v6017_v17 = vpack.c.bf16 %v6013_v62, %v6013_v62 }
 0x3dd   :  { %6353 = vmatprep.mubr.bf16.mxu1 %v6017_v17 }
 0x3de   :  { %6354 = vmatmul.mubr.bf16.vlgmr.msra.gmra.mxu1 %v6016_v6 }
 0x3f2   :  { %v7202_v60 = vpop.f32.mrf.mxu0 }
 0x3f4   :  { %v7203_v63 = vpop.f32.mrf.mxu0 }
 0x3f5   :  { %v7204_v2 = vadd.f32 %v7203_v63, %v7202_v60 }
 0x3f6   :  { %v7205_v43 = vpop.f32.mrf.mxu0 }
 0x3f7   :  { %v6316_v7 = vadd.f32 %v7204_v2, %v7153_v1 }
 0x3f8   :  { %v7206_v3 = vpop.f32.mrf.mxu0 }
 0x49e   :  { %v7224_v50 = vpop.f32.mrf.mxu1 }
 0x4a0   :  { %v7225_v30 = vpop.f32.mrf.mxu1 }
 0x4a1   :  { %v7226_v34 = vadd.f32 %v7225_v30, %v7224_v50 }
 0x4a2   :  { %v7227_v10 = vpop.f32.mrf.mxu1 }
 0x4a3   :  { %v6356_v11 = vadd.f32 %v7226_v34, %v6316_v7 }
 0x4a4   :  { %v7228_v12 = vpop.f32.mrf.mxu1 }
 0x4a5   :  { %6361 = vst [vmem:[%s11192_s5] sm:$0x3] %v6356_v11 }

</bundles_post_ra>
